<compile_context>
chip_gen: v5e
topology: v5e:2x2
jax: 0.10.0
libtpu: 0.0.40
codegen_flags: <defaults>
</compile_context>

<pallas_src>
import functools

import jax
import jax.numpy as jnp
from jax.experimental import pallas as pl
from jax.experimental.pallas import tpu as pltpu

LATENT = 7
LATENT_PAD = 8
HEAD_PAD = 128          # lane-dense mu|logvar output slab width


def _round_up(n, m):
    return ((n + m - 1) // m) * m


def _cdiv(a, b):
    return -(-a // b)


# --------------------------------------------------------------------------
# Pallas kernel: full VAE forward (encode + reparameterize + decode)
# --------------------------------------------------------------------------
def vae_sk_kernel(
    x_ref, eps_ref,
    w1, b1, w2, b2, w3, b3, w4, b4,
    whead, bhead,                      # fused fc51|fc52, padded to 128 lanes
    w6, b6, w7, b7, w8, b8, w9, b9, w10, b10,
    recon_ref, head_ref,
):
    f32 = jnp.float32
    bf16 = jnp.bfloat16

    def linear(h_bf16, w_ref, b_ref):
        # bf16 MXU inputs, f32 accumulation, f32 bias add.
        return jnp.dot(h_bf16, w_ref[...], preferred_element_type=f32) + b_ref[...]

    def relu_bf16(h):
        # Fused ReLU + downcast for the next matmul's LHS.
        return jnp.maximum(h, 0.0).astype(bf16)

    x = x_ref[...]                         # already bf16 (cast in wrapper)

    # ---- encoder ----
    h = relu_bf16(linear(x, w1, b1))       # (tb, 512)
    h = relu_bf16(linear(h, w2, b2))       # (tb, 256)
    h = relu_bf16(linear(h, w3, b3))       # (tb, 128)
    h = relu_bf16(linear(h, w4, b4))       # (tb, 64)

    head = linear(h, whead, bhead)         # (tb, 128) = [mu_pad | logvar_pad | zeros]
    mu = head[:, :LATENT_PAD]              # (tb, 8), col 7 is zero
    logvar = head[:, LATENT_PAD:2 * LATENT_PAD]  # (tb, 8), col 7 is zero

    # ---- reparameterize (f32) ----
    std = jnp.exp(0.5 * logvar)
    z = mu + eps_ref[...] * std            # (tb, 8); eps col 7 zero => z col 7 zero

    # ---- decoder ----
    h = relu_bf16(linear(z.astype(bf16), w6, b6))   # (tb, 64)   (w6 row 7 zero)
    h = relu_bf16(linear(h, w7, b7))                # (tb, 128)
    h = relu_bf16(linear(h, w8, b8))                # (tb, 256)
    h = relu_bf16(linear(h, w9, b9))                # (tb, 512)
    recon = linear(h, w10, b10)                     # (tb, out_pad), lane-dense

    recon_ref[...] = recon.astype(recon_ref.dtype)
    head_ref[...] = head.astype(head_ref.dtype)


# --------------------------------------------------------------------------
# Parameter construction (deterministic, PyTorch nn.Linear-style init, f32)
# Weights stored as (in, out) so the kernel does x @ W; biases (1, out).
# --------------------------------------------------------------------------
LAYER_DIMS = [
    ("fc1", None, 512),
    ("fc2", 512, 256),
    ("fc3", 256, 128),
    ("fc4", 128, 64),
    ("fc51", 64, LATENT),
    ("fc52", 64, LATENT),
    ("fc6", LATENT, 64),
    ("fc7", 64, 128),
    ("fc8", 128, 256),
    ("fc9", 256, 512),
    ("fc10", 512, None),
]


def make_params(key, input_dim, output_dim):
    params = []
    for _, fin, fout in LAYER_DIMS:
        fin = input_dim if fin is None else fin
        fout = output_dim if fout is None else fout
        key, kw, kb = jax.random.split(key, 3)
        bound = 1.0 / jnp.sqrt(jnp.float32(fin))
        w = jax.random.uniform(kw, (fin, fout), jnp.float32, -bound, bound)
        b = jax.random.uniform(kb, (1, fout), jnp.float32, -bound, bound)
        params.append((w, b))
    return params


def _prepare_params(params, out_pad):
    """Fuse/pad/cast the f32 (in,out) params into the kernel's flat arg tuple."""
    (w1, b1), (w2, b2), (w3, b3), (w4, b4), \
        (w51, b51), (w52, b52), \
        (w6, b6), (w7, b7), (w8, b8), (w9, b9), (w10, b10) = params
    bf16 = jnp.bfloat16

    def pad_cols(a, n):
        return jnp.pad(a, ((0, 0), (0, n - a.shape[1])))

    # Fused, lane-dense mu|logvar head: (64, 128).
    # Layout: cols [0:8) = mu (7 real + 1 zero), [8:16) = logvar, [16:128) zeros.
    whead = pad_cols(
        jnp.concatenate([pad_cols(w51, LATENT_PAD), pad_cols(w52, LATENT_PAD)], axis=1),
        HEAD_PAD)
    bhead = pad_cols(
        jnp.concatenate([pad_cols(b51, LATENT_PAD), pad_cols(b52, LATENT_PAD)], axis=1),
        HEAD_PAD)

    # fc6 input padded 7 -> 8 (extra row is zero; z's padded column is zero anyway).
    w6p = jnp.pad(w6, ((0, LATENT_PAD - LATENT), (0, 0)))

    # fc10 output padded to a lane-dense multiple of 128.
    w10p = pad_cols(w10, out_pad)
    b10p = pad_cols(b10, out_pad)

    flat = (
        w1.astype(bf16), b1, w2.astype(bf16), b2,
        w3.astype(bf16), b3, w4.astype(bf16), b4,
        whead.astype(bf16), bhead,
        w6p.astype(bf16), b6, w7.astype(bf16), b7,
        w8.astype(bf16), b8, w9.astype(bf16), b9,
        w10p.astype(bf16), b10p,
    )
    return flat


# --------------------------------------------------------------------------
# Wrapper
# --------------------------------------------------------------------------
@functools.partial(jax.jit, static_argnames=("max_tile_b",))
def vae_sk_forward(x, eps, params, *, max_tile_b=1024):
    B, input_dim = x.shape
    output_dim = params[-1][0].shape[1]
    out_pad = _round_up(output_dim, 128)

    flat = _prepare_params(params, out_pad)

    # ---- adaptive batch tiling ----
    # * cap tile at max_tile_b (v7x-safe; plenty of MXU streaming on v5e/v6e),
    # * >= 2 grid steps when possible so v7x's two TensorCores both get work,
    # * pick the smallest tile that covers B in n_steps to minimize pad waste,
    # * round to 16 rows (safe sublane granularity for the bf16 x tile).
    min_steps = 2 if B >= 32 else 1
    n_steps = max(_cdiv(B, max_tile_b), min_steps)
    tile_b = _round_up(_cdiv(B, n_steps), 16)
    Bp = tile_b * n_steps
    grid = (n_steps,)

    # Padded batch rows are garbage (bias-only activations -> finite), sliced off.
    xp = jnp.pad(x, ((0, Bp - B), (0, 0))).astype(jnp.bfloat16)
    epsp = jnp.pad(eps, ((0, Bp - B), (0, LATENT_PAD - eps.shape[1])))

    # Weights/biases: whole arrays resident in VMEM for the entire call
    # (no per-step pipelining / double-buffering for constant operands).
    weight_spec = pl.BlockSpec(memory_space=pltpu.MemorySpace.VMEM)
    in_specs = [
        pl.BlockSpec((tile_b, input_dim), lambda i: (i, 0)),     # x tile (bf16)
        pl.BlockSpec((tile_b, LATENT_PAD), lambda i: (i, 0)),    # eps tile (f32)
    ] + [weight_spec] * len(flat)

    out_shapes = (
        jax.ShapeDtypeStruct((Bp, out_pad), jnp.float32),        # recon (padded)
        jax.ShapeDtypeStruct((Bp, HEAD_PAD), jnp.float32),       # mu|logvar slab
    )
    out_specs = (
        pl.BlockSpec((tile_b, out_pad), lambda i: (i, 0)),
        pl.BlockSpec((tile_b, HEAD_PAD), lambda i: (i, 0)),
    )

    # Advisory cost estimate.
    mm_dims = [(input_dim, 512), (512, 256), (256, 128), (128, 64),
               (64, HEAD_PAD),
               (LATENT_PAD, 64), (64, 128), (128, 256), (256, 512),
               (512, out_pad)]
    flops = 2 * Bp * sum(a * b for a, b in mm_dims)
    bytes_accessed = (
        sum(int(p.size) * p.dtype.itemsize for p in flat)
        + xp.size * 2 + epsp.size * 4
        + Bp * out_pad * 4 + Bp * HEAD_PAD * 4
    )
    cost = pl.CostEstimate(flops=flops,
                           transcendentals=Bp * LATENT_PAD,
                           bytes_accessed=bytes_accessed)

    recon_p, head = pl.pallas_call(
        vae_sk_kernel,
        out_shape=out_shapes,
        grid=grid,
        in_specs=in_specs,
        out_specs=out_specs,
        compiler_params=pltpu.CompilerParams(
            dimension_semantics=("parallel",),
            vmem_limit_bytes=32 << 20,
        ),
        cost_estimate=cost,
    )(xp, epsp, *flat)

    recon = recon_p[:B, :output_dim]
    mu = head[:B, :LATENT]
    logvar = head[:B, LATENT_PAD:LATENT_PAD + LATENT]
    return recon, mu, logvar


# --------------------------------------------------------------------------
# Pure-JAX reference (same bf16-input / f32-accumulate numerics as the kernel)
# --------------------------------------------------------------------------
def vae_sk_reference(x, eps, params):
    bf16 = jnp.bfloat16

    def lin(h, p):
        return jnp.dot(h.astype(bf16), p[0].astype(bf16),
                       preferred_element_type=jnp.float32) + p[1]

    relu = lambda h: jnp.maximum(h, 0.0)
    h = x
    for p in params[:4]:
        h = relu(lin(h, p))
    mu = lin(h, params[4])
    logvar = lin(h, params[5])
    z = mu + eps * jnp.exp(0.5 * logvar)
    h = z
    for p in params[6:10]:
        h = relu(lin(h, p))
    recon = lin(h, params[10])
    return recon, mu, logvar


# --------------------------------------------------------------------------
if __name__ == "__main__":
    INPUT_DIM = 32
    OUTPUT_DIM = 32
    BATCH = 128     # adaptive tiling -> 2 grid steps of 64 rows (both TCs on v7x)

    key = jax.random.PRNGKey(0)
    key, kx, keps, kparam = jax.random.split(key, 4)

    x = jax.random.normal(kx, (BATCH, INPUT_DIM), jnp.float32)
    eps = jax.random.normal(keps, (BATCH, LATENT), jnp.float32)  # randn_like(std)

    params = make_params(kparam, INPUT_DIM, OUTPUT_DIM)

    recon, mu, logvar = vae_sk_forward(x, eps, params)
    jax.block_until_ready((recon, mu, logvar))

    # correctness check vs pure-JAX reference (same bf16/f32 mixed precision)
    r_ref, mu_ref, lv_ref = vae_sk_reference(x, eps, params)
    assert recon.shape == (BATCH, OUTPUT_DIM)
    assert mu.shape == (BATCH, LATENT) and logvar.shape == (BATCH, LATENT)
    assert jnp.allclose(recon, r_ref, atol=5e-2, rtol=5e-2)
    assert jnp.allclose(mu, mu_ref, atol=2e-2, rtol=2e-2)
    assert jnp.allclose(logvar, lv_ref, atol=2e-2, rtol=2e-2)

    print("KERNEL_OK")
</pallas_src>

<mosaic_0001>
module attributes {stable_mosaic.version = 11 : i64} {
  func.func @vae_sk_kernel(%arg0: i32, %arg1: memref<64x32xbf16, #tpu.memory_space<vmem>>, %arg2: memref<64x8xf32, #tpu.memory_space<vmem>>, %arg3: memref<32x512xbf16, #tpu.memory_space<vmem>>, %arg4: memref<1x512xf32, #tpu.memory_space<vmem>>, %arg5: memref<512x256xbf16, #tpu.memory_space<vmem>>, %arg6: memref<1x256xf32, #tpu.memory_space<vmem>>, %arg7: memref<256x128xbf16, #tpu.memory_space<vmem>>, %arg8: memref<1x128xf32, #tpu.memory_space<vmem>>, %arg9: memref<128x64xbf16, #tpu.memory_space<vmem>>, %arg10: memref<1x64xf32, #tpu.memory_space<vmem>>, %arg11: memref<64x128xbf16, #tpu.memory_space<vmem>>, %arg12: memref<1x128xf32, #tpu.memory_space<vmem>>, %arg13: memref<8x64xbf16, #tpu.memory_space<vmem>>, %arg14: memref<1x64xf32, #tpu.memory_space<vmem>>, %arg15: memref<64x128xbf16, #tpu.memory_space<vmem>>, %arg16: memref<1x128xf32, #tpu.memory_space<vmem>>, %arg17: memref<128x256xbf16, #tpu.memory_space<vmem>>, %arg18: memref<1x256xf32, #tpu.memory_space<vmem>>, %arg19: memref<256x512xbf16, #tpu.memory_space<vmem>>, %arg20: memref<1x512xf32, #tpu.memory_space<vmem>>, %arg21: memref<512x128xbf16, #tpu.memory_space<vmem>>, %arg22: memref<1x128xf32, #tpu.memory_space<vmem>>, %arg23: memref<64x128xf32, #tpu.memory_space<vmem>>, %arg24: memref<64x128xf32, #tpu.memory_space<vmem>>) attributes {dimension_semantics = [#tpu.dimension_semantics<parallel>], iteration_bounds = array<i64: 2>, scalar_prefetch = 0 : i64, scratch_operands = 0 : i64, tpu.core_type = #tpu.core_type<tc>, window_params = [{transform_indices = @transform_0, window_bounds = array<i64: 64, 32>}, {transform_indices = @transform_1, window_bounds = array<i64: 64, 8>}, {pipeline_mode = #tpu.pipeline_mode<synchronous>, transform_indices = @transform_2, window_bounds = array<i64: 32, 512>}, {pipeline_mode = #tpu.pipeline_mode<synchronous>, transform_indices = @transform_3, window_bounds = array<i64: 1, 512>}, {pipeline_mode = #tpu.pipeline_mode<synchronous>, transform_indices = @transform_4, window_bounds = array<i64: 512, 256>}, {pipeline_mode = #tpu.pipeline_mode<synchronous>, transform_indices = @transform_5, window_bounds = array<i64: 1, 256>}, {pipeline_mode = #tpu.pipeline_mode<synchronous>, transform_indices = @transform_6, window_bounds = array<i64: 256, 128>}, {pipeline_mode = #tpu.pipeline_mode<synchronous>, transform_indices = @transform_7, window_bounds = array<i64: 1, 128>}, {pipeline_mode = #tpu.pipeline_mode<synchronous>, transform_indices = @transform_8, window_bounds = array<i64: 128, 64>}, {pipeline_mode = #tpu.pipeline_mode<synchronous>, transform_indices = @transform_9, window_bounds = array<i64: 1, 64>}, {pipeline_mode = #tpu.pipeline_mode<synchronous>, transform_indices = @transform_10, window_bounds = array<i64: 64, 128>}, {pipeline_mode = #tpu.pipeline_mode<synchronous>, transform_indices = @transform_11, window_bounds = array<i64: 1, 128>}, {pipeline_mode = #tpu.pipeline_mode<synchronous>, transform_indices = @transform_12, window_bounds = array<i64: 8, 64>}, {pipeline_mode = #tpu.pipeline_mode<synchronous>, transform_indices = @transform_13, window_bounds = array<i64: 1, 64>}, {pipeline_mode = #tpu.pipeline_mode<synchronous>, transform_indices = @transform_14, window_bounds = array<i64: 64, 128>}, {pipeline_mode = #tpu.pipeline_mode<synchronous>, transform_indices = @transform_15, window_bounds = array<i64: 1, 128>}, {pipeline_mode = #tpu.pipeline_mode<synchronous>, transform_indices = @transform_16, window_bounds = array<i64: 128, 256>}, {pipeline_mode = #tpu.pipeline_mode<synchronous>, transform_indices = @transform_17, window_bounds = array<i64: 1, 256>}, {pipeline_mode = #tpu.pipeline_mode<synchronous>, transform_indices = @transform_18, window_bounds = array<i64: 256, 512>}, {pipeline_mode = #tpu.pipeline_mode<synchronous>, transform_indices = @transform_19, window_bounds = array<i64: 1, 512>}, {pipeline_mode = #tpu.pipeline_mode<synchronous>, transform_indices = @transform_20, window_bounds = array<i64: 512, 128>}, {pipeline_mode = #tpu.pipeline_mode<synchronous>, transform_indices = @transform_21, window_bounds = array<i64: 1, 128>}, {transform_indices = @transform_22, window_bounds = array<i64: 64, 128>}, {transform_indices = @transform_23, window_bounds = array<i64: 64, 128>}]} {
    %c0 = arith.constant 0 : index
    %c0_0 = arith.constant 0 : index
    %0 = vector.load %arg1[%c0, %c0_0] : memref<64x32xbf16, #tpu.memory_space<vmem>>, vector<64x32xbf16>
    %c0_1 = arith.constant 0 : index
    %c0_2 = arith.constant 0 : index
    %1 = vector.load %arg3[%c0_1, %c0_2] : memref<32x512xbf16, #tpu.memory_space<vmem>>, vector<32x512xbf16>
    %cst = arith.constant dense<0.000000e+00> : vector<64x512xf32>
    %2 = tpu.matmul %0, %1, %cst {dimension_numbers = #tpu.dot_dimension_numbers<[1], [0], [0], [1], [0, 0, 1, 1], [], []>} : vector<64x32xbf16>, vector<32x512xbf16>, vector<64x512xf32> -> vector<64x512xf32>
    %c0_3 = arith.constant 0 : index
    %c0_4 = arith.constant 0 : index
    %3 = vector.load %arg4[%c0_3, %c0_4] : memref<1x512xf32, #tpu.memory_space<vmem>>, vector<1x512xf32>
    %4 = vector.broadcast %3 : vector<1x512xf32> to vector<64x512xf32>
    %5 = arith.addf %2, %4 : vector<64x512xf32>
    %cst_5 = arith.constant 0.000000e+00 : f32
    %6 = vector.broadcast %cst_5 : f32 to vector<64x512xf32>
    %7 = arith.maximumf %5, %6 : vector<64x512xf32>
    %8 = arith.truncf %7 : vector<64x512xf32> to vector<64x512xbf16>
    %c0_6 = arith.constant 0 : index
    %c0_7 = arith.constant 0 : index
    %9 = vector.load %arg5[%c0_6, %c0_7] : memref<512x256xbf16, #tpu.memory_space<vmem>>, vector<512x256xbf16>
    %cst_8 = arith.constant dense<0.000000e+00> : vector<64x256xf32>
    %10 = tpu.matmul %8, %9, %cst_8 {dimension_numbers = #tpu.dot_dimension_numbers<[1], [0], [0], [1], [0, 0, 1, 1], [], []>} : vector<64x512xbf16>, vector<512x256xbf16>, vector<64x256xf32> -> vector<64x256xf32>
    %c0_9 = arith.constant 0 : index
    %c0_10 = arith.constant 0 : index
    %11 = vector.load %arg6[%c0_9, %c0_10] : memref<1x256xf32, #tpu.memory_space<vmem>>, vector<1x256xf32>
    %12 = vector.broadcast %11 : vector<1x256xf32> to vector<64x256xf32>
    %13 = arith.addf %10, %12 : vector<64x256xf32>
    %cst_11 = arith.constant 0.000000e+00 : f32
    %14 = vector.broadcast %cst_11 : f32 to vector<64x256xf32>
    %15 = arith.maximumf %13, %14 : vector<64x256xf32>
    %16 = arith.truncf %15 : vector<64x256xf32> to vector<64x256xbf16>
    %c0_12 = arith.constant 0 : index
    %c0_13 = arith.constant 0 : index
    %17 = vector.load %arg7[%c0_12, %c0_13] : memref<256x128xbf16, #tpu.memory_space<vmem>>, vector<256x128xbf16>
    %cst_14 = arith.constant dense<0.000000e+00> : vector<64x128xf32>
    %18 = tpu.matmul %16, %17, %cst_14 {dimension_numbers = #tpu.dot_dimension_numbers<[1], [0], [0], [1], [0, 0, 1, 1], [], []>} : vector<64x256xbf16>, vector<256x128xbf16>, vector<64x128xf32> -> vector<64x128xf32>
    %c0_15 = arith.constant 0 : index
    %c0_16 = arith.constant 0 : index
    %19 = vector.load %arg8[%c0_15, %c0_16] : memref<1x128xf32, #tpu.memory_space<vmem>>, vector<1x128xf32>
    %20 = vector.broadcast %19 : vector<1x128xf32> to vector<64x128xf32>
    %21 = arith.addf %18, %20 : vector<64x128xf32>
    %cst_17 = arith.constant 0.000000e+00 : f32
    %22 = vector.broadcast %cst_17 : f32 to vector<64x128xf32>
    %23 = arith.maximumf %21, %22 : vector<64x128xf32>
    %24 = arith.truncf %23 : vector<64x128xf32> to vector<64x128xbf16>
    %c0_18 = arith.constant 0 : index
    %c0_19 = arith.constant 0 : index
    %25 = vector.load %arg9[%c0_18, %c0_19] : memref<128x64xbf16, #tpu.memory_space<vmem>>, vector<128x64xbf16>
    %cst_20 = arith.constant dense<0.000000e+00> : vector<64x64xf32>
    %26 = tpu.matmul %24, %25, %cst_20 {dimension_numbers = #tpu.dot_dimension_numbers<[1], [0], [0], [1], [0, 0, 1, 1], [], []>} : vector<64x128xbf16>, vector<128x64xbf16>, vector<64x64xf32> -> vector<64x64xf32>
    %c0_21 = arith.constant 0 : index
    %c0_22 = arith.constant 0 : index
    %27 = vector.load %arg10[%c0_21, %c0_22] : memref<1x64xf32, #tpu.memory_space<vmem>>, vector<1x64xf32>
    %28 = vector.broadcast %27 : vector<1x64xf32> to vector<64x64xf32>
    %29 = arith.addf %26, %28 : vector<64x64xf32>
    %cst_23 = arith.constant 0.000000e+00 : f32
    %30 = vector.broadcast %cst_23 : f32 to vector<64x64xf32>
    %31 = arith.maximumf %29, %30 : vector<64x64xf32>
    %32 = arith.truncf %31 : vector<64x64xf32> to vector<64x64xbf16>
    %c0_24 = arith.constant 0 : index
    %c0_25 = arith.constant 0 : index
    %33 = vector.load %arg11[%c0_24, %c0_25] : memref<64x128xbf16, #tpu.memory_space<vmem>>, vector<64x128xbf16>
    %cst_26 = arith.constant dense<0.000000e+00> : vector<64x128xf32>
    %34 = tpu.matmul %32, %33, %cst_26 {dimension_numbers = #tpu.dot_dimension_numbers<[1], [0], [0], [1], [0, 0, 1, 1], [], []>} : vector<64x64xbf16>, vector<64x128xbf16>, vector<64x128xf32> -> vector<64x128xf32>
    %c0_27 = arith.constant 0 : index
    %c0_28 = arith.constant 0 : index
    %35 = vector.load %arg12[%c0_27, %c0_28] : memref<1x128xf32, #tpu.memory_space<vmem>>, vector<1x128xf32>
    %36 = vector.broadcast %35 : vector<1x128xf32> to vector<64x128xf32>
    %37 = arith.addf %34, %36 : vector<64x128xf32>
    %38 = vector.extract_strided_slice %37 {offsets = [0, 0], sizes = [64, 8], strides = [1, 1]} : vector<64x128xf32> to vector<64x8xf32>
    %39 = vector.extract_strided_slice %37 {offsets = [0, 8], sizes = [64, 8], strides = [1, 1]} : vector<64x128xf32> to vector<64x8xf32>
    %cst_29 = arith.constant 5.000000e-01 : f32
    %40 = vector.broadcast %cst_29 : f32 to vector<64x8xf32>
    %41 = arith.mulf %40, %39 : vector<64x8xf32>
    %42 = math.exp %41 : vector<64x8xf32>
    %c0_30 = arith.constant 0 : index
    %c0_31 = arith.constant 0 : index
    %43 = vector.load %arg2[%c0_30, %c0_31] : memref<64x8xf32, #tpu.memory_space<vmem>>, vector<64x8xf32>
    %44 = arith.mulf %43, %42 : vector<64x8xf32>
    %45 = arith.addf %38, %44 : vector<64x8xf32>
    %46 = arith.truncf %45 : vector<64x8xf32> to vector<64x8xbf16>
    %c0_32 = arith.constant 0 : index
    %c0_33 = arith.constant 0 : index
    %47 = vector.load %arg13[%c0_32, %c0_33] : memref<8x64xbf16, #tpu.memory_space<vmem>>, vector<8x64xbf16>
    %cst_34 = arith.constant dense<0.000000e+00> : vector<64x64xf32>
    %48 = tpu.matmul %46, %47, %cst_34 {dimension_numbers = #tpu.dot_dimension_numbers<[1], [0], [0], [1], [0, 0, 1, 1], [], []>} : vector<64x8xbf16>, vector<8x64xbf16>, vector<64x64xf32> -> vector<64x64xf32>
    %c0_35 = arith.constant 0 : index
    %c0_36 = arith.constant 0 : index
    %49 = vector.load %arg14[%c0_35, %c0_36] : memref<1x64xf32, #tpu.memory_space<vmem>>, vector<1x64xf32>
    %50 = vector.broadcast %49 : vector<1x64xf32> to vector<64x64xf32>
    %51 = arith.addf %48, %50 : vector<64x64xf32>
    %cst_37 = arith.constant 0.000000e+00 : f32
    %52 = vector.broadcast %cst_37 : f32 to vector<64x64xf32>
    %53 = arith.maximumf %51, %52 : vector<64x64xf32>
    %54 = arith.truncf %53 : vector<64x64xf32> to vector<64x64xbf16>
    %c0_38 = arith.constant 0 : index
    %c0_39 = arith.constant 0 : index
    %55 = vector.load %arg15[%c0_38, %c0_39] : memref<64x128xbf16, #tpu.memory_space<vmem>>, vector<64x128xbf16>
    %cst_40 = arith.constant dense<0.000000e+00> : vector<64x128xf32>
    %56 = tpu.matmul %54, %55, %cst_40 {dimension_numbers = #tpu.dot_dimension_numbers<[1], [0], [0], [1], [0, 0, 1, 1], [], []>} : vector<64x64xbf16>, vector<64x128xbf16>, vector<64x128xf32> -> vector<64x128xf32>
    %c0_41 = arith.constant 0 : index
    %c0_42 = arith.constant 0 : index
    %57 = vector.load %arg16[%c0_41, %c0_42] : memref<1x128xf32, #tpu.memory_space<vmem>>, vector<1x128xf32>
    %58 = vector.broadcast %57 : vector<1x128xf32> to vector<64x128xf32>
    %59 = arith.addf %56, %58 : vector<64x128xf32>
    %cst_43 = arith.constant 0.000000e+00 : f32
    %60 = vector.broadcast %cst_43 : f32 to vector<64x128xf32>
    %61 = arith.maximumf %59, %60 : vector<64x128xf32>
    %62 = arith.truncf %61 : vector<64x128xf32> to vector<64x128xbf16>
    %c0_44 = arith.constant 0 : index
    %c0_45 = arith.constant 0 : index
    %63 = vector.load %arg17[%c0_44, %c0_45] : memref<128x256xbf16, #tpu.memory_space<vmem>>, vector<128x256xbf16>
    %cst_46 = arith.constant dense<0.000000e+00> : vector<64x256xf32>
    %64 = tpu.matmul %62, %63, %cst_46 {dimension_numbers = #tpu.dot_dimension_numbers<[1], [0], [0], [1], [0, 0, 1, 1], [], []>} : vector<64x128xbf16>, vector<128x256xbf16>, vector<64x256xf32> -> vector<64x256xf32>
    %c0_47 = arith.constant 0 : index
    %c0_48 = arith.constant 0 : index
    %65 = vector.load %arg18[%c0_47, %c0_48] : memref<1x256xf32, #tpu.memory_space<vmem>>, vector<1x256xf32>
    %66 = vector.broadcast %65 : vector<1x256xf32> to vector<64x256xf32>
    %67 = arith.addf %64, %66 : vector<64x256xf32>
    %cst_49 = arith.constant 0.000000e+00 : f32
    %68 = vector.broadcast %cst_49 : f32 to vector<64x256xf32>
    %69 = arith.maximumf %67, %68 : vector<64x256xf32>
    %70 = arith.truncf %69 : vector<64x256xf32> to vector<64x256xbf16>
    %c0_50 = arith.constant 0 : index
    %c0_51 = arith.constant 0 : index
    %71 = vector.load %arg19[%c0_50, %c0_51] : memref<256x512xbf16, #tpu.memory_space<vmem>>, vector<256x512xbf16>
    %cst_52 = arith.constant dense<0.000000e+00> : vector<64x512xf32>
    %72 = tpu.matmul %70, %71, %cst_52 {dimension_numbers = #tpu.dot_dimension_numbers<[1], [0], [0], [1], [0, 0, 1, 1], [], []>} : vector<64x256xbf16>, vector<256x512xbf16>, vector<64x512xf32> -> vector<64x512xf32>
    %c0_53 = arith.constant 0 : index
    %c0_54 = arith.constant 0 : index
    %73 = vector.load %arg20[%c0_53, %c0_54] : memref<1x512xf32, #tpu.memory_space<vmem>>, vector<1x512xf32>
    %74 = vector.broadcast %73 : vector<1x512xf32> to vector<64x512xf32>
    %75 = arith.addf %72, %74 : vector<64x512xf32>
    %cst_55 = arith.constant 0.000000e+00 : f32
    %76 = vector.broadcast %cst_55 : f32 to vector<64x512xf32>
    %77 = arith.maximumf %75, %76 : vector<64x512xf32>
    %78 = arith.truncf %77 : vector<64x512xf32> to vector<64x512xbf16>
    %c0_56 = arith.constant 0 : index
    %c0_57 = arith.constant 0 : index
    %79 = vector.load %arg21[%c0_56, %c0_57] : memref<512x128xbf16, #tpu.memory_space<vmem>>, vector<512x128xbf16>
    %cst_58 = arith.constant dense<0.000000e+00> : vector<64x128xf32>
    %80 = tpu.matmul %78, %79, %cst_58 {dimension_numbers = #tpu.dot_dimension_numbers<[1], [0], [0], [1], [0, 0, 1, 1], [], []>} : vector<64x512xbf16>, vector<512x128xbf16>, vector<64x128xf32> -> vector<64x128xf32>
    %c0_59 = arith.constant 0 : index
    %c0_60 = arith.constant 0 : index
    %81 = vector.load %arg22[%c0_59, %c0_60] : memref<1x128xf32, #tpu.memory_space<vmem>>, vector<1x128xf32>
    %82 = vector.broadcast %81 : vector<1x128xf32> to vector<64x128xf32>
    %83 = arith.addf %80, %82 : vector<64x128xf32>
    %c0_61 = arith.constant 0 : index
    %c0_62 = arith.constant 0 : index
    %84 = vector.load %arg23[%c0_61, %c0_62] : memref<64x128xf32, #tpu.memory_space<vmem>>, vector<64x128xf32>
    tpu.vector_store %arg23[%c0_61, %c0_62], %83 {strides = array<i32>} : memref<64x128xf32, #tpu.memory_space<vmem>>, vector<64x128xf32>,
    %c0_63 = arith.constant 0 : index
    %c0_64 = arith.constant 0 : index
    %85 = vector.load %arg24[%c0_63, %c0_64] : memref<64x128xf32, #tpu.memory_space<vmem>>, vector<64x128xf32>
    tpu.vector_store %arg24[%c0_63, %c0_64], %37 {strides = array<i32>} : memref<64x128xf32, #tpu.memory_space<vmem>>, vector<64x128xf32>,
    return
  }
  func.func @transform_0(%arg0: i32) -> (i32, i32) {
    %c0_i32 = arith.constant 0 : i32
    %c0_i32_0 = arith.constant 0 : i32
    return %arg0, %c0_i32 : i32, i32
  }
  func.func @transform_1(%arg0: i32) -> (i32, i32) {
    %c0_i32 = arith.constant 0 : i32
    %c0_i32_0 = arith.constant 0 : i32
    return %arg0, %c0_i32 : i32, i32
  }
  func.func @transform_2(%arg0: i32) -> (i32, i32) {
    %c0_i32 = arith.constant 0 : i32
    %c0_i32_0 = arith.constant 0 : i32
    %c0_i32_1 = arith.constant 0 : i32
    return %c0_i32, %c0_i32_0 : i32, i32
  }
  func.func @transform_3(%arg0: i32) -> (i32, i32) {
    %c0_i32 = arith.constant 0 : i32
    %c0_i32_0 = arith.constant 0 : i32
    %c0_i32_1 = arith.constant 0 : i32
    return %c0_i32, %c0_i32_0 : i32, i32
  }
  func.func @transform_4(%arg0: i32) -> (i32, i32) {
    %c0_i32 = arith.constant 0 : i32
    %c0_i32_0 = arith.constant 0 : i32
    %c0_i32_1 = arith.constant 0 : i32
    return %c0_i32, %c0_i32_0 : i32, i32
  }
  func.func @transform_5(%arg0: i32) -> (i32, i32) {
    %c0_i32 = arith.constant 0 : i32
    %c0_i32_0 = arith.constant 0 : i32
    %c0_i32_1 = arith.constant 0 : i32
    return %c0_i32, %c0_i32_0 : i32, i32
  }
  func.func @transform_6(%arg0: i32) -> (i32, i32) {
    %c0_i32 = arith.constant 0 : i32
    %c0_i32_0 = arith.constant 0 : i32
    %c0_i32_1 = arith.constant 0 : i32
    return %c0_i32, %c0_i32_0 : i32, i32
  }
  func.func @transform_7(%arg0: i32) -> (i32, i32) {
    %c0_i32 = arith.constant 0 : i32
    %c0_i32_0 = arith.constant 0 : i32
    %c0_i32_1 = arith.constant 0 : i32
    return %c0_i32, %c0_i32_0 : i32, i32
  }
  func.func @transform_8(%arg0: i32) -> (i32, i32) {
    %c0_i32 = arith.constant 0 : i32
    %c0_i32_0 = arith.constant 0 : i32
    %c0_i32_1 = arith.constant 0 : i32
    return %c0_i32, %c0_i32_0 : i32, i32
  }
  func.func @transform_9(%arg0: i32) -> (i32, i32) {
    %c0_i32 = arith.constant 0 : i32
    %c0_i32_0 = arith.constant 0 : i32
    %c0_i32_1 = arith.constant 0 : i32
    return %c0_i32, %c0_i32_0 : i32, i32
  }
  func.func @transform_10(%arg0: i32) -> (i32, i32) {
    %c0_i32 = arith.constant 0 : i32
    %c0_i32_0 = arith.constant 0 : i32
    %c0_i32_1 = arith.constant 0 : i32
    return %c0_i32, %c0_i32_0 : i32, i32
  }
  func.func @transform_11(%arg0: i32) -> (i32, i32) {
    %c0_i32 = arith.constant 0 : i32
    %c0_i32_0 = arith.constant 0 : i32
    %c0_i32_1 = arith.constant 0 : i32
    return %c0_i32, %c0_i32_0 : i32, i32
  }
  func.func @transform_12(%arg0: i32) -> (i32, i32) {
    %c0_i32 = arith.constant 0 : i32
    %c0_i32_0 = arith.constant 0 : i32
    %c0_i32_1 = arith.constant 0 : i32
    return %c0_i32, %c0_i32_0 : i32, i32
  }
  func.func @transform_13(%arg0: i32) -> (i32, i32) {
    %c0_i32 = arith.constant 0 : i32
    %c0_i32_0 = arith.constant 0 : i32
    %c0_i32_1 = arith.constant 0 : i32
    return %c0_i32, %c0_i32_0 : i32, i32
  }
  func.func @transform_14(%arg0: i32) -> (i32, i32) {
    %c0_i32 = arith.constant 0 : i32
    %c0_i32_0 = arith.constant 0 : i32
    %c0_i32_1 = arith.constant 0 : i32
    return %c0_i32, %c0_i32_0 : i32, i32
  }
  func.func @transform_15(%arg0: i32) -> (i32, i32) {
    %c0_i32 = arith.constant 0 : i32
    %c0_i32_0 = arith.constant 0 : i32
    %c0_i32_1 = arith.constant 0 : i32
    return %c0_i32, %c0_i32_0 : i32, i32
  }
  func.func @transform_16(%arg0: i32) -> (i32, i32) {
    %c0_i32 = arith.constant 0 : i32
    %c0_i32_0 = arith.constant 0 : i32
    %c0_i32_1 = arith.constant 0 : i32
    return %c0_i32, %c0_i32_0 : i32, i32
  }
  func.func @transform_17(%arg0: i32) -> (i32, i32) {
    %c0_i32 = arith.constant 0 : i32
    %c0_i32_0 = arith.constant 0 : i32
    %c0_i32_1 = arith.constant 0 : i32
    return %c0_i32, %c0_i32_0 : i32, i32
  }
  func.func @transform_18(%arg0: i32) -> (i32, i32) {
    %c0_i32 = arith.constant 0 : i32
    %c0_i32_0 = arith.constant 0 : i32
    %c0_i32_1 = arith.constant 0 : i32
    return %c0_i32, %c0_i32_0 : i32, i32
  }
  func.func @transform_19(%arg0: i32) -> (i32, i32) {
    %c0_i32 = arith.constant 0 : i32
    %c0_i32_0 = arith.constant 0 : i32
    %c0_i32_1 = arith.constant 0 : i32
    return %c0_i32, %c0_i32_0 : i32, i32
  }
  func.func @transform_20(%arg0: i32) -> (i32, i32) {
    %c0_i32 = arith.constant 0 : i32
    %c0_i32_0 = arith.constant 0 : i32
    %c0_i32_1 = arith.constant 0 : i32
    return %c0_i32, %c0_i32_0 : i32, i32
  }
  func.func @transform_21(%arg0: i32) -> (i32, i32) {
    %c0_i32 = arith.constant 0 : i32
    %c0_i32_0 = arith.constant 0 : i32
    %c0_i32_1 = arith.constant 0 : i32
    return %c0_i32, %c0_i32_0 : i32, i32
  }
  func.func @transform_22(%arg0: i32) -> (i32, i32) {
    %c0_i32 = arith.constant 0 : i32
    %c0_i32_0 = arith.constant 0 : i32
    return %arg0, %c0_i32 : i32, i32
  }
  func.func @transform_23(%arg0: i32) -> (i32, i32) {
    %c0_i32 = arith.constant 0 : i32
    %c0_i32_0 = arith.constant 0 : i32
    return %arg0, %c0_i32 : i32, i32
  }
}

</mosaic_0001>

<bundles_post_ra>
// kernel: vae_sk_forward.1
= control target key start
LH: loop header
LB: loop body
LE: loop exit
PB: predicated region body
PF: predicated region fallthrough
CT: control target
= control target key end

     0   :  { %s6427_s0 = inlined_call_operand.vmem [shape: bf16[128,32], index: 0, kind: input, shape index: {}]   ;;  %s6428_s1 = inlined_call_operand.vmem [shape: f32[128,8], index: 1, kind: input, shape index: {}]   ;;  %s6429_s2 = inlined_call_operand.vmem [shape: bf16[32,512], index: 2, kind: input, shape index: {}]   ;;  %s6430_s3 = inlined_call_operand.vmem [shape: f32[1,512], index: 3, kind: input, shape index: {}]   ;;  %s6431_s4 = inlined_call_operand.vmem [shape: bf16[512,256], index: 4, kind: input, shape index: {}]   ;;  %s6432_s5 = inlined_call_operand.vmem [shape: f32[1,256], index: 5, kind: input, shape index: {}]   ;;  %s6433_s6 = inlined_call_operand.vmem [shape: bf16[256,128], index: 6, kind: input, shape index: {}]   ;;  %s6434_s7 = inlined_call_operand.vmem [shape: f32[1,128], index: 7, kind: input, shape index: {}]   ;;  %s6435_s8 = inlined_call_operand.vmem [shape: bf16[128,64], index: 8, kind: input, shape index: {}]   ;;  %s6436_s9 = inlined_call_operand.vmem [shape: f32[1,64], index: 9, kind: input, shape index: {}]   ;;  %s6437_s10 = inlined_call_operand.vmem [shape: bf16[64,128], index: 10, kind: input, shape index: {}]   ;;  %s6438_s11 = inlined_call_operand.vmem [shape: f32[1,128], index: 11, kind: input, shape index: {}]   ;;  %s6439_s12 = inlined_call_operand.vmem [shape: bf16[8,64], index: 12, kind: input, shape index: {}]   ;;  %s6440_s13 = inlined_call_operand.vmem [shape: f32[1,64], index: 13, kind: input, shape index: {}]   ;;  %s6441_s14 = inlined_call_operand.vmem [shape: bf16[64,128], index: 14, kind: input, shape index: {}]   ;;  %s6442_s15 = inlined_call_operand.vmem [shape: f32[1,128], index: 15, kind: input, shape index: {}]   ;;  %s6443_s16 = inlined_call_operand.vmem [shape: bf16[128,256], index: 16, kind: input, shape index: {}]   ;;  %s6444_s17 = inlined_call_operand.vmem [shape: f32[1,256], index: 17, kind: input, shape index: {}]   ;;  %s6445_s18 = inlined_call_operand.vmem [shape: bf16[256,512], index: 18, kind: input, shape index: {}]   ;;  %s6446_s19 = inlined_call_operand.vmem [shape: f32[1,512], index: 19, kind: input, shape index: {}]   ;;  %s6447_s20 = inlined_call_operand.vmem [shape: bf16[512,128], index: 20, kind: input, shape index: {}]   ;;  %s6448_s21 = inlined_call_operand.vmem [shape: f32[1,128], index: 21, kind: input, shape index: {}]   ;;  %s6449_s22 = inlined_call_operand.vmem [shape: f32[128,128], index: 22, kind: output, shape index: {0}]   ;;  %s6450_s23 = inlined_call_operand.vmem [shape: f32[128,128], index: 23, kind: output, shape index: {1}]  }
   0x1   :  { %6455 = sst [smem:[#allocation2_spill]] %s6427_s0 }
   0x2   :  { %6456 = sst [smem:[#allocation3_spill]] %s6428_s1 }
   0x3   :  { %6457 = sst [smem:[#allocation4_spill]] %s6429_s2 }
   0x4   :  { %6458 = sst [smem:[#allocation5_spill]] %s6430_s3 }
   0x5   :  { %6459 = sst [smem:[#allocation6_spill]] %s6431_s4  ;;  %s4940_s4 = smov 0  }
   0x6   :  { %6460 = sst [smem:[#allocation7_spill]] %s6432_s5 }
   0x7   :  { %6461 = sst [smem:[#allocation8_spill]] %s6433_s6 }
   0x8   :  { %6462 = sst [smem:[#allocation9_spill]] %s6434_s7 }
   0x9 LB: > { %s3637_s30 = sadd.s32 4294967295, %s4817_s4   ;;  %p3641_p0 = scmp.ge.s32.totalorder %s4817_s4, 1  ;;  %s4817_s4 = sphi %s4940_s4, %s34_s4  }
   0xa   : > { %p652_p1 = scmp.lt.s32.totalorder %s4817_s4, 3 }
   0xc   : > { %p653_p2 = pnand %p3641_p0, %p652_p1 }
   0xd   : > { %s6463_s5 = sld [smem:[#allocation4_spill]] (!%p653_p2)  ;;  %s3642_s28 = sshll.u32 (!%p653_p2), %s3637_s30, 3 }
   0xe   : > { %656 = sbr.rel (%p653_p2) target bundleno = 1778 (0x6f2), region = 108  ;;  %p727_p3 = scmp.lt.s32.totalorder (!%p653_p2), %s3642_s28, 15 }
   0xf   : > { %s6464_s24 = sld [smem:[#allocation2_spill]] (!%p653_p2) }
  0x10   : > { %s6465_s26 = sld [smem:[#allocation6_spill]] (!%p653_p2) }
  0x11   : > { %s6466_s2 = sld [smem:[#allocation5_spill]] (!%p653_p2) }
  0x12   : > { %s6467_s7 = sld [smem:[#allocation8_spill]] (!%p653_p2) }
  0x13   : > { %v3684_v0 = vld [vmem:[%s6463_s5 + $0x20] sm:$0xf]  ;;  %v4570_v1 = vld [vmem:[%s6463_s5 + $0x2c] sm:$0xf0]  ;;  %v4568_v2 = vld [vmem:[%s6463_s5 + $0x24] sm:$0xf] }
  0x14   : > { %v3685_v3 = vor.u32 %v4570_v1, %v3684_v0  ;;  %v3686_v4 = vld [vmem:[%s6463_s5 + $0x30] sm:$0xf0]  ;;  %v3692_v5 = vld [vmem:[%s6463_s5 + $0x28] sm:$0xf]  ;;  %v4571_v6 = vld [vmem:[%s6463_s5 + $0x34] sm:$0xf0] }
  0x15   : > { %v3689_v7 = vor.u32 %v4568_v2, %v3686_v4  ;;  %v3693_v8 = vor.u32 %v4571_v6, %v3692_v5  ;;  %v4569_v9 = vld [vmem:[%s6463_s5 + $0x2c] sm:$0xf]  ;;  %v3694_v10 = vld [vmem:[%s6463_s5 + $0x38] sm:$0xf0]  ;;  %v3668_v11 = vld [vmem:[%s6463_s5] sm:$0xf] }
  0x16   : > { %856 = vmatpush.bf16.msra.mxu0 %v3685_v3  ;;  %v3697_v12 = vor.u32 %v4569_v9, %v3694_v10  ;;  %v4566_v13 = vld [vmem:[%s6463_s5 + $0xc] sm:$0xf0]  ;;  %v4564_v14 = vld [vmem:[%s6463_s5 + $0x4] sm:$0xf]  ;;  %v3670_v15 = vld [vmem:[%s6463_s5 + $0x10] sm:$0xf0] }
  0x17   : > { %885 = vmatpush.bf16.msra.mxu1 %v3689_v7  ;;  %914 = vmatpush.bf16.msra.mxu2 %v3693_v8  ;;  %v3669_v16 = vor.u32 %v4566_v13, %v3668_v11  ;;  %v3673_v17 = vor.u32 %v4564_v14, %v3670_v15  ;;  %v3676_v18 = vld [vmem:[%s6463_s5 + $0x8] sm:$0xf]  ;;  %v4567_v19 = vld [vmem:[%s6463_s5 + $0x14] sm:$0xf0]  ;;  %v4565_v20 = vld [vmem:[%s6463_s5 + $0xc] sm:$0xf] }
  0x18   : > { %943 = vmatpush.bf16.msra.mxu3 %v3697_v12  ;;  %v3677_v21 = vor.u32 %v4567_v19, %v3676_v18  ;;  %v3678_v22 = vld [vmem:[%s6463_s5 + $0x18] sm:$0xf0]  ;;  %s6472_s28 = smov (!%p727_p3, %s3642_s28), 15  ;;  %vm837_vm0 = vcmask 261120   ;;  %v3900_v26 = vld [vmem:[%s6465_s26 + $0x170] sm:$0xf] }
  0x19   : > { %v3681_v23 = vor.u32 %v4565_v20, %v3678_v22  ;;  %s3643_s29 = sshll.u32 %s6472_s28, 2  ;;  %v4619_v27 = vld [vmem:[%s6465_s26 + $0x174] sm:$0xf0]  ;;  %v3772_v28 = vld [vmem:[%s6465_s26 + $0x70] sm:$0xf]  ;;  %s6468_s1 = sld [smem:[#allocation7_spill]] }
  0x1a   : > { %857 = vmatpush.bf16.msra.mxu0 %v3669_v16  ;;  %s5004_s25 = scalar_lea.vmem %s6464_s24, %s3643_s29  ;;  %v3901_v29 = vor.u32 %v4619_v27, %v3900_v26  ;;  %v4587_v30 = vld [vmem:[%s6465_s26 + $0x74] sm:$0xf0]  ;;  %v3964_v31 = vld [vmem:[%s6465_s26 + $0x1f0] sm:$0xf]  ;;  %v3892_v37 = vld [vmem:[%s6465_s26 + $0x160] sm:$0xf] }
  0x1b   : > { %886 = vmatpush.bf16.msra.mxu1 %v3673_v17  ;;  %915 = vmatpush.bf16.msra.mxu2 %v3677_v21  ;;  %v4560_v24 = vld [vmem:[%s5004_s25] sm:$0xff]  ;;  %v4561_v25 = vld [vmem:[%s5004_s25 + $0x8] sm:$0xff]  ;;  %v4635_v32 = vld [vmem:[%s6465_s26 + $0x1f4] sm:$0xf0]  ;;  %v3773_v33 = vor.u32 %v4587_v30, %v3772_v28  ;;  %vm2007_vm1 = vcmask 523264   ;;  %vm2151_vm2 = vcmask 1043456  }
  0x1c   : > { %944 = vmatpush.bf16.msra.mxu3 %v3681_v23  ;;  %v3965_v34 = vor.u32 %v4635_v32, %v3964_v31  ;;  %v3836_v35 = vld [vmem:[%s6465_s26 + $0xf0] sm:$0xf]  ;;  %v4603_v36 = vld [vmem:[%s6465_s26 + $0xf4] sm:$0xf0]  ;;  %v4617_v39 = vld [vmem:[%s6465_s26 + $0x164] sm:$0xf0] }
  0x1d   : > { %3698 = vmatmul.msk.bf16.vlgmr.msra.gmra.mxu0 %vm837_vm0, %v4560_v24  ;;  %v3837_v38 = vor.u32 %v4603_v36, %v3836_v35  ;;  %v3764_v40 = vld [vmem:[%s6465_s26 + $0x60] sm:$0xf]  ;;  %v4585_v41 = vld [vmem:[%s6465_s26 + $0x64] sm:$0xf0]  ;;  %v3893_v42 = vor.u32 %v4617_v39, %v3892_v37  ;;  %v3884_v49 = vld [vmem:[%s6465_s26 + $0x150] sm:$0xf] }
  0x1e   : > { %3702 = vmatmul.msk.bf16.vlgmr.msra.gmra.mxu1 %vm837_vm0, %v4560_v24  ;;  %3706 = vmatmul.msk.bf16.vlgmr.msra.gmra.mxu2 %vm837_vm0, %v4560_v24  ;;  %v3765_v43 = vor.u32 %v4585_v41, %v3764_v40  ;;  %v3956_v44 = vld [vmem:[%s6465_s26 + $0x1e0] sm:$0xf]  ;;  %v4633_v45 = vld [vmem:[%s6465_s26 + $0x1e4] sm:$0xf0]  ;;  %v4615_v50 = vld [vmem:[%s6465_s26 + $0x154] sm:$0xf0] }
  0x1f   : > { %3710 = vmatmul.msk.bf16.vlgmr.msra.gmra.mxu3 %vm837_vm0, %v4560_v24  ;;  %1462 = vmatpush.bf16.msrb.mxu2 %v3901_v29  ;;  %v3828_v46 = vld [vmem:[%s6465_s26 + $0xe0] sm:$0xf]  ;;  %v3957_v47 = vor.u32 %v4633_v45, %v3956_v44  ;;  %v4601_v48 = vld [vmem:[%s6465_s26 + $0xe4] sm:$0xf0]  ;;  %v3756_v52 = vld [vmem:[%s6465_s26 + $0x50] sm:$0xf]  ;;  %v3885_v55 = vor.u32 %v4615_v50, %v3884_v49 }
  0x20   : > { %1404 = vmatpush.bf16.msrb.mxu0 %v3773_v33  ;;  %1491 = vmatpush.bf16.msrb.mxu3 %v3965_v34  ;;  %v3829_v51 = vor.u32 %v4601_v48, %v3828_v46  ;;  %v4583_v53 = vld [vmem:[%s6465_s26 + $0x54] sm:$0xf0]  ;;  %v3948_v54 = vld [vmem:[%s6465_s26 + $0x1d0] sm:$0xf]  ;;  %v3876_v63 = vld [vmem:[%s6465_s26 + $0x140] sm:$0xf] }
  0x21   : > { %1433 = vmatpush.bf16.msrb.mxu1 %v3837_v38  ;;  %v4631_v56 = vld [vmem:[%s6465_s26 + $0x1d4] sm:$0xf0]  ;;  %v3820_v57 = vld [vmem:[%s6465_s26 + $0xd0] sm:$0xf]  ;;  %v3757_v59 = vor.u32 %v4583_v53, %v3756_v52  ;;  %v4613_v0 = vld [vmem:[%s6465_s26 + $0x144] sm:$0xf0] }
  0x22   : > { %v4599_v58 = vld [vmem:[%s6465_s26 + $0xd4] sm:$0xf0]  ;;  %v3949_v60 = vor.u32 %v4631_v56, %v3948_v54  ;;  %v4562_v61 = vld [vmem:[%s5004_s25 + $0x10] sm:$0xff]  ;;  %v3748_v1 = vld [vmem:[%s6465_s26 + $0x40] sm:$0xf]  ;;  %v3877_v7 = vor.u32 %v4613_v0, %v3876_v63  ;;  %s6470_s30 = sld [smem:[#allocation3_spill]] }
  0x23   : > { %1463 = vmatpush.bf16.msrb.mxu2 %v3893_v42  ;;  %v3821_v62 = vor.u32 %v4599_v58, %v3820_v57  ;;  %v4581_v2 = vld [vmem:[%s6465_s26 + $0x44] sm:$0xf0]  ;;  %v3940_v3 = vld [vmem:[%s6465_s26 + $0x1c0] sm:$0xf]  ;;  %v3868_v9 = vld [vmem:[%s6465_s26 + $0x130] sm:$0xf] }
  0x24   : > { %1405 = vmatpush.bf16.msrb.mxu0 %v3765_v43  ;;  %1492 = vmatpush.bf16.msrb.mxu3 %v3957_v47  ;;  %v4629_v4 = vld [vmem:[%s6465_s26 + $0x1c4] sm:$0xf0]  ;;  %v3812_v5 = vld [vmem:[%s6465_s26 + $0xc0] sm:$0xf]  ;;  %v3749_v8 = vor.u32 %v4581_v2, %v3748_v1  ;;  %v4611_v10 = vld [vmem:[%s6465_s26 + $0x134] sm:$0xf0] }
  0x25   : > { %1434 = vmatpush.bf16.msrb.mxu1 %v3829_v51  ;;  %v4597_v6 = vld [vmem:[%s6465_s26 + $0xc4] sm:$0xf0]  ;;  %v3941_v11 = vor.u32 %v4629_v4, %v3940_v3  ;;  %v3740_v13 = vld [vmem:[%s6465_s26 + $0x30] sm:$0xf]  ;;  %v4579_v14 = vld [vmem:[%s6465_s26 + $0x34] sm:$0xf0]  ;;  %v3869_v19 = vor.u32 %v4611_v10, %v3868_v9 }
  0x26   : > { %v3813_v12 = vor.u32 %v4597_v6, %v3812_v5  ;;  %v3932_v15 = vld [vmem:[%s6465_s26 + $0x1b0] sm:$0xf]  ;;  %v4627_v16 = vld [vmem:[%s6465_s26 + $0x1b4] sm:$0xf0]  ;;  %v3741_v20 = vor.u32 %v4579_v14, %v3740_v13  ;;  %v3860_v21 = vld [vmem:[%s6465_s26 + $0x120] sm:$0xf] }
  0x27   : > { %1464 = vmatpush.bf16.msrb.mxu2 %v3885_v55  ;;  %v3804_v17 = vld [vmem:[%s6465_s26 + $0xb0] sm:$0xf]  ;;  %v4595_v18 = vld [vmem:[%s6465_s26 + $0xb4] sm:$0xf0]  ;;  %v3933_v22 = vor.u32 %v4627_v16, %v3932_v15  ;;  %v4609_v24 = vld [vmem:[%s6465_s26 + $0x124] sm:$0xf0] }
  0x28   : > { %1406 = vmatpush.bf16.msrb.mxu0 %v3757_v59  ;;  %1493 = vmatpush.bf16.msrb.mxu3 %v3949_v60  ;;  %v3805_v23 = vor.u32 %v4595_v18, %v3804_v17  ;;  %v4577_v26 = vld [vmem:[%s6465_s26 + $0x24] sm:$0xf0]  ;;  %v3924_v27 = vld [vmem:[%s6465_s26 + $0x1a0] sm:$0xf]  ;;  %v3861_v29 = vor.u32 %v4609_v24, %v3860_v21  ;;  %v4563_v32 = vld [vmem:[%s5004_s25 + $0x18] sm:$0xff]  ;;  %vm2138_vm3 = vcmask 64512  }
  0x29   : > { %1435 = vmatpush.bf16.msrb.mxu1 %v3821_v62  ;;  %v4625_v28 = vld [vmem:[%s6465_s26 + $0x1a4] sm:$0xf0]  ;;  %v3796_v33 = vld [vmem:[%s6465_s26 + $0xa0] sm:$0xf]  ;;  %v3852_v36 = vld [vmem:[%s6465_s26 + $0x110] sm:$0xf] }
  0x2a   : > { %v3925_v31 = vor.u32 %v4625_v28, %v3924_v27  ;;  %v4593_v34 = vld [vmem:[%s6465_s26 + $0xa4] sm:$0xf0]  ;;  %v4607_v37 = vld [vmem:[%s6465_s26 + $0x114] sm:$0xf0]  ;;  %v3724_v39 = vld [vmem:[%s6465_s26 + $0x10] sm:$0xf] }
  0x2b   : > { %1465 = vmatpush.bf16.msrb.mxu2 %v3877_v7  ;;  %v3797_v35 = vor.u32 %v4593_v34, %v3796_v33  ;;  %v3853_v38 = vor.u32 %v4607_v37, %v3852_v36  ;;  %v4575_v40 = vld [vmem:[%s6465_s26 + $0x14] sm:$0xf0]  ;;  %v3788_v41 = vld [vmem:[%s6465_s26 + $0x90] sm:$0xf]  ;;  %v3716_v47 = vld [vmem:[%s6465_s26] sm:$0xf] }
  0x2c   : > { %1407 = vmatpush.bf16.msrb.mxu0 %v3749_v8  ;;  %1494 = vmatpush.bf16.msrb.mxu3 %v3941_v11  ;;  %v3725_v42 = vor.u32 %v4575_v40, %v3724_v39  ;;  %v4591_v43 = vld [vmem:[%s6465_s26 + $0x94] sm:$0xf0]  ;;  %v3916_v45 = vld [vmem:[%s6465_s26 + $0x190] sm:$0xf]  ;;  %v4573_v49 = vld [vmem:[%s6465_s26 + $0x4] sm:$0xf0] }
  0x2d   : > { %3699 = vmatmul.msk.bf16.gmra.mxu0 %vm837_vm0, %v4561_v25  ;;  %1436 = vmatpush.bf16.msrb.mxu1 %v3813_v12  ;;  %v3789_v44 = vor.u32 %v4591_v43, %v3788_v41  ;;  %v4623_v46 = vld [vmem:[%s6465_s26 + $0x194] sm:$0xf0]  ;;  %v3780_v50 = vld [vmem:[%s6465_s26 + $0x80] sm:$0xf]  ;;  %v4589_v51 = vld [vmem:[%s6465_s26 + $0x84] sm:$0xf0]  ;;  %v3717_v52 = vor.u32 %v4573_v49, %v3716_v47 }
  0x2e   : > { %3703 = vmatmul.msk.bf16.gmra.mxu1 %vm837_vm0, %v4561_v25  ;;  %3707 = vmatmul.msk.bf16.gmra.mxu2 %vm837_vm0, %v4561_v25  ;;  %v3917_v48 = vor.u32 %v4623_v46, %v3916_v45  ;;  %v3781_v53 = vor.u32 %v4589_v51, %v3780_v50  ;;  %v3844_v54 = vld [vmem:[%s6465_s26 + $0x100] sm:$0xf]  ;;  %v4605_v55 = vld [vmem:[%s6465_s26 + $0x104] sm:$0xf0]  ;;  %v4618_v60 = vld [vmem:[%s6465_s26 + $0x174] sm:$0xf] }
  0x2f   : > { %3711 = vmatmul.msk.bf16.gmra.mxu3 %vm837_vm0, %v4561_v25  ;;  %v3732_v25 = vld [vmem:[%s6465_s26 + $0x20] sm:$0xf]  ;;  %1466 = vmatpush.bf16.msrb.mxu2 %v3869_v19  ;;  %v3845_v56 = vor.u32 %v4605_v55, %v3844_v54  ;;  %v4621_v58 = vld [vmem:[%s6465_s26 + $0x184] sm:$0xf0]  ;;  %v4586_v63 = vld [vmem:[%s6465_s26 + $0x74] sm:$0xf] }
  0x30   : > { %1408 = vmatpush.bf16.msrb.mxu0 %v3741_v20  ;;  %v3733_v30 = vor.u32 %v4577_v26, %v3732_v25  ;;  %1495 = vmatpush.bf16.msrb.mxu3 %v3933_v22  ;;  %v3908_v57 = vld [vmem:[%s6465_s26 + $0x180] sm:$0xf]  ;;  %v3774_v0 = vld [vmem:[%s6465_s26 + $0x78] sm:$0xf0]  ;;  %v4634_v1 = vld [vmem:[%s6465_s26 + $0x1f4] sm:$0xf] }
  0x31   : > { %1437 = vmatpush.bf16.msrb.mxu1 %v3805_v23  ;;  %v3909_v59 = vor.u32 %v4621_v58, %v3908_v57  ;;  %v3777_v2 = vor.u32 %v4586_v63, %v3774_v0  ;;  %v3966_v3 = vld [vmem:[%s6465_s26 + $0x1f8] sm:$0xf0]  ;;  %v4602_v4 = vld [vmem:[%s6465_s26 + $0xf4] sm:$0xf]  ;;  %v4616_v8 = vld [vmem:[%s6465_s26 + $0x164] sm:$0xf] }
  0x32   : > { %v3838_v5 = vld [vmem:[%s6465_s26 + $0xf8] sm:$0xf0]  ;;  %v3969_v6 = vor.u32 %v4634_v1, %v3966_v3  ;;  %v3894_v9 = vld [vmem:[%s6465_s26 + $0x168] sm:$0xf0]  ;;  %v767_v11 = vld [vmem:[%s6466_s2] sm:$0xf] }
  0x33   : > { %1467 = vmatpush.bf16.msrb.mxu2 %v3861_v29  ;;  %v3841_v7 = vor.u32 %v4602_v4, %v3838_v5  ;;  %v3897_v10 = vor.u32 %v4616_v8, %v3894_v9  ;;  %v5251_v14 = vperm.slane %v767_v11, 0  ;;  %v5253_v15 = vperm.slane %v767_v11, 1  ;;  %v4584_v16 = vld [vmem:[%s6465_s26 + $0x64] sm:$0xf]  ;;  %v3766_v17 = vld [vmem:[%s6465_s26 + $0x68] sm:$0xf0] }
  0x34   : > { %1409 = vmatpush.bf16.msrb.mxu0 %v3733_v30  ;;  %1496 = vmatpush.bf16.msrb.mxu3 %v3925_v31  ;;  %v4632_v18 = vld [vmem:[%s6465_s26 + $0x1e4] sm:$0xf]  ;;  %v3769_v19 = vor.u32 %v4584_v16, %v3766_v17  ;;  %v3958_v20 = vld [vmem:[%s6465_s26 + $0x1e8] sm:$0xf0]  ;;  %v4614_v27 = vld [vmem:[%s6465_s26 + $0x154] sm:$0xf] }
  0x35   : > { %1438 = vmatpush.bf16.msrb.mxu1 %v3797_v35  ;;  %v4600_v21 = vld [vmem:[%s6465_s26 + $0xe4] sm:$0xf]  ;;  %v3961_v22 = vor.u32 %v4632_v18, %v3958_v20  ;;  %v3830_v23 = vld [vmem:[%s6465_s26 + $0xe8] sm:$0xf0]  ;;  %v3886_v28 = vld [vmem:[%s6465_s26 + $0x158] sm:$0xf0] }
  0x36   : > { %v3833_v26 = vor.u32 %v4600_v21, %v3830_v23  ;;  %v3889_v31 = vor.u32 %v4614_v27, %v3886_v28  ;;  %v5283_v33 = vperm.slane %v767_v11, 3  ;;  %v4582_v40 = vld [vmem:[%s6465_s26 + $0x54] sm:$0xf]  ;;  %v3758_v41 = vld [vmem:[%s6465_s26 + $0x58] sm:$0xf0] }
  0x37   : > { %1468 = vmatpush.bf16.msrb.mxu2 %v3853_v38  ;;  %v4630_v45 = vld [vmem:[%s6465_s26 + $0x1d4] sm:$0xf]  ;;  %v3950_v46 = vld [vmem:[%s6465_s26 + $0x1d8] sm:$0xf0]  ;;  %v4612_v51 = vld [vmem:[%s6465_s26 + $0x144] sm:$0xf] }
  0x38   : > { %1410 = vmatpush.bf16.msrb.mxu0 %v3725_v42  ;;  %1497 = vmatpush.bf16.msrb.mxu3 %v3917_v48  ;;  %v3953_v48 = vor.u32 %v4630_v45, %v3950_v46  ;;  %v4598_v49 = vld [vmem:[%s6465_s26 + $0xd4] sm:$0xf]  ;;  %v3822_v50 = vld [vmem:[%s6465_s26 + $0xd8] sm:$0xf0]  ;;  %v4580_v4 = vld [vmem:[%s6465_s26 + $0x44] sm:$0xf] }
  0x39   : > { %1439 = vmatpush.bf16.msrb.mxu1 %v3789_v44  ;;  %v3761_v44 = vor.u32 %v4582_v40, %v3758_v41  ;;  %v3825_v55 = vor.u32 %v4598_v49, %v3822_v50  ;;  %v3750_v5 = vld [vmem:[%s6465_s26 + $0x48] sm:$0xf0]  ;;  %v3870_v20 = vld [vmem:[%s6465_s26 + $0x138] sm:$0xf0]  ;;  %v4594_v41 = vld [vmem:[%s6465_s26 + $0xb4] sm:$0xf] }
  0x3a   : > { %v3942_v8 = vld [vmem:[%s6465_s26 + $0x1c8] sm:$0xf0] }
  0x3b   : > { %1469 = vmatpush.bf16.msrb.mxu2 %v3845_v56  ;;  %v3878_v56 = vld [vmem:[%s6465_s26 + $0x148] sm:$0xf0] }
  0x3c   : > { %1411 = vmatpush.bf16.msrb.mxu0 %v3717_v52  ;;  %1498 = vmatpush.bf16.msrb.mxu3 %v3909_v59  ;;  %v3881_v57 = vor.u32 %v4612_v51, %v3878_v56 }
  0x3d   : > { %3700 = vmatmul.msk.bf16.gmra.mxu0 %vm837_vm0, %v4562_v61  ;;  %1440 = vmatpush.bf16.msrb.mxu1 %v3781_v53 }
  0x3e   : > { %3704 = vmatmul.msk.bf16.gmra.mxu1 %vm837_vm0, %v4562_v61  ;;  %3708 = vmatmul.msk.bf16.gmra.mxu2 %vm837_vm0, %v4562_v61 }
  0x3f   : > { %3712 = vmatmul.msk.bf16.gmra.mxu3 %vm837_vm0, %v4562_v61  ;;  %v3902_v61 = vld [vmem:[%s6465_s26 + $0x178] sm:$0xf0] }
  0x40   : > { %v3905_v62 = vor.u32 %v4618_v60, %v3902_v61  ;;  %1520 = vmatpush.bf16.msra.mxu0 %v3777_v2  ;;  %1607 = vmatpush.bf16.msra.mxu3 %v3969_v6  ;;  %v3753_v6 = vor.u32 %v4580_v4, %v3750_v5  ;;  %v3926_v4 = vld [vmem:[%s6465_s26 + $0x1a8] sm:$0xf0] }
  0x41   : > { %1549 = vmatpush.bf16.msra.mxu1 %v3841_v7  ;;  %v4628_v7 = vld [vmem:[%s6465_s26 + $0x1c4] sm:$0xf] }
  0x42   : > { %1578 = vmatpush.bf16.msra.mxu2 %v3905_v62 }
  0x44   : > { %1521 = vmatpush.bf16.msra.mxu0 %v3769_v19  ;;  %1608 = vmatpush.bf16.msra.mxu3 %v3961_v22  ;;  %v4610_v19 = vld [vmem:[%s6465_s26 + $0x134] sm:$0xf] }
  0x45   : > { %1550 = vmatpush.bf16.msra.mxu1 %v3833_v26  ;;  %v3873_v23 = vor.u32 %v4610_v19, %v3870_v20  ;;  %v4574_v19 = vld [vmem:[%s6465_s26 + $0x14] sm:$0xf] }
  0x46   : > { %1579 = vmatpush.bf16.msra.mxu2 %v3897_v10 }
  0x48   : > { %1522 = vmatpush.bf16.msra.mxu0 %v3761_v44  ;;  %1609 = vmatpush.bf16.msra.mxu3 %v3953_v48  ;;  %v3862_v48 = vld [vmem:[%s6465_s26 + $0x128] sm:$0xf0] }
  0x49   : > { %1551 = vmatpush.bf16.msra.mxu1 %v3825_v55 }
  0x4a   : > { %1580 = vmatpush.bf16.msra.mxu2 %v3889_v31  ;;  %v3742_v31 = vld [vmem:[%s6465_s26 + $0x38] sm:$0xf0] }
  0x4c   : > { %1523 = vmatpush.bf16.msra.mxu0 %v3753_v6 }
  0x4d   : > { %3701 = vmatmul.msk.bf16.gmra.mxu0 %vm837_vm0, %v4563_v32 }
  0x4e   : > { %3705 = vmatmul.msk.bf16.gmra.mxu1 %vm837_vm0, %v4563_v32  ;;  %3709 = vmatmul.msk.bf16.gmra.mxu2 %vm837_vm0, %v4563_v32 }
  0x4f   : > { %3713 = vmatmul.msk.bf16.gmra.mxu3 %vm837_vm0, %v4563_v32  ;;  %v5281_v32 = vperm.slane %v767_v11, 2  ;;  %1581 = vmatpush.bf16.msra.mxu2 %v3881_v57  ;;  %v3945_v11 = vor.u32 %v4628_v7, %v3942_v8  ;;  %v4592_v8 = vld [vmem:[%s6465_s26 + $0xa4] sm:$0xf] }
  0x51   : > { %1610 = vmatpush.bf16.msra.mxu3 %v3945_v11  ;;  %v3798_v11 = vld [vmem:[%s6465_s26 + $0xa8] sm:$0xf0] }
  0x53   : > { %1582 = vmatpush.bf16.msra.mxu2 %v3873_v23  ;;  %v3726_v23 = vld [vmem:[%s6465_s26 + $0x18] sm:$0xf0] }
  0x9a   : > { %v859_v12 = vpop.f32.mrf.mxu0 }
  0x9b   : > { %v888_v13 = vpop.f32.mrf.mxu1  ;;  %v860_v24 = vadd.f32 %v859_v12, %v5251_v14  ;;  %v4596_v12 = vld [vmem:[%s6465_s26 + $0xc4] sm:$0xf] }
  0x9c   : > { %v889_v25 = vadd.f32 %v888_v13, %v5253_v15  ;;  %v3814_v13 = vld [vmem:[%s6465_s26 + $0xc8] sm:$0xf0] }
  0x9d   : > { %v966_v36 = vmax.f32 %v860_v24, 0.0  ;;  %v3817_v18 = vor.u32 %v4596_v12, %v3814_v13 }
  0x9e   : > { %v967_v37 = vmax.f32 %v889_v25, 0.0 }
  0x9f   : > { %1552 = vmatpush.bf16.msra.mxu1 %v3817_v18  ;;  %v3854_v18 = vld [vmem:[%s6465_s26 + $0x118] sm:$0xf0] }
  0xa1   : > { %v917_v29 = vpop.f32.mrf.mxu2 }
  0xa2   : > { %v946_v30 = vpop.f32.mrf.mxu3  ;;  %v861_v34 = vpop.f32.mrf.mxu0  ;;  %v918_v47 = vadd.f32 %v917_v29, %v5281_v32 }
  0xa3   : > { %v890_v35 = vpop.f32.mrf.mxu1  ;;  %v862_v38 = vadd.f32 %v861_v34, %v5251_v14  ;;  %v947_v52 = vadd.f32 %v946_v30, %v5283_v33  ;;  %v4578_v30 = vld [vmem:[%s6465_s26 + $0x34] sm:$0xf] }
  0xa4   : > { %v891_v39 = vadd.f32 %v890_v35, %v5253_v15  ;;  %v968_v0 = vmax.f32 %v918_v47, 0.0 }
  0xa5   : > { %v970_v42 = vmax.f32 %v862_v38, 0.0  ;;  %v969_v1 = vmax.f32 %v947_v52, 0.0  ;;  %v3934_v38 = vld [vmem:[%s6465_s26 + $0x1b8] sm:$0xf0] }
  0xa6   : > { %v971_v43 = vmax.f32 %v891_v39, 0.0 }
  0xa7   : > { %v5310_v53 = vpack.c.bf16 %v970_v42, %v966_v36  ;;  %v3745_v36 = vor.u32 %v4578_v30, %v3742_v31  ;;  %v3806_v42 = vld [vmem:[%s6465_s26 + $0xb8] sm:$0xf0]  ;;  %v4590_v30 = vld [vmem:[%s6465_s26 + $0x94] sm:$0xf] }
  0xa8   : > { %v5312_v54 = vpack.c.bf16 %v971_v43, %v967_v37  ;;  %v4626_v37 = vld [vmem:[%s6465_s26 + $0x1b4] sm:$0xf]  ;;  %v4608_v43 = vld [vmem:[%s6465_s26 + $0x124] sm:$0xf]  ;;  %v3809_v47 = vor.u32 %v4594_v41, %v3806_v42  ;;  %v3790_v31 = vld [vmem:[%s6465_s26 + $0x98] sm:$0xf0] }
  0xa9   : > { %v919_v58 = vpop.f32.mrf.mxu2  ;;  %1412 = vmatmul.bf16.vlgmr.msrb.gmra.mxu0 %v5310_v53  ;;  %v3937_v40 = vor.u32 %v4626_v37, %v3934_v38  ;;  %v3865_v49 = vor.u32 %v4608_v43, %v3862_v48  ;;  %v3793_v37 = vor.u32 %v4590_v30, %v3790_v31  ;;  %v3718_v38 = vld [vmem:[%s6465_s26 + $0x8] sm:$0xf0]  ;;  %v4604_v42 = vld [vmem:[%s6465_s26 + $0x104] sm:$0xf] }
  0xaa   : > { %v948_v59 = vpop.f32.mrf.mxu3  ;;  %1441 = vmatmul.bf16.vlgmr.msrb.gmra.mxu1 %v5312_v54  ;;  %v920_v60 = vadd.f32 %v919_v58, %v5281_v32  ;;  %v864_v62 = vpop.f32.mrf.mxu0  ;;  %1524 = vmatpush.bf16.msra.mxu0 %v3745_v36  ;;  %v3846_v43 = vld [vmem:[%s6465_s26 + $0x108] sm:$0xf0] }
  0xab   : > { %v949_v61 = vadd.f32 %v948_v59, %v5283_v33  ;;  %v893_v63 = vpop.f32.mrf.mxu1  ;;  %v865_v16 = vadd.f32 %v864_v62, %v5251_v14  ;;  %1611 = vmatpush.bf16.msra.mxu3 %v3937_v40  ;;  %1553 = vmatpush.bf16.msra.mxu1 %v3809_v47  ;;  %v3782_v40 = vld [vmem:[%s6465_s26 + $0x88] sm:$0xf0]  ;;  %v3849_v48 = vor.u32 %v4604_v42, %v3846_v43 }
  0xac   : > { %v972_v2 = vmax.f32 %v920_v60, 0.0  ;;  %v894_v17 = vadd.f32 %v893_v63, %v5253_v15  ;;  %1583 = vmatpush.bf16.msra.mxu2 %v3865_v49 }
  0xad   : > { %v973_v3 = vmax.f32 %v949_v61, 0.0  ;;  %v974_v26 = vmax.f32 %v865_v16, 0.0  ;;  %v3801_v16 = vor.u32 %v4592_v8, %v3798_v11 }
  0xae   : > { %v5333_v9 = vpack.c.bf16 %v972_v2, %v968_v0  ;;  %v975_v27 = vmax.f32 %v894_v17, 0.0  ;;  %v4576_v0 = vld [vmem:[%s6465_s26 + $0x24] sm:$0xf]  ;;  %v4606_v17 = vld [vmem:[%s6465_s26 + $0x114] sm:$0xf] }
  0xaf   : > { %v5335_v10 = vpack.c.bf16 %v973_v3, %v969_v1  ;;  %v3734_v1 = vld [vmem:[%s6465_s26 + $0x28] sm:$0xf0]  ;;  %v4624_v3 = vld [vmem:[%s6465_s26 + $0x1a4] sm:$0xf]  ;;  %1554 = vmatpush.bf16.msra.mxu1 %v3801_v16 }
  0xb0   : > { %1470 = vmatmul.bf16.vlgmr.msrb.gmra.mxu2 %v5333_v9  ;;  %v3737_v2 = vor.u32 %v4576_v0, %v3734_v1  ;;  %v3929_v7 = vor.u32 %v4624_v3, %v3926_v4 }
  0xb1   : > { %1499 = vmatmul.bf16.vlgmr.msrb.gmra.mxu3 %v5335_v10  ;;  %v922_v21 = vpop.f32.mrf.mxu2 }
  0xb2   : > { %v951_v22 = vpop.f32.mrf.mxu3  ;;  %v866_v24 = vpop.f32.mrf.mxu0  ;;  %v923_v39 = vadd.f32 %v922_v21, %v5281_v32  ;;  %1525 = vmatpush.bf16.msra.mxu0 %v3737_v2  ;;  %1612 = vmatpush.bf16.msra.mxu3 %v3929_v7 }
  0xb3   : > { %v895_v25 = vpop.f32.mrf.mxu1  ;;  %v867_v28 = vadd.f32 %v866_v24, %v5251_v14  ;;  %v952_v44 = vadd.f32 %v951_v22, %v5283_v33  ;;  %v3857_v22 = vor.u32 %v4606_v17, %v3854_v18  ;;  %v4622_v24 = vld [vmem:[%s6465_s26 + $0x194] sm:$0xf]  ;;  %1555 = vmatpush.bf16.msra.mxu1 %v3793_v37 }
  0xb4   : > { %v896_v29 = vadd.f32 %v895_v25, %v5253_v15  ;;  %v976_v58 = vmax.f32 %v923_v39, 0.0  ;;  %v3918_v25 = vld [vmem:[%s6465_s26 + $0x198] sm:$0xf0]  ;;  %v4588_v39 = vld [vmem:[%s6465_s26 + $0x84] sm:$0xf] }
  0xb5   : > { %v978_v34 = vmax.f32 %v867_v28, 0.0  ;;  %v977_v59 = vmax.f32 %v952_v44, 0.0  ;;  %v3729_v28 = vor.u32 %v4574_v19, %v3726_v23  ;;  %1584 = vmatpush.bf16.msra.mxu2 %v3857_v22  ;;  %v3785_v49 = vor.u32 %v4588_v39, %v3782_v40  ;;  %v4651_v39 = vld [vmem:[%s6467_s7 + $0x78] sm:$0xff]  ;;  %v5523_v40 = vld [vmem:[%s6468_s1] sm:$0x3]  ;;  %s6469_s1 = sld [smem:[#allocation9_spill]] }
  0xb6   : > { %v979_v35 = vmax.f32 %v896_v29, 0.0  ;;  %v3921_v29 = vor.u32 %v4622_v24, %v3918_v25 }
  0xb7   : > { %v5378_v45 = vpack.c.bf16 %v978_v34, %v974_v26  ;;  %v4572_v34 = vld [vmem:[%s6465_s26 + $0x4] sm:$0xf]  ;;  %1526 = vmatpush.bf16.msra.mxu0 %v3729_v28  ;;  %1556 = vmatpush.bf16.msra.mxu1 %v3785_v49 }
  0xb8   : > { %v5380_v46 = vpack.c.bf16 %v979_v35, %v975_v27  ;;  %v3721_v41 = vor.u32 %v4572_v34, %v3718_v38  ;;  %1613 = vmatpush.bf16.msra.mxu3 %v3921_v29 }
  0xb9   : > { %v924_v50 = vpop.f32.mrf.mxu2  ;;  %1417 = vmatmul.bf16.gmra.mxu0 %v5378_v45  ;;  %1585 = vmatpush.bf16.msra.mxu2 %v3849_v48 }
  0xba   : > { %v953_v51 = vpop.f32.mrf.mxu3  ;;  %1446 = vmatmul.bf16.gmra.mxu1 %v5380_v46  ;;  %v925_v52 = vadd.f32 %v924_v50, %v5281_v32  ;;  %v869_v56 = vpop.f32.mrf.mxu0 }
  0xbb   : > { %v954_v55 = vadd.f32 %v953_v51, %v5283_v33  ;;  %v898_v57 = vpop.f32.mrf.mxu1  ;;  %v870_v60 = vadd.f32 %v869_v56, %v5251_v14  ;;  %1527 = vmatpush.bf16.msra.mxu0 %v3721_v41  ;;  %1821 = vmatpush.bf16.msrb.mxu1 %v4651_v39  ;;  %v5526_v41 = vperm.slane %v5523_v40, 0 }
  0xbc   : > { %v899_v61 = vadd.f32 %v898_v57, %v5253_v15  ;;  %v980_v62 = vmax.f32 %v925_v52, 0.0 }
  0xbd   : > { %v981_v63 = vmax.f32 %v954_v55, 0.0  ;;  %v982_v12 = vmax.f32 %v870_v60, 0.0 }
  0xbe   : > { %v5403_v5 = vpack.c.bf16 %v980_v62, %v976_v58  ;;  %v983_v13 = vmax.f32 %v899_v61, 0.0  ;;  %v4620_v58 = vld [vmem:[%s6465_s26 + $0x184] sm:$0xf] }
  0xbf   : > { %v5405_v6 = vpack.c.bf16 %v981_v63, %v977_v59  ;;  %v3910_v59 = vld [vmem:[%s6465_s26 + $0x188] sm:$0xf0] }
  0xc0   : > { %1475 = vmatmul.bf16.gmra.mxu2 %v5403_v5  ;;  %v3913_v0 = vor.u32 %v4620_v58, %v3910_v59 }
  0xc1   : > { %1504 = vmatmul.bf16.gmra.mxu3 %v5405_v6  ;;  %v927_v20 = vpop.f32.mrf.mxu2 }
  0xc2   : > { %v956_v21 = vpop.f32.mrf.mxu3  ;;  %v871_v26 = vpop.f32.mrf.mxu0  ;;  %v928_v52 = vadd.f32 %v927_v20, %v5281_v32  ;;  %1614 = vmatpush.bf16.msra.mxu3 %v3913_v0 }
  0xc3   : > { %v900_v27 = vpop.f32.mrf.mxu1  ;;  %v872_v35 = vadd.f32 %v871_v26, %v5251_v14  ;;  %v957_v55 = vadd.f32 %v956_v21, %v5283_v33 }
  0xc4   : > { %v901_v36 = vadd.f32 %v900_v27, %v5253_v15  ;;  %v984_v1 = vmax.f32 %v928_v52, 0.0 }
  0xc5   : > { %v986_v44 = vmax.f32 %v872_v35, 0.0  ;;  %v985_v2 = vmax.f32 %v957_v55, 0.0 }
  0xc6   : > { %v987_v47 = vmax.f32 %v901_v36, 0.0 }
  0xc7   : > { %v5459_v50 = vpack.c.bf16 %v986_v44, %v982_v12  ;;  %v4650_v44 = vld [vmem:[%s6467_s7 + $0x70] sm:$0xff] }
  0xc8   : > { %v5461_v51 = vpack.c.bf16 %v987_v47, %v983_v13  ;;  %1822 = vmatpush.bf16.msrb.mxu1 %v4650_v44 }
  0xc9   : > { %v929_v56 = vpop.f32.mrf.mxu2  ;;  %1422 = vmatmul.bf16.gmra.mxu0 %v5459_v50 }
  0xca   : > { %v958_v57 = vpop.f32.mrf.mxu3  ;;  %1451 = vmatmul.bf16.gmra.mxu1 %v5461_v51  ;;  %v930_v60 = vadd.f32 %v929_v56, %v5281_v32  ;;  %v874_v62 = vpop.f32.mrf.mxu0 }
  0xcb   : > { %v959_v61 = vadd.f32 %v958_v57, %v5283_v33  ;;  %v903_v63 = vpop.f32.mrf.mxu1  ;;  %v875_v11 = vadd.f32 %v874_v62, %v5251_v14  ;;  %v4649_v57 = vld [vmem:[%s6467_s7 + $0x68] sm:$0xff] }
  0xcc   : > { %v988_v3 = vmax.f32 %v930_v60, 0.0  ;;  %v904_v12 = vadd.f32 %v903_v63, %v5253_v15  ;;  %1823 = vmatpush.bf16.msrb.mxu1 %v4649_v57 }
  0xcd   : > { %v989_v4 = vmax.f32 %v959_v61, 0.0  ;;  %v990_v19 = vmax.f32 %v875_v11, 0.0 }
  0xce   : > { %v1008_v7 = vpack.c.bf16 %v988_v3, %v984_v1  ;;  %v991_v20 = vmax.f32 %v904_v12, 0.0 }
  0xcf   : > { %v1009_v8 = vpack.c.bf16 %v989_v4, %v985_v2  ;;  %v4648_v4 = vld [vmem:[%s6467_s7 + $0x60] sm:$0xff] }
  0xd0   : > { %1480 = vmatmul.bf16.gmra.mxu2 %v1008_v7  ;;  %1824 = vmatpush.bf16.msrb.mxu1 %v4648_v4 }
  0xd1   : > { %1509 = vmatmul.bf16.gmra.mxu3 %v1009_v8  ;;  %v932_v13 = vpop.f32.mrf.mxu2 }
  0xd2   : > { %v961_v16 = vpop.f32.mrf.mxu3  ;;  %v876_v17 = vpop.f32.mrf.mxu0  ;;  %v933_v27 = vadd.f32 %v932_v13, %v5281_v32 }
  0xd3   : > { %v905_v18 = vpop.f32.mrf.mxu1  ;;  %v877_v21 = vadd.f32 %v876_v17, %v5251_v14  ;;  %v962_v28 = vadd.f32 %v961_v16, %v5283_v33 }
  0xd4   : > { %v906_v22 = vadd.f32 %v905_v18, %v5253_v15  ;;  %v992_v35 = vmax.f32 %v933_v27, 0.0 }
  0xd5   : > { %v994_v23 = vmax.f32 %v877_v21, 0.0  ;;  %v993_v14 = vmax.f32 %v962_v28, 0.0 }
  0xd6   : > { %v995_v24 = vmax.f32 %v906_v22, 0.0 }
  0xd7   : > { %v1010_v25 = vpack.c.bf16 %v994_v23, %v990_v19 }
  0xd8   : > { %v1011_v26 = vpack.c.bf16 %v995_v24, %v991_v20  ;;  %v4647_v20 = vld [vmem:[%s6467_s7 + $0x58] sm:$0xff] }
  0xd9   : > { %v934_v29 = vpop.f32.mrf.mxu2  ;;  %1427 = vmatmul.bf16.gmra.mxu0 %v1010_v25  ;;  %1825 = vmatpush.bf16.msrb.mxu1 %v4647_v20 }
  0xda   : > { %v963_v30 = vpop.f32.mrf.mxu3  ;;  %1456 = vmatmul.bf16.gmra.mxu1 %v1011_v26  ;;  %v935_v31 = vadd.f32 %v934_v29, %v5281_v32  ;;  %v4643_v32 = vld [vmem:[%s6467_s7 + $0x38] sm:$0xff] }
  0xdb   : > { %v964_v34 = vadd.f32 %v963_v30, %v5283_v33  ;;  %1792 = vmatpush.bf16.msrb.mxu0 %v4643_v32  ;;  %v4642_v33 = vld [vmem:[%s6467_s7 + $0x30] sm:$0xff] }
  0xdc   : > { %v996_v36 = vmax.f32 %v935_v31, 0.0  ;;  %v4646_v31 = vld [vmem:[%s6467_s7 + $0x50] sm:$0xff] }
  0xdd   : > { %v997_v15 = vmax.f32 %v964_v34, 0.0  ;;  %1826 = vmatpush.bf16.msrb.mxu1 %v4646_v31 }
  0xde   : > { %v1012_v37 = vpack.c.bf16 %v996_v36, %v992_v35 }
  0xdf   : > { %v1013_v38 = vpack.c.bf16 %v997_v15, %v993_v14  ;;  %1793 = vmatpush.bf16.msrb.mxu0 %v4642_v33 }
  0xe0   : > { %1485 = vmatmul.bf16.gmra.mxu2 %v1012_v37 }
  0xe1   : > { %1514 = vmatmul.bf16.gmra.mxu3 %v1013_v38 }
  0xe9   : > { %1528 = vmatmul.bf16.vlgmr.msra.gmra.mxu0 %v5310_v53  ;;  %v4641_v53 = vld [vmem:[%s6467_s7 + $0x28] sm:$0xff] }
  0xea   : > { %1557 = vmatmul.bf16.vlgmr.msra.gmra.mxu1 %v5312_v54  ;;  %1794 = vmatpush.bf16.msrb.mxu0 %v4641_v53  ;;  %v4640_v54 = vld [vmem:[%s6467_s7 + $0x20] sm:$0xff]  ;;  %v4645_v53 = vld [vmem:[%s6467_s7 + $0x48] sm:$0xff] }
  0xeb   : > { %1827 = vmatpush.bf16.msrb.mxu1 %v4645_v53 }
  0xee   : > { %1795 = vmatpush.bf16.msrb.mxu0 %v4640_v54 }
  0xf0   : > { %1586 = vmatmul.bf16.vlgmr.msra.gmra.mxu2 %v5333_v9  ;;  %v4639_v9 = vld [vmem:[%s6467_s7 + $0x18] sm:$0xff] }
  0xf1   : > { %1615 = vmatmul.bf16.vlgmr.msra.gmra.mxu3 %v5335_v10  ;;  %v4638_v10 = vld [vmem:[%s6467_s7 + $0x10] sm:$0xff] }
  0xf2   : > { %1796 = vmatpush.bf16.msrb.mxu0 %v4639_v9 }
  0xf6   : > { %1797 = vmatpush.bf16.msrb.mxu0 %v4638_v10 }
  0xf9   : > { %1533 = vmatmul.bf16.gmra.mxu0 %v5378_v45  ;;  %v4637_v45 = vld [vmem:[%s6467_s7 + $0x8] sm:$0xff] }
  0xfa   : > { %1562 = vmatmul.bf16.gmra.mxu1 %v5380_v46  ;;  %1798 = vmatpush.bf16.msrb.mxu0 %v4637_v45  ;;  %v4636_v46 = vld [vmem:[%s6467_s7] sm:$0xff] }
  0xfe   : > { %1799 = vmatpush.bf16.msrb.mxu0 %v4636_v46 }
 0x100   : > { %1591 = vmatmul.bf16.gmra.mxu2 %v5403_v5 }
 0x101   : > { %1620 = vmatmul.bf16.gmra.mxu3 %v5405_v6 }
 0x109   : > { %1538 = vmatmul.bf16.gmra.mxu0 %v5459_v50 }
 0x10a   : > { %1567 = vmatmul.bf16.gmra.mxu1 %v5461_v51 }
 0x110   : > { %1596 = vmatmul.bf16.gmra.mxu2 %v1008_v7 }
 0x111   : > { %1625 = vmatmul.bf16.gmra.mxu3 %v1009_v8 }
 0x119   : > { %1543 = vmatmul.bf16.gmra.mxu0 %v1010_v25 }
 0x11a   : > { %1572 = vmatmul.bf16.gmra.mxu1 %v1011_v26 }
 0x120   : > { %1601 = vmatmul.bf16.gmra.mxu2 %v1012_v37 }
 0x121   : > { %1630 = vmatmul.bf16.gmra.mxu3 %v1013_v38 }
 0x126   : > { %v1413_v5 = vpop.f32.mrf.mxu0 }
 0x127   : > { %v1442_v6 = vpop.f32.mrf.mxu1  ;;  %v1414_v47 = vadd.f32 %v1413_v5, %v5526_v41 }
 0x129   : > { %v1443_v50 = vadd.f32 %v1442_v6, %v1414_v47 }
 0x12e   : > { %v1415_v42 = vpop.f32.mrf.mxu0 }
 0x12f   : > { %v1444_v43 = vpop.f32.mrf.mxu1  ;;  %v1416_v51 = vadd.f32 %v1415_v42, %v5526_v41  ;;  %v4644_v42 = vld [vmem:[%s6467_s7 + $0x40] sm:$0xff] }
 0x130   : > { %1828 = vmatpush.bf16.msrb.mxu1 %v4644_v42 }
 0x131   : > { %v1445_v58 = vadd.f32 %v1444_v43, %v1416_v51 }
 0x133   : > { %v1471_v48 = vpop.f32.mrf.mxu2 }
 0x134   : > { %v1500_v49 = vpop.f32.mrf.mxu3  ;;  %v1472_v56 = vadd.f32 %v1471_v48, %v1443_v50 }
 0x136   : > { %v1418_v52 = vpop.f32.mrf.mxu0  ;;  %v1501_v61 = vadd.f32 %v1500_v49, %v1472_v56 }
 0x137   : > { %v1447_v55 = vpop.f32.mrf.mxu1  ;;  %v1419_v7 = vadd.f32 %v1418_v52, %v5526_v41 }
 0x138   : > { %v1636_v2 = vmax.f32 %v1501_v61, 0.0 }
 0x139   : > { %v1448_v13 = vadd.f32 %v1447_v55, %v1419_v7 }
 0x13b   : > { %v1473_v59 = vpop.f32.mrf.mxu2 }
 0x13c   : > { %v1502_v60 = vpop.f32.mrf.mxu3  ;;  %v1474_v62 = vadd.f32 %v1473_v59, %v1445_v58 }
 0x13e   : > { %v1503_v63 = vadd.f32 %v1502_v60, %v1474_v62  ;;  %v1420_v0 = vpop.f32.mrf.mxu0 }
 0x13f   : > { %v1449_v1 = vpop.f32.mrf.mxu1  ;;  %v1421_v16 = vadd.f32 %v1420_v0, %v5526_v41 }
 0x140   : > { %v1638_v3 = vmax.f32 %v1503_v63, 0.0  ;;  %v5558_v63 = vperm.slane %v5523_v40, 1 }
 0x141   : > { %v1450_v21 = vadd.f32 %v1449_v1, %v1421_v16 }
 0x142   : > { %v1652_v8 = vpack.c.bf16 %v1638_v3, %v1636_v2 }
 0x143   : > { %v1476_v11 = vpop.f32.mrf.mxu2 }
 0x144   : > { %v1505_v12 = vpop.f32.mrf.mxu3  ;;  %1800 = vmatmul.bf16.vlgmr.msrb.gmra.mxu0 %v1652_v8  ;;  %v1477_v19 = vadd.f32 %v1476_v11, %v1448_v13 }
 0x146   : > { %v1423_v17 = vpop.f32.mrf.mxu0  ;;  %v1506_v24 = vadd.f32 %v1505_v12, %v1477_v19 }
 0x147   : > { %v1452_v18 = vpop.f32.mrf.mxu1  ;;  %v1424_v34 = vadd.f32 %v1423_v17, %v5526_v41 }
 0x148   : > { %v1640_v29 = vmax.f32 %v1506_v24, 0.0 }
 0x149   : > { %v1453_v15 = vadd.f32 %v1452_v18, %v1424_v34 }
 0x14b   : > { %v1478_v22 = vpop.f32.mrf.mxu2 }
 0x14c   : > { %v1507_v23 = vpop.f32.mrf.mxu3  ;;  %v1479_v25 = vadd.f32 %v1478_v22, %v1450_v21 }
 0x14e   : > { %v1508_v26 = vadd.f32 %v1507_v23, %v1479_v25  ;;  %v1425_v27 = vpop.f32.mrf.mxu0 }
 0x14f   : > { %v1454_v28 = vpop.f32.mrf.mxu1  ;;  %v1426_v37 = vadd.f32 %v1425_v27, %v5526_v41 }
 0x150   : > { %v1642_v30 = vmax.f32 %v1508_v26, 0.0 }
 0x151   : > { %v1455_v54 = vadd.f32 %v1454_v28, %v1426_v37 }
 0x152   : > { %v1654_v35 = vpack.c.bf16 %v1642_v30, %v1640_v29 }
 0x153   : > { %v1481_v14 = vpop.f32.mrf.mxu2 }
 0x154   : > { %v1510_v36 = vpop.f32.mrf.mxu3  ;;  %1805 = vmatmul.bf16.gmra.mxu0 %v1654_v35  ;;  %v1482_v33 = vadd.f32 %v1481_v14, %v1453_v15 }
 0x156   : > { %v1428_v38 = vpop.f32.mrf.mxu0  ;;  %v1511_v45 = vadd.f32 %v1510_v36, %v1482_v33 }
 0x157   : > { %v1457_v32 = vpop.f32.mrf.mxu1  ;;  %v1429_v47 = vadd.f32 %v1428_v38, %v5526_v41 }
 0x158   : > { %v1644_v43 = vmax.f32 %v1511_v45, 0.0 }
 0x159   : > { %v1458_v51 = vadd.f32 %v1457_v32, %v1429_v47 }
 0x15b   : > { %v1483_v9 = vpop.f32.mrf.mxu2 }
 0x15c   : > { %v1512_v10 = vpop.f32.mrf.mxu3  ;;  %v1484_v46 = vadd.f32 %v1483_v9, %v1455_v54 }
 0x15e   : > { %v1513_v5 = vadd.f32 %v1512_v10, %v1484_v46  ;;  %v1430_v6 = vpop.f32.mrf.mxu0 }
 0x15f   : > { %v1459_v39 = vpop.f32.mrf.mxu1  ;;  %v1431_v52 = vadd.f32 %v1430_v6, %v5526_v41 }
 0x160   : > { %v1646_v44 = vmax.f32 %v1513_v5, 0.0 }
 0x161   : > { %v1460_v58 = vadd.f32 %v1459_v39, %v1431_v52 }
 0x162   : > { %v1656_v48 = vpack.c.bf16 %v1646_v44, %v1644_v43 }
 0x163   : > { %v1486_v49 = vpop.f32.mrf.mxu2 }
 0x164   : > { %v1515_v50 = vpop.f32.mrf.mxu3  ;;  %1810 = vmatmul.bf16.gmra.mxu0 %v1656_v48  ;;  %v1487_v57 = vadd.f32 %v1486_v49, %v1458_v51 }
 0x166   : > { %v1529_v55 = vpop.f32.mrf.mxu0  ;;  %v1516_v61 = vadd.f32 %v1515_v50, %v1487_v57 }
 0x167   : > { %v1558_v56 = vpop.f32.mrf.mxu1  ;;  %v1530_v7 = vadd.f32 %v1529_v55, %v5558_v63 }
 0x168   : > { %v1648_v3 = vmax.f32 %v1516_v61, 0.0 }
 0x169   : > { %v1559_v12 = vadd.f32 %v1558_v56, %v1530_v7 }
 0x16b   : > { %v1488_v59 = vpop.f32.mrf.mxu2 }
 0x16c   : > { %v1517_v60 = vpop.f32.mrf.mxu3  ;;  %v1489_v62 = vadd.f32 %v1488_v59, %v1460_v58 }
 0x16e   : > { %v1518_v0 = vadd.f32 %v1517_v60, %v1489_v62  ;;  %v1531_v1 = vpop.f32.mrf.mxu0 }
 0x16f   : > { %v1560_v2 = vpop.f32.mrf.mxu1  ;;  %v1532_v13 = vadd.f32 %v1531_v1, %v5558_v63 }
 0x170   : > { %v1650_v4 = vmax.f32 %v1518_v0, 0.0 }
 0x171   : > { %v1561_v19 = vadd.f32 %v1560_v2, %v1532_v13 }
 0x172   : > { %v1658_v8 = vpack.c.bf16 %v1650_v4, %v1648_v3 }
 0x173   : > { %v1587_v41 = vpop.f32.mrf.mxu2 }
 0x174   : > { %v1616_v11 = vpop.f32.mrf.mxu3  ;;  %1815 = vmatmul.bf16.gmra.mxu0 %v1658_v8  ;;  %v1588_v18 = vadd.f32 %v1587_v41, %v1559_v12  ;;  %v4659_v41 = vld [vmem:[%s6435_s8 + $0x38] sm:$0xff] }
 0x175   : > { %1930 = vmatpush.bf16.msrb.mxu2 %v4659_v41 }
 0x176   : > { %v1534_v16 = vpop.f32.mrf.mxu0  ;;  %v1617_v21 = vadd.f32 %v1616_v11, %v1588_v18 }
 0x177   : > { %v1563_v17 = vpop.f32.mrf.mxu1  ;;  %v1535_v28 = vadd.f32 %v1534_v16, %v5558_v63 }
 0x178   : > { %v1637_v25 = vmax.f32 %v1617_v21, 0.0  ;;  %v4656_v21 = vld [vmem:[%s6435_s8 + $0x20] sm:$0xff] }
 0x179   : > { %v1564_v34 = vadd.f32 %v1563_v17, %v1535_v28 }
 0x17b   : > { %v1589_v40 = vpop.f32.mrf.mxu2 }
 0x17c   : > { %v1618_v20 = vpop.f32.mrf.mxu3  ;;  %v1590_v22 = vadd.f32 %v1589_v40, %v1561_v19 }
 0x17e   : > { %v1619_v23 = vadd.f32 %v1618_v20, %v1590_v22  ;;  %v1536_v24 = vpop.f32.mrf.mxu0  ;;  %v4657_v20 = vld [vmem:[%s6435_s8 + $0x28] sm:$0xff]  ;;  %v4655_v22 = vld [vmem:[%s6435_s8 + $0x18] sm:$0xff] }
 0x17f   : > { %v1565_v27 = vpop.f32.mrf.mxu1  ;;  %v1537_v35 = vadd.f32 %v1536_v24, %v5558_v63  ;;  %v4653_v24 = vld [vmem:[%s6435_s8 + $0x8] sm:$0xff] }
 0x180   : > { %v1639_v26 = vmax.f32 %v1619_v23, 0.0  ;;  %v4654_v23 = vld [vmem:[%s6435_s8 + $0x10] sm:$0xff] }
 0x181   : > { %v1566_v15 = vadd.f32 %v1565_v27, %v1537_v35 }
 0x182   : > { %v1653_v29 = vpack.c.bf16 %v1639_v26, %v1637_v25  ;;  %v4652_v25 = vld [vmem:[%s6435_s8] sm:$0xff] }
 0x183   : > { %v1592_v30 = vpop.f32.mrf.mxu2 }
 0x184   : > { %v1621_v31 = vpop.f32.mrf.mxu3  ;;  %1829 = vmatmul.bf16.vlgmr.msrb.gmra.mxu1 %v1653_v29  ;;  %v1593_v36 = vadd.f32 %v1592_v30, %v1564_v34  ;;  %v4789_v29 = vld [vmem:[%s6469_s1] ss:$0 sm:$0xff]  ;;  %s5615_s1 = sshll.u32 %s6472_s28, 3  ;;  %s4819_s28 = smov 120  }
 0x185   : > { %s5624_s3 = scalar_lea.vmem %s6450_s23, %s5615_s1  ;;  %s5673_s2 = scalar_lea.vmem %s6470_s30, %s5615_s1 }
 0x186   : > { %v1539_v14 = vpop.f32.mrf.mxu0  ;;  %v1622_v33 = vadd.f32 %v1621_v31, %v1593_v36  ;;  %s6414_s24 = scalar_lea.vmem %s6449_s22, %s5615_s1 }
 0x187   : > { %v1568_v37 = vpop.f32.mrf.mxu1  ;;  %v1540_v46 = vadd.f32 %v1539_v14, %v5558_v63 }
 0x188   : > { %v1641_v10 = vmax.f32 %v1622_v33, 0.0 }
 0x189   : > { %v1569_v43 = vadd.f32 %v1568_v37, %v1540_v46 }
 0x18b   : > { %v1594_v38 = vpop.f32.mrf.mxu2 }
 0x18c   : > { %v1623_v32 = vpop.f32.mrf.mxu3  ;;  %v1595_v53 = vadd.f32 %v1594_v38, %v1566_v15 }
 0x18e   : > { %v1624_v54 = vadd.f32 %v1623_v32, %v1595_v53  ;;  %v1541_v9 = vpop.f32.mrf.mxu0 }
 0x18f   : > { %v1570_v42 = vpop.f32.mrf.mxu1  ;;  %v1542_v44 = vadd.f32 %v1541_v9, %v5558_v63 }
 0x190   : > { %v1643_v45 = vmax.f32 %v1624_v54, 0.0 }
 0x191   : > { %v1571_v49 = vadd.f32 %v1570_v42, %v1542_v44  ;;  %v4663_v42 = vld [vmem:[%s6437_s10 + $0x18] sm:$0xff] }
 0x192   : > { %v1655_v5 = vpack.c.bf16 %v1643_v45, %v1641_v10  ;;  %2024 = vmatpush.bf16.msrb.mxu3 %v4663_v42 }
 0x193   : > { %v1597_v6 = vpop.f32.mrf.mxu2 }
 0x194   : > { %v1626_v39 = vpop.f32.mrf.mxu3  ;;  %1834 = vmatmul.bf16.gmra.mxu1 %v1655_v5  ;;  %v1598_v47 = vadd.f32 %v1597_v6, %v1569_v43 }
 0x196   : > { %v1544_v48 = vpop.f32.mrf.mxu0  ;;  %v1627_v52 = vadd.f32 %v1626_v39, %v1598_v47  ;;  %v4662_v47 = vld [vmem:[%s6437_s10 + $0x10] sm:$0xff] }
 0x197   : > { %v1573_v57 = vpop.f32.mrf.mxu1  ;;  %v1545_v60 = vadd.f32 %v1544_v48, %v5558_v63  ;;  %2025 = vmatpush.bf16.msrb.mxu3 %v4662_v47 }
 0x198   : > { %v1645_v58 = vmax.f32 %v1627_v52, 0.0 }
 0x199   : > { %v1574_v2 = vadd.f32 %v1573_v57, %v1545_v60 }
 0x19b   : > { %v1599_v50 = vpop.f32.mrf.mxu2 }
 0x19c   : > { %v1628_v51 = vpop.f32.mrf.mxu3  ;;  %v1600_v55 = vadd.f32 %v1599_v50, %v1571_v49  ;;  %v4661_v49 = vld [vmem:[%s6437_s10 + $0x8] sm:$0xff] }
 0x19d   : > { %2026 = vmatpush.bf16.msrb.mxu3 %v4661_v49 }
 0x19e   : > { %v1629_v56 = vadd.f32 %v1628_v51, %v1600_v55  ;;  %v1546_v61 = vpop.f32.mrf.mxu0 }
 0x19f   : > { %v1547_v3 = vadd.f32 %v1546_v61, %v5558_v63  ;;  %v1575_v7 = vpop.f32.mrf.mxu1  ;;  %v4658_v63 = vld [vmem:[%s6435_s8 + $0x30] sm:$0xff] }
 0x1a0   : > { %v1647_v59 = vmax.f32 %v1629_v56, 0.0  ;;  %1931 = vmatpush.bf16.msrb.mxu2 %v4658_v63  ;;  %v4660_v56 = vld [vmem:[%s6437_s10] sm:$0xff] }
 0x1a1   : > { %v1576_v8 = vadd.f32 %v1575_v7, %v1547_v3  ;;  %2027 = vmatpush.bf16.msrb.mxu3 %v4660_v56 }
 0x1a2   : > { %v1657_v62 = vpack.c.bf16 %v1647_v59, %v1645_v58 }
 0x1a3   : > { %v1602_v0 = vpop.f32.mrf.mxu2 }
 0x1a4   : > { %v1631_v1 = vpop.f32.mrf.mxu3  ;;  %1839 = vmatmul.bf16.gmra.mxu1 %v1657_v62  ;;  %v1603_v4 = vadd.f32 %v1602_v0, %v1574_v2  ;;  %1932 = vmatpush.bf16.msrb.mxu2 %v4657_v20 }
 0x1a6   : > { %v1632_v12 = vadd.f32 %v1631_v1, %v1603_v4 }
 0x1a8   : > { %v1649_v18 = vmax.f32 %v1632_v12, 0.0  ;;  %1933 = vmatpush.bf16.msrb.mxu2 %v4656_v21  ;;  %v4790_v12 = vld [vmem:[%s6436_s9] ss:$0 sm:$0xff] }
 0x1ab   : > { %v1604_v11 = vpop.f32.mrf.mxu2 }
 0x1ac   : > { %v1605_v13 = vadd.f32 %v1604_v11, %v1576_v8  ;;  %v1633_v16 = vpop.f32.mrf.mxu3  ;;  %1934 = vmatpush.bf16.msrb.mxu2 %v4655_v22 }
 0x1ae   : > { %v1634_v17 = vadd.f32 %v1633_v16, %v1605_v13 }
 0x1b0   : > { %v1651_v19 = vmax.f32 %v1634_v17, 0.0  ;;  %1935 = vmatpush.bf16.msrb.mxu2 %v4654_v23 }
 0x1b2   : > { %v1659_v40 = vpack.c.bf16 %v1651_v19, %v1649_v18 }
 0x1b4   : > { %1844 = vmatmul.bf16.gmra.mxu1 %v1659_v40  ;;  %1936 = vmatpush.bf16.msrb.mxu2 %v4653_v24 }
 0x1b8   : > { %1937 = vmatpush.bf16.msrb.mxu2 %v4652_v25 }
 0x1c1   : > { %v1801_v26 = vpop.f32.mrf.mxu0 }
 0x1c2   : > { %v1802_v31 = vadd.f32 %v4789_v29, %v1801_v26 }
 0x1c9   : > { %v1803_v27 = vpop.f32.mrf.mxu0 }
 0x1ca   : > { %v1804_v34 = vadd.f32 %v4789_v29, %v1803_v27 }
 0x1d1   : > { %v1806_v30 = vpop.f32.mrf.mxu0 }
 0x1d2   : > { %v1807_v53 = vadd.f32 %v4789_v29, %v1806_v30 }
 0x1d9   : > { %v1808_v38 = vpop.f32.mrf.mxu0 }
 0x1da   : > { %v1809_v9 = vadd.f32 %v4789_v29, %v1808_v38 }
 0x1e1   : > { %v1811_v54 = vpop.f32.mrf.mxu0 }
 0x1e2   : > { %v1812_v48 = vadd.f32 %v4789_v29, %v1811_v54 }
 0x1e9   : > { %v1813_v43 = vpop.f32.mrf.mxu0 }
 0x1ea   : > { %v1814_v50 = vadd.f32 %v4789_v29, %v1813_v43 }
 0x1f1   : > { %v1816_v57 = vpop.f32.mrf.mxu0 }
 0x1f2   : > { %v1817_v0 = vadd.f32 %v4789_v29, %v1816_v57 }
 0x1f9   : > { %v1818_v62 = vpop.f32.mrf.mxu0 }
 0x1fa   : > { %v1819_v1 = vadd.f32 %v4789_v29, %v1818_v62 }
 0x201   : > { %v1830_v28 = vpop.f32.mrf.mxu1 }
 0x202   : > { %v1831_v35 = vadd.f32 %v1830_v28, %v1802_v31 }
 0x204   : > { %v1850_v15 = vmax.f32 %v1831_v35, 0.0 }
 0x209   : > { %v1832_v14 = vpop.f32.mrf.mxu1 }
 0x20a   : > { %v1833_v36 = vadd.f32 %v1832_v14, %v1804_v34 }
 0x20c   : > { %v1851_v37 = vmax.f32 %v1833_v36, 0.0 }
 0x20e   : > { %v1858_v32 = vpack.c.bf16 %v1851_v37, %v1850_v15 }
 0x210   : > { %1938 = vmatmul.bf16.vlgmr.msrb.gmra.mxu2 %v1858_v32 }
 0x211   : > { %v1835_v33 = vpop.f32.mrf.mxu1 }
 0x212   : > { %v1836_v10 = vadd.f32 %v1835_v33, %v1807_v53  ;;  %v4791_v33 = vld [vmem:[%s6438_s11] ss:$0 sm:$0xff] }
 0x214   : > { %v1852_v5 = vmax.f32 %v1836_v10, 0.0 }
 0x219   : > { %v1837_v45 = vpop.f32.mrf.mxu1 }
 0x21a   : > { %v1838_v46 = vadd.f32 %v1837_v45, %v1809_v9 }
 0x21c   : > { %v1853_v6 = vmax.f32 %v1838_v46, 0.0 }
 0x21e   : > { %v1859_v39 = vpack.c.bf16 %v1853_v6, %v1852_v5 }
 0x220   : > { %1943 = vmatmul.bf16.gmra.mxu2 %v1859_v39 }
 0x221   : > { %v1840_v44 = vpop.f32.mrf.mxu1 }
 0x222   : > { %v1841_v51 = vadd.f32 %v1840_v44, %v1812_v48 }
 0x224   : > { %v1854_v58 = vmax.f32 %v1841_v51, 0.0 }
 0x229   : > { %v1842_v52 = vpop.f32.mrf.mxu1 }
 0x22a   : > { %v1843_v55 = vadd.f32 %v1842_v52, %v1814_v50 }
 0x22c   : > { %v1855_v59 = vmax.f32 %v1843_v55, 0.0 }
 0x22e   : > { %v1860_v60 = vpack.c.bf16 %v1855_v59, %v1854_v58 }
 0x230   : > { %1948 = vmatmul.bf16.gmra.mxu2 %v1860_v60 }
 0x231   : > { %v1845_v61 = vpop.f32.mrf.mxu1 }
 0x232   : > { %v1846_v2 = vadd.f32 %v1845_v61, %v1817_v0  ;;  %v2133_v61 = vld [vmem:[%s6439_s12] sm:$0xf] }
 0x233   : > { %v2153_v62 = vsel %vm2151_vm2, %v2133_v61, 0 }
 0x234   : > { %v1856_v7 = vmax.f32 %v1846_v2, 0.0  ;;  %2162 = vmatpush.bf16.msra.mxu0 %v2153_v62 }
 0x239   : > { %v1847_v3 = vpop.f32.mrf.mxu1 }
 0x23a   : > { %v1848_v4 = vadd.f32 %v1847_v3, %v1819_v1 }
 0x23c   : > { %v1857_v8 = vmax.f32 %v1848_v4, 0.0 }
 0x23e   : > { %v1861_v41 = vpack.c.bf16 %v1857_v8, %v1856_v7 }
 0x240   : > { %1953 = vmatmul.bf16.gmra.mxu2 %v1861_v41 }
 0x293   : > { %v1939_v11 = vpop.f32.mrf.mxu2 }
 0x294   : > { %v1940_v13 = vadd.f32 %v4790_v12, %v1939_v11 }
 0x296   : > { %v1959_v18 = vmax.f32 %v1940_v13, 0.0 }
 0x29b   : > { %v1941_v16 = vpop.f32.mrf.mxu2 }
 0x29c   : > { %v1942_v17 = vadd.f32 %v4790_v12, %v1941_v16 }
 0x29e   : > { %v1960_v19 = vmax.f32 %v1942_v17, 0.0 }
 0x2a0   : > { %v1967_v40 = vpack.c.bf16 %v1960_v19, %v1959_v18 }
 0x2a2   : > { %4082 = vmatmul.msk.bf16.vlgmr.msrb.gmra.mxu3 %vm2007_vm1, %v1967_v40 }
 0x2a3   : > { %v1944_v63 = vpop.f32.mrf.mxu2 }
 0x2a4   : > { %v1945_v20 = vadd.f32 %v4790_v12, %v1944_v63 }
 0x2a6   : > { %v1961_v23 = vmax.f32 %v1945_v20, 0.0  ;;  %v2073_v20 = vld [vmem:[%s5673_s2] sm:$0xff] }
 0x2ab   : > { %v1946_v21 = vpop.f32.mrf.mxu2 }
 0x2ac   : > { %v1947_v22 = vadd.f32 %v4790_v12, %v1946_v21  ;;  %v2074_v21 = vld [vmem:[%s5673_s2 + $0x8] sm:$0xff] }
 0x2ae   : > { %v1962_v24 = vmax.f32 %v1947_v22, 0.0 }
 0x2b0   : > { %v1968_v25 = vpack.c.bf16 %v1962_v24, %v1961_v23 }
 0x2b2   : > { %4083 = vmatmul.msk.bf16.gmra.mxu3 %vm2007_vm1, %v1968_v25 }
 0x2b3   : > { %v1949_v26 = vpop.f32.mrf.mxu2 }
 0x2b4   : > { %v1950_v27 = vadd.f32 %v4790_v12, %v1949_v26 }
 0x2b6   : > { %v1963_v30 = vmax.f32 %v1950_v27, 0.0 }
 0x2bb   : > { %v1951_v28 = vpop.f32.mrf.mxu2 }
 0x2bc   : > { %v1952_v29 = vadd.f32 %v4790_v12, %v1951_v28 }
 0x2be   : > { %v1964_v31 = vmax.f32 %v1952_v29, 0.0  ;;  %v2075_v29 = vld [vmem:[%s5673_s2 + $0x10] sm:$0xff] }
 0x2c0   : > { %v1969_v34 = vpack.c.bf16 %v1964_v31, %v1963_v30  ;;  %v2076_v30 = vld [vmem:[%s5673_s2 + $0x18] sm:$0xff] }
 0x2c2   : > { %4084 = vmatmul.msk.bf16.gmra.mxu3 %vm2007_vm1, %v1969_v34 }
 0x2c3   : > { %v1954_v35 = vpop.f32.mrf.mxu2 }
 0x2c4   : > { %v1955_v14 = vadd.f32 %v4790_v12, %v1954_v35 }
 0x2c6   : > { %v1965_v37 = vmax.f32 %v1955_v14, 0.0 }
 0x2cb   : > { %v1956_v36 = vpop.f32.mrf.mxu2 }
 0x2cc   : > { %v1957_v15 = vadd.f32 %v4790_v12, %v1956_v36 }
 0x2ce   : > { %v1966_v38 = vmax.f32 %v1957_v15, 0.0 }
 0x2d0   : > { %v1970_v32 = vpack.c.bf16 %v1966_v38, %v1965_v37  ;;  %v4667_v38 = vld [vmem:[%s6441_s14 + $0x18] sm:$0xff] }
 0x2d1   : > { %2248 = vmatpush.bf16.msra.mxu1 %v4667_v38 }
 0x2d2   : > { %4085 = vmatmul.msk.bf16.gmra.mxu3 %vm2007_vm1, %v1970_v32  ;;  %v4666_v32 = vld [vmem:[%s6441_s14 + $0x10] sm:$0xff] }
 0x2d5   : > { %2249 = vmatpush.bf16.msra.mxu1 %v4666_v32 }
 0x325   : > { %v2029_v53 = vpop.f32.mrf.mxu3 }
 0x326   : > { %v5626_v54 = vadd.f32 %v4791_v33, %v2029_v53 }
 0x328   : > { %v2049_v9 = vmul.f32 0.5, %v5626_v54  ;;  %3527 = vst [vmem:[%s5624_s3] sm:$0xff] %v5626_v54 }
 0x32a   : > { %v2057_v10 = vmul.f32 1.442695, %v2049_v9 }
 0x32c   : > { %4795 = vpow2.f32 %v2057_v10  ;;  %v4665_v10 = vld [vmem:[%s6441_s14 + $0x8] sm:$0xff] }
 0x32d   : > { %v2031_v45 = vpop.f32.mrf.mxu3  ;;  %2250 = vmatpush.bf16.msra.mxu1 %v4665_v10 }
 0x32e   : > { %v5631_v46 = vadd.f32 %v4791_v33, %v2031_v45 }
 0x330   : > { %v2050_v5 = vmul.f32 0.5, %v5631_v46  ;;  %3528 = vst [vmem:[%s5624_s3 + $0x8] sm:$0xff] %v5631_v46 }
 0x332   : > { %v4796_v6 = vpop.eup %4795  ;;  %v2059_v39 = vmul.f32 1.442695, %v2050_v5  ;;  %v4664_v5 = vld [vmem:[%s6441_s14] sm:$0xff] }
 0x333   : > { %2089 = vrot.lane.b32.xlu0 %v4796_v6, %s4819_s28  ;;  %2251 = vmatpush.bf16.msra.mxu1 %v4664_v5  ;;  %v4128_v5 = vld [vmem:[%s6443_s16 + $0x20] sm:$0xf] }
 0x334   : > { %4797 = vpow2.f32 %v2059_v39 }
 0x335   : > { %v2034_v42 = vpop.f32.mrf.mxu3 }
 0x336   : > { %v5637_v43 = vadd.f32 %v4791_v33, %v2034_v42  ;;  %v2079_v42 = vld [vmem:[%s5673_s2 + $0x30] sm:$0xff] }
 0x338   : > { %v2051_v44 = vmul.f32 0.5, %v5637_v43  ;;  %3529 = vst [vmem:[%s5624_s3 + $0x10] sm:$0xff] %v5637_v43 }
 0x33a   : > { %v4798_v47 = vpop.eup %4797  ;;  %v2061_v48 = vmul.f32 1.442695, %v2051_v44  ;;  %v2080_v44 = vld [vmem:[%s5673_s2 + $0x38] sm:$0xff] }
 0x33b   : > { %2091 = vrot.lane.b32.xlu0 %v4798_v47, %s4819_s28 }
 0x33c   : > { %4799 = vpow2.f32 %v2061_v48 }
 0x33d   : > { %v2036_v49 = vpop.f32.mrf.mxu3 }
 0x33e   : > { %v5643_v50 = vadd.f32 %v4791_v33, %v2036_v49 }
 0x340   : > { %v2052_v51 = vmul.f32 0.5, %v5643_v50  ;;  %3530 = vst [vmem:[%s5624_s3 + $0x18] sm:$0xff] %v5643_v50 }
 0x342   : > { %v4800_v52 = vpop.eup %4799  ;;  %v2063_v55 = vmul.f32 1.442695, %v2052_v51 }
 0x343   : > { %2093 = vrot.lane.b32.xlu1 %v4800_v52, %s4819_s28 }
 0x344   : > { %4801 = vpow2.f32 %v2063_v55 }
 0x345   : > { %v2039_v56 = vpop.f32.mrf.mxu3 }
 0x346   : > { %v5649_v57 = vadd.f32 %v4791_v33, %v2039_v56  ;;  %v5708_v56 = vld [vmem:[%s6440_s13] ss:$0 sm:$0xff] }
 0x348   : > { %v2053_v58 = vmul.f32 0.5, %v5649_v57  ;;  %3531 = vst [vmem:[%s5624_s3 + $0x20] sm:$0xff] %v5649_v57 }
 0x34a   : > { %v4802_v59 = vpop.eup %4801  ;;  %v2065_v60 = vmul.f32 1.442695, %v2053_v58 }
 0x34b   : > { %2095 = vrot.lane.b32.xlu1 %v4802_v59, %s4819_s28 }
 0x34c   : > { %4803 = vpow2.f32 %v2065_v60 }
 0x34d   : > { %v2041_v0 = vpop.f32.mrf.mxu3 }
 0x34e   : > { %v2042_v1 = vadd.f32 %v4791_v33, %v2041_v0 }
 0x350   : > { %v2054_v2 = vmul.f32 0.5, %v2042_v1  ;;  %3532 = vst [vmem:[%s5624_s3 + $0x28] sm:$0xff] %v2042_v1 }
 0x352   : > { %v4804_v3 = vpop.eup %4803  ;;  %v2067_v4 = vmul.f32 1.442695, %v2054_v2 }
 0x353   : > { %2097 = vrot.lane.b32.xlu2 %v4804_v3, %s4819_s28 }
 0x354   : > { %4805 = vpow2.f32 %v2067_v4 }
 0x355   : > { %v2044_v7 = vpop.f32.mrf.mxu3 }
 0x356   : > { %v5660_v8 = vadd.f32 %v4791_v33, %v2044_v7 }
 0x358   : > { %v2055_v41 = vmul.f32 0.5, %v5660_v8  ;;  %3533 = vst [vmem:[%s5624_s3 + $0x30] sm:$0xff] %v5660_v8 }
 0x35a   : > { %v4806_v11 = vpop.eup %4805  ;;  %v2069_v12 = vmul.f32 1.442695, %v2055_v41  ;;  %v4168_v41 = vld [vmem:[%s6443_s16 + $0x70] sm:$0xf] }
 0x35b   : > { %2099 = vrot.lane.b32.xlu2 %v4806_v11, %s4819_s28  ;;  %v4683_v11 = vld [vmem:[%s6443_s16 + $0x74] sm:$0xf0] }
 0x35c   : > { %4807 = vpow2.f32 %v2069_v12  ;;  %v4682_v12 = vld [vmem:[%s6443_s16 + $0x74] sm:$0xf] }
 0x35d   : > { %v2046_v13 = vpop.f32.mrf.mxu3 }
 0x35e   : > { %v2047_v16 = vadd.f32 %v4791_v33, %v2046_v13  ;;  %v2078_v33 = vld [vmem:[%s5673_s2 + $0x28] sm:$0xff] }
 0x360   : > { %v2056_v17 = vmul.f32 0.5, %v2047_v16  ;;  %3534 = vst [vmem:[%s5624_s3 + $0x38] sm:$0xff] %v2047_v16 }
 0x362   : > { %v4808_v18 = vpop.eup %4807  ;;  %v2071_v19 = vmul.f32 1.442695, %v2056_v17  ;;  %v4170_v17 = vld [vmem:[%s6443_s16 + $0x78] sm:$0xf0] }
 0x363   : > { %2101 = vrot.lane.b32.xlu0 %v4808_v18, %s4819_s28  ;;  %v4160_v18 = vld [vmem:[%s6443_s16 + $0x60] sm:$0xf] }
 0x364   : > { %4809 = vpow2.f32 %v2071_v19  ;;  %v4681_v19 = vld [vmem:[%s6443_s16 + $0x64] sm:$0xf0] }
 0x36a   : > { %v4810_v40 = vpop.eup %4809 }
 0x36b   : > { %2103 = vrot.lane.b32.xlu1 %v4810_v40, %s4819_s28  ;;  %v4173_v40 = vor.u32 %v4682_v12, %v4170_v17 }
 0x36d   : > { %2416 = vmatpush.bf16.msra.mxu3 %v4173_v40 }
 0x3a5   : > { %v2090_v63 = vpop.permute.xlu0 %2089 }
 0x3a6   : > { %v2113_v22 = vmul.f32 %v2090_v63, %v2073_v20  ;;  %v4680_v63 = vld [vmem:[%s6443_s16 + $0x64] sm:$0xf]  ;;  %v4162_v20 = vld [vmem:[%s6443_s16 + $0x68] sm:$0xf0] }
 0x3a8   : > { %v2121_v25 = vadd.f32 %v2113_v22, %v5626_v54  ;;  %v2077_v54 = vld [vmem:[%s5673_s2 + $0x20] sm:$0xff]  ;;  %v4165_v22 = vor.u32 %v4680_v63, %v4162_v20 }
 0x3aa   : > { %2417 = vmatpush.bf16.msra.mxu3 %v4165_v22 }
 0x3ad   : > { %v2092_v23 = vpop.permute.xlu0 %2091  ;;  %v2098_v34 = vpop.permute.xlu2 %2097 }
 0x3ae   : > { %v2114_v24 = vmul.f32 %v2092_v23, %v2074_v21  ;;  %v2117_v45 = vmul.f32 %v2098_v34, %v2077_v54  ;;  %v4161_v21 = vor.u32 %v4681_v19, %v4160_v18  ;;  %v4152_v23 = vld [vmem:[%s6443_s16 + $0x50] sm:$0xf]  ;;  %v4674_v54 = vld [vmem:[%s6443_s16 + $0x34] sm:$0xf] }
 0x3b0   : > { %v2122_v26 = vadd.f32 %v2114_v24, %v5631_v46  ;;  %v2125_v6 = vadd.f32 %v2117_v45, %v5649_v57  ;;  %v4679_v24 = vld [vmem:[%s6443_s16 + $0x54] sm:$0xf0] }
 0x3b2   : > { %v2129_v27 = vpack.c.bf16 %v2122_v26, %v2121_v25  ;;  %v4678_v25 = vld [vmem:[%s6443_s16 + $0x54] sm:$0xf]  ;;  %v4154_v26 = vld [vmem:[%s6443_s16 + $0x58] sm:$0xf0] }
 0x3b4   : > { %4086 = vmatmul.msk.bf16.vlgmr.msra.gmra.mxu0 %vm2138_vm3, %v2129_v27  ;;  %v4153_v27 = vor.u32 %v4679_v24, %v4152_v23  ;;  %v4712_v23 = vld [vmem:[%s6445_s18 + $0xe4] sm:$0xf]  ;;  %v4290_v24 = vld [vmem:[%s6445_s18 + $0xf0] sm:$0xf0] }
 0x3b5   : > { %v2094_v28 = vpop.permute.xlu1 %2093  ;;  %v2100_v53 = vpop.permute.xlu2 %2099 }
 0x3b6   : > { %v2115_v31 = vmul.f32 %v2094_v28, %v2075_v29  ;;  %v2118_v9 = vmul.f32 %v2100_v53, %v2078_v33  ;;  %v4157_v29 = vor.u32 %v4678_v25, %v4154_v26  ;;  %v4136_v33 = vld [vmem:[%s6443_s16 + $0x30] sm:$0xf]  ;;  %v4675_v53 = vld [vmem:[%s6443_s16 + $0x34] sm:$0xf0]  ;;  %v4744_v25 = vld [vmem:[%s6445_s18 + $0x1e4] sm:$0xf] }
 0x3b7   : > { %v4137_v45 = vor.u32 %v4675_v53, %v4136_v33 }
 0x3b8   : > { %v2123_v36 = vadd.f32 %v2115_v31, %v5637_v43  ;;  %v2126_v46 = vadd.f32 %v2118_v9, %v2042_v1  ;;  %v4677_v31 = vld [vmem:[%s6443_s16 + $0x44] sm:$0xf0]  ;;  %2418 = vmatpush.bf16.msra.mxu3 %v4157_v29  ;;  %v4138_v9 = vld [vmem:[%s6443_s16 + $0x38] sm:$0xf0]  ;;  %v4288_v29 = vld [vmem:[%s6445_s18 + $0xe0] sm:$0xf] }
 0x3ba   : > { %v2131_v39 = vpack.c.bf16 %v2126_v46, %v2125_v6  ;;  %v4141_v46 = vor.u32 %v4674_v54, %v4138_v9  ;;  %v4673_v6 = vld [vmem:[%s6443_s16 + $0x24] sm:$0xf0]  ;;  %v4272_v54 = vld [vmem:[%s6445_s18 + $0xc0] sm:$0xf]  ;;  %v4710_v9 = vld [vmem:[%s6445_s18 + $0xcc] sm:$0xf0] }
 0x3bd   : > { %v2096_v35 = vpop.permute.xlu1 %2095 }
 0x3be   : > { %v2116_v14 = vmul.f32 %v2096_v35, %v2076_v30  ;;  %v4144_v30 = vld [vmem:[%s6443_s16 + $0x40] sm:$0xf]  ;;  %v4676_v35 = vld [vmem:[%s6443_s16 + $0x44] sm:$0xf] }
 0x3c0   : > { %v2124_v15 = vadd.f32 %v2116_v14, %v5643_v50  ;;  %v4146_v14 = vld [vmem:[%s6443_s16 + $0x48] sm:$0xf0] }
 0x3c1   : > { %v4149_v32 = vor.u32 %v4676_v35, %v4146_v14  ;;  %v4416_v35 = vld [vmem:[%s6445_s18 + $0x1e0] sm:$0xf]  ;;  %v4746_v14 = vld [vmem:[%s6445_s18 + $0x1ec] sm:$0xf0] }
 0x3c2   : > { %v2130_v37 = vpack.c.bf16 %v2124_v15, %v2123_v36  ;;  %v4145_v15 = vor.u32 %v4677_v31, %v4144_v30  ;;  %v4714_v30 = vld [vmem:[%s6445_s18 + $0xec] sm:$0xf0] }
 0x3c3   : > { %2419 = vmatpush.bf16.msra.mxu3 %v4149_v32  ;;  %v4402_v32 = vld [vmem:[%s6445_s18 + $0x1d0] sm:$0xf0] }
 0x3c4   : > { %4087 = vmatmul.msk.bf16.gmra.mxu0 %vm2138_vm3, %v2130_v37 }
 0x3c7   : > { %2420 = vmatpush.bf16.msra.mxu3 %v4141_v46  ;;  %v4742_v46 = vld [vmem:[%s6445_s18 + $0x1cc] sm:$0xf0] }
 0x3d4   : > { %4088 = vmatmul.msk.bf16.gmra.mxu0 %vm2138_vm3, %v2131_v39 }
 0x3d5   : > { %v2102_v43 = vpop.permute.xlu0 %2101 }
 0x3d6   : > { %v2119_v47 = vmul.f32 %v2102_v43, %v2079_v42  ;;  %v4672_v42 = vld [vmem:[%s6443_s16 + $0x24] sm:$0xf]  ;;  %v4130_v43 = vld [vmem:[%s6443_s16 + $0x28] sm:$0xf0] }
 0x3d8   : > { %v2127_v50 = vadd.f32 %v2119_v47, %v5660_v8  ;;  %v4133_v47 = vor.u32 %v4672_v42, %v4130_v43  ;;  %v4736_v42 = vld [vmem:[%s6445_s18 + $0x1a4] sm:$0xf]  ;;  %v4386_v43 = vld [vmem:[%s6445_s18 + $0x1b0] sm:$0xf0] }
 0x3da   : > { %2421 = vmatpush.bf16.msra.mxu3 %v4133_v47  ;;  %v4256_v47 = vld [vmem:[%s6445_s18 + $0xa0] sm:$0xf] }
 0x3dd   : > { %v2104_v48 = vpop.permute.xlu1 %2103 }
 0x3de   : > { %v2120_v49 = vmul.f32 %v2104_v48, %v2080_v44  ;;  %v4129_v44 = vor.u32 %v4673_v6, %v4128_v5  ;;  %v4120_v48 = vld [vmem:[%s6443_s16 + $0x10] sm:$0xf]  ;;  %v4704_v5 = vld [vmem:[%s6445_s18 + $0xa4] sm:$0xf] }
 0x3e0   : > { %v2128_v51 = vadd.f32 %v2120_v49, %v2047_v16  ;;  %v4169_v16 = vor.u32 %v4683_v11, %v4168_v41  ;;  %v4671_v49 = vld [vmem:[%s6443_s16 + $0x14] sm:$0xf0] }
 0x3e2   : > { %v2132_v52 = vpack.c.bf16 %v2128_v51, %v2127_v50  ;;  %2387 = vmatpush.bf16.msra.mxu2 %v4169_v16  ;;  %v4121_v50 = vor.u32 %v4671_v49, %v4120_v48  ;;  %v4706_v48 = vld [vmem:[%s6445_s18 + $0xac] sm:$0xf0]  ;;  %v4384_v49 = vld [vmem:[%s6445_s18 + $0x1a0] sm:$0xf] }
 0x3e4   : > { %4089 = vmatmul.msk.bf16.gmra.mxu0 %vm2138_vm3, %v2132_v52 }
 0x3e6   : > { %2388 = vmatpush.bf16.msra.mxu2 %v4161_v21 }
 0x3ea   : > { %2389 = vmatpush.bf16.msra.mxu2 %v4153_v27  ;;  %v4293_v27 = vor.u32 %v4712_v23, %v4290_v24  ;;  %v4730_v23 = vld [vmem:[%s6445_s18 + $0x16c] sm:$0xf0]  ;;  %v4692_v24 = vld [vmem:[%s6445_s18 + $0x44] sm:$0xf] }
 0x3ee   : > { %2390 = vmatpush.bf16.msra.mxu2 %v4145_v15  ;;  %v4417_v15 = vor.u32 %v4746_v14, %v4416_v35  ;;  %v4694_v35 = vld [vmem:[%s6445_s18 + $0x4c] sm:$0xf0] }
 0x3f0   : > { %2892 = vmatpush.bf16.msrb.mxu1 %v4417_v15  ;;  %v4726_v15 = vld [vmem:[%s6445_s18 + $0x14c] sm:$0xf0] }
 0x3f2   : > { %2391 = vmatpush.bf16.msra.mxu2 %v4137_v45  ;;  %v4400_v45 = vld [vmem:[%s6445_s18 + $0x1c0] sm:$0xf] }
 0x3f3   : > { %v4401_v6 = vor.u32 %v4742_v46, %v4400_v45 }
 0x3f5   : > { %2893 = vmatpush.bf16.msrb.mxu1 %v4401_v6 }
 0x3f6   : > { %2392 = vmatpush.bf16.msra.mxu2 %v4129_v44 }
 0x3fa   : > { %2393 = vmatpush.bf16.msra.mxu2 %v4121_v50 }
 0x431   : > { %v2164_v55 = vpop.f32.mrf.mxu0 }
 0x432   : > { %v2165_v57 = vadd.f32 %v5708_v56, %v2164_v55 }
 0x434   : > { %v2184_v60 = vmax.f32 %v2165_v57, 0.0 }
 0x439   : > { %v2166_v58 = vpop.f32.mrf.mxu0 }
 0x43a   : > { %v2167_v59 = vadd.f32 %v5708_v56, %v2166_v58 }
 0x43c   : > { %v2185_v61 = vmax.f32 %v2167_v59, 0.0 }
 0x43e   : > { %v2192_v62 = vpack.c.bf16 %v2185_v61, %v2184_v60  ;;  %v4670_v60 = vld [vmem:[%s6443_s16 + $0x14] sm:$0xf]  ;;  %v4122_v61 = vld [vmem:[%s6443_s16 + $0x18] sm:$0xf0] }
 0x440   : > { %4106 = vmatmul.msk.bf16.vlgmr.msra.gmra.mxu1 %vm2007_vm1, %v2192_v62  ;;  %v4112_v62 = vld [vmem:[%s6443_s16] sm:$0xf] }
 0x441   : > { %v2169_v0 = vpop.f32.mrf.mxu0 }
 0x442   : > { %v2170_v1 = vadd.f32 %v5708_v56, %v2169_v0  ;;  %v4125_v0 = vor.u32 %v4670_v60, %v4122_v61  ;;  %v4732_v61 = vld [vmem:[%s6445_s18 + $0x184] sm:$0xf] }
 0x444   : > { %v2186_v4 = vmax.f32 %v2170_v1, 0.0  ;;  %2422 = vmatpush.bf16.msra.mxu3 %v4125_v0  ;;  %v4370_v0 = vld [vmem:[%s6445_s18 + $0x190] sm:$0xf0] }
 0x449   : > { %v2171_v2 = vpop.f32.mrf.mxu0 }
 0x44a   : > { %v2172_v3 = vadd.f32 %v5708_v56, %v2171_v2  ;;  %v4668_v2 = vld [vmem:[%s6443_s16 + $0x4] sm:$0xf] }
 0x44c   : > { %v2187_v7 = vmax.f32 %v2172_v3, 0.0  ;;  %v4114_v3 = vld [vmem:[%s6443_s16 + $0x8] sm:$0xf0] }
 0x44e   : > { %v2193_v8 = vpack.c.bf16 %v2187_v7, %v2186_v4  ;;  %v4117_v4 = vor.u32 %v4668_v2, %v4114_v3  ;;  %v4368_v3 = vld [vmem:[%s6445_s18 + $0x180] sm:$0xf] }
 0x450   : > { %4107 = vmatmul.msk.bf16.gmra.mxu1 %vm2007_vm1, %v2193_v8  ;;  %2423 = vmatpush.bf16.msra.mxu3 %v4117_v4  ;;  %v5821_v8 = vld [vmem:[%s6442_s15] ss:$0 sm:$0xff]  ;;  %v4734_v4 = vld [vmem:[%s6445_s18 + $0x18c] sm:$0xf0] }
 0x451   : > { %v2174_v13 = vpop.f32.mrf.mxu0 }
 0x452   : > { %v2175_v28 = vadd.f32 %v5708_v56, %v2174_v13 }
 0x454   : > { %v2188_v37 = vmax.f32 %v2175_v28, 0.0  ;;  %v4418_v28 = vld [vmem:[%s6445_s18 + $0x1f0] sm:$0xf0] }
 0x455   : > { %v4421_v31 = vor.u32 %v4744_v25, %v4418_v28  ;;  %v4210_v25 = vld [vmem:[%s6445_s18 + $0x50] sm:$0xf0] }
 0x456   : > { %v4213_v14 = vor.u32 %v4692_v24, %v4210_v25  ;;  %v4711_v25 = vld [vmem:[%s6445_s18 + $0xd4] sm:$0xf0] }
 0x457   : > { %2950 = vmatpush.bf16.msrb.mxu3 %v4421_v31  ;;  %v4338_v31 = vld [vmem:[%s6445_s18 + $0x150] sm:$0xf0] }
 0x459   : > { %v2176_v34 = vpop.f32.mrf.mxu0 }
 0x45a   : > { %v2177_v36 = vadd.f32 %v5708_v56, %v2176_v34  ;;  %v4289_v34 = vor.u32 %v4714_v30, %v4288_v29  ;;  %v4724_v29 = vld [vmem:[%s6445_s18 + $0x144] sm:$0xf] }
 0x45c   : > { %v2189_v38 = vmax.f32 %v2177_v36, 0.0  ;;  %v4708_v36 = vld [vmem:[%s6445_s18 + $0xc4] sm:$0xf]  ;;  %2863 = vmatpush.bf16.msrb.mxu0 %v4289_v34  ;;  %v4208_v34 = vld [vmem:[%s6445_s18 + $0x40] sm:$0xf] }
 0x45e   : > { %v2194_v10 = vpack.c.bf16 %v2189_v38, %v2188_v37  ;;  %v4274_v37 = vld [vmem:[%s6445_s18 + $0xd0] sm:$0xf0]  ;;  %v4740_v38 = vld [vmem:[%s6445_s18 + $0x1c4] sm:$0xf] }
 0x45f   : > { %v4277_v33 = vor.u32 %v4708_v36, %v4274_v37  ;;  %v4405_v53 = vor.u32 %v4740_v38, %v4402_v32  ;;  %v4336_v36 = vld [vmem:[%s6445_s18 + $0x140] sm:$0xf]  ;;  %v4688_v37 = vld [vmem:[%s6445_s18 + $0x24] sm:$0xf]  ;;  %v4194_v38 = vld [vmem:[%s6445_s18 + $0x30] sm:$0xf0]  ;;  %v4341_v32 = vor.u32 %v4724_v29, %v4338_v31 }
 0x460   : > { %4108 = vmatmul.msk.bf16.gmra.mxu1 %vm2007_vm1, %v2194_v10  ;;  %v4273_v10 = vor.u32 %v4710_v9, %v4272_v54  ;;  %v4197_v54 = vor.u32 %v4688_v37, %v4194_v38  ;;  %v4737_v38 = vld [vmem:[%s6445_s18 + $0x1ac] sm:$0xf] }
 0x461   : > { %v2179_v39 = vpop.f32.mrf.mxu0  ;;  %2951 = vmatpush.bf16.msrb.mxu3 %v4405_v53  ;;  %v4337_v53 = vor.u32 %v4726_v15, %v4336_v36 }
 0x462   : > { %v2180_v51 = vadd.f32 %v5708_v56, %v2179_v39  ;;  %v4258_v39 = vld [vmem:[%s6445_s18 + $0xb0] sm:$0xf0]  ;;  %2864 = vmatpush.bf16.msrb.mxu0 %v4273_v10 }
 0x463   : > { %v4261_v44 = vor.u32 %v4704_v5, %v4258_v39  ;;  %v4720_v39 = vld [vmem:[%s6445_s18 + $0x124] sm:$0xf] }
 0x464   : > { %v2190_v57 = vmax.f32 %v2180_v51, 0.0  ;;  %v4389_v51 = vor.u32 %v4736_v42, %v4386_v43  ;;  %v4322_v42 = vld [vmem:[%s6445_s18 + $0x130] sm:$0xf0]  ;;  %v4192_v43 = vld [vmem:[%s6445_s18 + $0x20] sm:$0xf] }
 0x466   : > { %2952 = vmatpush.bf16.msrb.mxu3 %v4389_v51  ;;  %v4684_v51 = vld [vmem:[%s6445_s18 + $0x4] sm:$0xf] }
 0x469   : > { %v2181_v52 = vpop.f32.mrf.mxu0 }
 0x46a   : > { %v2182_v55 = vadd.f32 %v5708_v56, %v2181_v52  ;;  %v4669_v56 = vld [vmem:[%s6443_s16 + $0x4] sm:$0xf0]  ;;  %v4257_v52 = vor.u32 %v4706_v48, %v4256_v47  ;;  %v4320_v47 = vld [vmem:[%s6445_s18 + $0x120] sm:$0xf]  ;;  %v4722_v48 = vld [vmem:[%s6445_s18 + $0x12c] sm:$0xf0] }
 0x46b   : > { %v4113_v1 = vor.u32 %v4669_v56, %v4112_v62  ;;  %v4240_v56 = vld [vmem:[%s6445_s18 + $0x80] sm:$0xf] }
 0x46c   : > { %v2191_v58 = vmax.f32 %v2182_v55, 0.0  ;;  %v4738_v55 = vld [vmem:[%s6445_s18 + $0x1ac] sm:$0xf0]  ;;  %2865 = vmatpush.bf16.msrb.mxu0 %v4257_v52  ;;  %v4178_v52 = vld [vmem:[%s6445_s18 + $0x10] sm:$0xf0] }
 0x46d   : > { %2394 = vmatpush.bf16.msra.mxu2 %v4113_v1  ;;  %v4385_v60 = vor.u32 %v4738_v55, %v4384_v49  ;;  %v4702_v1 = vld [vmem:[%s6445_s18 + $0x8c] sm:$0xf0]  ;;  %v4181_v55 = vor.u32 %v4684_v51, %v4178_v52 }
 0x46e   : > { %v2195_v59 = vpack.c.bf16 %v2191_v58, %v2190_v57  ;;  %v4700_v57 = vld [vmem:[%s6445_s18 + $0x84] sm:$0xf]  ;;  %v4242_v58 = vld [vmem:[%s6445_s18 + $0x90] sm:$0xf0] }
 0x46f   : > { %v4245_v2 = vor.u32 %v4700_v57, %v4242_v58  ;;  %2894 = vmatpush.bf16.msrb.mxu1 %v4385_v60  ;;  %v4716_v57 = vld [vmem:[%s6445_s18 + $0x104] sm:$0xf]  ;;  %v4306_v58 = vld [vmem:[%s6445_s18 + $0x110] sm:$0xf0] }
 0x470   : > { %4109 = vmatmul.msk.bf16.gmra.mxu1 %vm2007_vm1, %v2195_v59  ;;  %v4309_v60 = vor.u32 %v4716_v57, %v4306_v58  ;;  %v4733_v58 = vld [vmem:[%s6445_s18 + $0x18c] sm:$0xf] }
 0x471   : > { %2921 = vmatpush.bf16.msrb.mxu2 %v4293_v27 }
 0x475   : > { %2922 = vmatpush.bf16.msrb.mxu2 %v4277_v33  ;;  %v4209_v33 = vor.u32 %v4694_v35, %v4208_v34  ;;  %v4705_v35 = vld [vmem:[%s6445_s18 + $0xac] sm:$0xf] }
 0x479   : > { %2923 = vmatpush.bf16.msrb.mxu2 %v4261_v44  ;;  %v4690_v44 = vld [vmem:[%s6445_s18 + $0x2c] sm:$0xf0] }
 0x47a   : > { %v4193_v49 = vor.u32 %v4690_v44, %v4192_v43 }
 0x47d   : > { %2924 = vmatpush.bf16.msrb.mxu2 %v4245_v2  ;;  %v4713_v2 = vld [vmem:[%s6445_s18 + $0xec] sm:$0xf] }
 0x4bd   : > { %v2253_v7 = vpop.f32.mrf.mxu1 }
 0x4be   : > { %v2254_v41 = vadd.f32 %v5821_v8, %v2253_v7 }
 0x4c0   : > { %v2273_v13 = vmax.f32 %v2254_v41, 0.0 }
 0x4c5   : > { %v2255_v11 = vpop.f32.mrf.mxu1 }
 0x4c6   : > { %v2256_v12 = vadd.f32 %v5821_v8, %v2255_v11  ;;  %v4696_v11 = vld [vmem:[%s6445_s18 + $0x64] sm:$0xf] }
 0x4c8   : > { %v2274_v16 = vmax.f32 %v2256_v12, 0.0  ;;  %v4226_v12 = vld [vmem:[%s6445_s18 + $0x70] sm:$0xf0] }
 0x4ca   : > { %v2281_v17 = vpack.c.bf16 %v2274_v16, %v2273_v13  ;;  %v4373_v13 = vor.u32 %v4732_v61, %v4370_v0  ;;  %v4241_v16 = vor.u32 %v4702_v1, %v4240_v56  ;;  %v4686_v61 = vld [vmem:[%s6445_s18 + $0xc] sm:$0xf0] }
 0x4cb   : > { %v4718_v0 = vld [vmem:[%s6445_s18 + $0x10c] sm:$0xf0] }
 0x4cc   : > { %2395 = vmatmul.bf16.vlgmr.msra.gmra.mxu2 %v2281_v17  ;;  %2424 = vmatmul.bf16.vlgmr.msra.gmra.mxu3 %v2281_v17  ;;  %v4728_v17 = vld [vmem:[%s6445_s18 + $0x164] sm:$0xf] }
 0x4cd   : > { %v2258_v18 = vpop.f32.mrf.mxu1  ;;  %2953 = vmatpush.bf16.msrb.mxu3 %v4373_v13  ;;  %2866 = vmatpush.bf16.msrb.mxu0 %v4241_v16  ;;  %v4715_v13 = vld [vmem:[%s6445_s18 + $0xf4] sm:$0xf0]  ;;  %v4424_v16 = vld [vmem:[%s6445_s18 + $0x1e8] sm:$0xf] }
 0x4ce   : > { %v2259_v19 = vadd.f32 %v5821_v8, %v2258_v18 }
 0x4d0   : > { %v2275_v20 = vmax.f32 %v2259_v19, 0.0  ;;  %v4369_v19 = vor.u32 %v4734_v4, %v4368_v3  ;;  %v4298_v3 = vld [vmem:[%s6445_s18 + $0xf8] sm:$0xf0] }
 0x4d1   : > { %v4301_v4 = vor.u32 %v4713_v2, %v4298_v3 }
 0x4d2   : > { %2895 = vmatpush.bf16.msrb.mxu1 %v4369_v19 }
 0x4d5   : > { %v2260_v40 = vpop.f32.mrf.mxu1 }
 0x4d6   : > { %v2261_v63 = vadd.f32 %v5821_v8, %v2260_v40  ;;  %v4354_v40 = vld [vmem:[%s6445_s18 + $0x170] sm:$0xf0] }
 0x4d7   : > { %v4357_v27 = vor.u32 %v4728_v17, %v4354_v40  ;;  %v4747_v17 = vld [vmem:[%s6445_s18 + $0x1f4] sm:$0xf0]  ;;  %v4709_v40 = vld [vmem:[%s6445_s18 + $0xcc] sm:$0xf] }
 0x4d8   : > { %v2276_v21 = vmax.f32 %v2261_v63, 0.0  ;;  %v4224_v63 = vld [vmem:[%s6445_s18 + $0x60] sm:$0xf]  ;;  %v4425_v19 = vor.u32 %v4747_v17, %v4424_v16  ;;  %v4232_v17 = vld [vmem:[%s6445_s18 + $0x68] sm:$0xf] }
 0x4d9   : > { %2954 = vmatpush.bf16.msrb.mxu3 %v4357_v27  ;;  %v4743_v27 = vld [vmem:[%s6445_s18 + $0x1d4] sm:$0xf0] }
 0x4da   : > { %v2282_v22 = vpack.c.bf16 %v2276_v21, %v2275_v20  ;;  %v4698_v20 = vld [vmem:[%s6445_s18 + $0x6c] sm:$0xf0]  ;;  %v4229_v21 = vor.u32 %v4696_v11, %v4226_v12  ;;  %v4296_v11 = vld [vmem:[%s6445_s18 + $0xe8] sm:$0xf] }
 0x4db   : > { %v4225_v28 = vor.u32 %v4698_v20, %v4224_v63  ;;  %v4282_v63 = vld [vmem:[%s6445_s18 + $0xd8] sm:$0xf0] }
 0x4dc   : > { %2400 = vmatmul.bf16.gmra.mxu2 %v2282_v22  ;;  %2429 = vmatmul.bf16.gmra.mxu3 %v2282_v22  ;;  %v4352_v22 = vld [vmem:[%s6445_s18 + $0x160] sm:$0xf]  ;;  %v4285_v20 = vor.u32 %v4709_v40, %v4282_v63  ;;  %v4731_v63 = vld [vmem:[%s6445_s18 + $0x174] sm:$0xf0] }
 0x4dd   : > { %v2263_v26 = vpop.f32.mrf.mxu1  ;;  %v4353_v30 = vor.u32 %v4730_v23, %v4352_v22  ;;  %2925 = vmatpush.bf16.msrb.mxu2 %v4229_v21  ;;  %2867 = vmatpush.bf16.msrb.mxu0 %v4225_v28  ;;  %v4741_v21 = vld [vmem:[%s6445_s18 + $0x1cc] sm:$0xf]  ;;  %v4410_v22 = vld [vmem:[%s6445_s18 + $0x1d8] sm:$0xf0]  ;;  %v4280_v23 = vld [vmem:[%s6445_s18 + $0xc8] sm:$0xf] }
 0x4de   : > { %v2264_v50 = vadd.f32 %v5821_v8, %v2263_v26  ;;  %2955 = vmatpush.bf16.msrb.mxu3 %v4341_v32  ;;  %v4413_v24 = vor.u32 %v4741_v21, %v4410_v22  ;;  %v4281_v28 = vor.u32 %v4711_v25, %v4280_v23  ;;  %v4394_v32 = vld [vmem:[%s6445_s18 + $0x1b8] sm:$0xf0] }
 0x4df   : > { %2896 = vmatpush.bf16.msrb.mxu1 %v4353_v30  ;;  %v2301_v30 = vld [vmem:[%s6444_s17] sm:$0x3]  ;;  %v4218_v21 = vld [vmem:[%s6445_s18 + $0x58] sm:$0xf0] }
 0x4e0   : > { %v2277_v7 = vmax.f32 %v2264_v50, 0.0  ;;  %v4321_v50 = vor.u32 %v4722_v48, %v4320_v47  ;;  %v6080_v15 = vperm.slane %v2301_v30, 0  ;;  %v6082_v37 = vperm.slane %v2301_v30, 1 }
 0x4e1   : > { %2926 = vmatpush.bf16.msrb.mxu2 %v4213_v14  ;;  %2868 = vmatpush.bf16.msrb.mxu0 %v4209_v33  ;;  %v4266_v14 = vld [vmem:[%s6445_s18 + $0xb8] sm:$0xf0]  ;;  %v4397_v33 = vor.u32 %v4737_v38, %v4394_v32  ;;  %v4725_v38 = vld [vmem:[%s6445_s18 + $0x14c] sm:$0xf] }
 0x4e2   : > { %v4269_v36 = vor.u32 %v4705_v35, %v4266_v14  ;;  %v4346_v32 = vld [vmem:[%s6445_s18 + $0x158] sm:$0xf0] }
 0x4e3   : > { %2897 = vmatpush.bf16.msrb.mxu1 %v4337_v53  ;;  %v4264_v53 = vld [vmem:[%s6445_s18 + $0xa8] sm:$0xf] }
 0x4e5   : > { %v2265_v59 = vpop.f32.mrf.mxu1  ;;  %2927 = vmatpush.bf16.msrb.mxu2 %v4197_v54  ;;  %2869 = vmatpush.bf16.msrb.mxu0 %v4193_v49  ;;  %v4707_v54 = vld [vmem:[%s6445_s18 + $0xb4] sm:$0xf0] }
 0x4e6   : > { %v2266_v62 = vadd.f32 %v5821_v8, %v2265_v59  ;;  %v4176_v59 = vld [vmem:[%s6445_s18] sm:$0xf] }
 0x4e7   : > { %2898 = vmatpush.bf16.msrb.mxu1 %v4321_v50  ;;  %v4177_v56 = vor.u32 %v4686_v61, %v4176_v59  ;;  %v4378_v59 = vld [vmem:[%s6445_s18 + $0x198] sm:$0xf0] }
 0x4e8   : > { %v2278_v41 = vmax.f32 %v2266_v62, 0.0  ;;  %v4304_v62 = vld [vmem:[%s6445_s18 + $0x100] sm:$0xf]  ;;  %v4381_v61 = vor.u32 %v4733_v58, %v4378_v59  ;;  %v4685_v58 = vld [vmem:[%s6445_s18 + $0xc] sm:$0xf] }
 0x4e9   : > { %2928 = vmatpush.bf16.msrb.mxu2 %v4181_v55  ;;  %v4305_v1 = vor.u32 %v4718_v0, %v4304_v62  ;;  %2870 = vmatpush.bf16.msrb.mxu0 %v4177_v56  ;;  %v4703_v62 = vld [vmem:[%s6445_s18 + $0x94] sm:$0xf0]  ;;  %v4376_v0 = vld [vmem:[%s6445_s18 + $0x188] sm:$0xf] }
 0x4ea   : > { %v2283_v18 = vpack.c.bf16 %v2278_v41, %v2277_v7  ;;  %v4745_v7 = vld [vmem:[%s6445_s18 + $0x1ec] sm:$0xf]  ;;  %v4426_v41 = vld [vmem:[%s6445_s18 + $0x1f8] sm:$0xf0]  ;;  %v4735_v56 = vld [vmem:[%s6445_s18 + $0x194] sm:$0xf0] }
 0x4eb   : > { %2899 = vmatpush.bf16.msrb.mxu1 %v4305_v1  ;;  %v4429_v12 = vor.u32 %v4745_v7, %v4426_v41  ;;  %v4377_v2 = vor.u32 %v4735_v56, %v4376_v0  ;;  %v4697_v7 = vld [vmem:[%s6445_s18 + $0x6c] sm:$0xf]  ;;  %v4234_v41 = vld [vmem:[%s6445_s18 + $0x78] sm:$0xf0]  ;;  %v4184_v56 = vld [vmem:[%s6445_s18 + $0x8] sm:$0xf] }
 0x4ec   : > { %2405 = vmatmul.bf16.gmra.mxu2 %v2283_v18  ;;  %2434 = vmatmul.bf16.gmra.mxu3 %v2283_v18  ;;  %v4297_v18 = vor.u32 %v4715_v13, %v4296_v11  ;;  %v4237_v11 = vor.u32 %v4697_v7, %v4234_v41  ;;  %v4362_v13 = vld [vmem:[%s6445_s18 + $0x178] sm:$0xf0]  ;;  %v4719_v7 = vld [vmem:[%s6445_s18 + $0x114] sm:$0xf0] }
 0x4ed   : > { %v2268_v26 = vpop.f32.mrf.mxu1  ;;  %3037 = vmatpush.bf16.msra.mxu2 %v4301_v4  ;;  %v4314_v0 = vld [vmem:[%s6445_s18 + $0x118] sm:$0xf0] }
 0x4ee   : > { %v2269_v9 = vadd.f32 %v5821_v8, %v2268_v26  ;;  %2979 = vmatpush.bf16.msra.mxu0 %v4297_v18  ;;  %v4408_v26 = vld [vmem:[%s6445_s18 + $0x1c8] sm:$0xf]  ;;  %v4699_v18 = vld [vmem:[%s6445_s18 + $0x74] sm:$0xf0] }
 0x4ef   : > { %3008 = vmatpush.bf16.msra.mxu1 %v4425_v19  ;;  %v4409_v29 = vor.u32 %v4743_v27, %v4408_v26  ;;  %v4360_v19 = vld [vmem:[%s6445_s18 + $0x168] sm:$0xf]  ;;  %v4233_v40 = vor.u32 %v4699_v18, %v4232_v17 }
 0x4f0   : > { %v2279_v46 = vmax.f32 %v2269_v9, 0.0  ;;  %v4392_v9 = vld [vmem:[%s6445_s18 + $0x1a8] sm:$0xf]  ;;  %v4361_v22 = vor.u32 %v4731_v63, %v4360_v19 }
 0x4f1   : > { %3038 = vmatpush.bf16.msra.mxu2 %v4285_v20  ;;  %v4693_v20 = vld [vmem:[%s6445_s18 + $0x4c] sm:$0xf] }
 0x4f2   : > { %2980 = vmatpush.bf16.msra.mxu0 %v4281_v28  ;;  %v4221_v23 = vor.u32 %v4693_v20, %v4218_v21 }
 0x4f3   : > { %3009 = vmatpush.bf16.msra.mxu1 %v4409_v29 }
 0x4f5   : > { %v2270_v10 = vpop.f32.mrf.mxu1  ;;  %3039 = vmatpush.bf16.msra.mxu2 %v4269_v36 }
 0x4f6   : > { %v2271_v45 = vadd.f32 %v5821_v8, %v2270_v10  ;;  %v4325_v8 = vor.u32 %v4720_v39, %v4322_v42  ;;  %v4265_v10 = vor.u32 %v4707_v54, %v4264_v53  ;;  %v4349_v53 = vor.u32 %v4725_v38, %v4346_v32  ;;  %v4695_v54 = vld [vmem:[%s6445_s18 + $0x54] sm:$0xf0] }
 0x4f8   : > { %v2280_v5 = vmax.f32 %v2271_v45, 0.0  ;;  %2956 = vmatpush.bf16.msrb.mxu3 %v4325_v8  ;;  %v4739_v45 = vld [vmem:[%s6445_s18 + $0x1b4] sm:$0xf0]  ;;  %2981 = vmatpush.bf16.msra.mxu0 %v4265_v10 }
 0x4f9   : > { %v4727_v10 = vld [vmem:[%s6445_s18 + $0x154] sm:$0xf0] }
 0x4fa   : > { %v2284_v6 = vpack.c.bf16 %v2280_v5, %v2279_v46  ;;  %v4701_v46 = vld [vmem:[%s6445_s18 + $0x8c] sm:$0xf]  ;;  %v4250_v5 = vld [vmem:[%s6445_s18 + $0x98] sm:$0xf0] }
 0x4fb   : > { %v4253_v39 = vor.u32 %v4701_v46, %v4250_v5 }
 0x4fc   : > { %2410 = vmatmul.bf16.gmra.mxu2 %v2284_v6  ;;  %2439 = vmatmul.bf16.gmra.mxu3 %v2284_v6  ;;  %v4393_v6 = vor.u32 %v4739_v45, %v4392_v9  ;;  %v4344_v9 = vld [vmem:[%s6445_s18 + $0x148] sm:$0xf] }
 0x4fd   : > { %2957 = vmatpush.bf16.msrb.mxu3 %v4309_v60  ;;  %3040 = vmatpush.bf16.msra.mxu2 %v4253_v39  ;;  %v4248_v60 = vld [vmem:[%s6445_s18 + $0x88] sm:$0xf]  ;;  %v4345_v46 = vor.u32 %v4727_v10, %v4344_v9  ;;  %v4689_v39 = vld [vmem:[%s6445_s18 + $0x2c] sm:$0xf]  ;;  %v4760_v9 = vld [vmem:[%s6447_s20 + $0x60] sm:$0xff] }
 0x4fe   : > { %3010 = vmatpush.bf16.msra.mxu1 %v4393_v6  ;;  %v4249_v1 = vor.u32 %v4703_v62, %v4248_v60  ;;  %v4186_v60 = vld [vmem:[%s6445_s18 + $0x18] sm:$0xf0]  ;;  %v4750_v10 = vld [vmem:[%s6447_s20 + $0x10] sm:$0xff] }
 0x4ff   : > { %v4189_v62 = vor.u32 %v4685_v58, %v4186_v60  ;;  %v4769_v58 = vld [vmem:[%s6447_s20 + $0xa8] sm:$0xff] }
 0x500   : > { %2982 = vmatpush.bf16.msra.mxu0 %v4249_v1  ;;  %v4687_v1 = vld [vmem:[%s6445_s18 + $0x14] sm:$0xf0] }
 0x501   : > { %3066 = vmatpush.bf16.msra.mxu3 %v4429_v12  ;;  %3041 = vmatpush.bf16.msra.mxu2 %v4237_v11  ;;  %v4729_v12 = vld [vmem:[%s6445_s18 + $0x16c] sm:$0xf] }
 0x502   : > { %3011 = vmatpush.bf16.msra.mxu1 %v4377_v2  ;;  %v4365_v16 = vor.u32 %v4729_v12, %v4362_v13 }
 0x504   : > { %2983 = vmatpush.bf16.msra.mxu0 %v4233_v40 }
 0x505   : > { %3067 = vmatpush.bf16.msra.mxu3 %v4413_v24  ;;  %3042 = vmatpush.bf16.msra.mxu2 %v4221_v23 }
 0x506   : > { %3012 = vmatpush.bf16.msra.mxu1 %v4361_v22 }
 0x509   : > { %3068 = vmatpush.bf16.msra.mxu3 %v4397_v33  ;;  %v4216_v33 = vld [vmem:[%s6445_s18 + $0x48] sm:$0xf] }
 0x50a   : > { %v4217_v45 = vor.u32 %v4695_v54, %v4216_v33  ;;  %3013 = vmatpush.bf16.msra.mxu1 %v4345_v46  ;;  %v4751_v54 = vld [vmem:[%s6447_s20 + $0x18] sm:$0xff]  ;;  %v4749_v46 = vld [vmem:[%s6447_s20 + $0x8] sm:$0xff] }
 0x50c   : > { %2984 = vmatpush.bf16.msra.mxu0 %v4217_v45  ;;  %v4759_v45 = vld [vmem:[%s6447_s20 + $0x58] sm:$0xff] }
 0x50d   : > { %3069 = vmatpush.bf16.msra.mxu3 %v4381_v61  ;;  %v4717_v61 = vld [vmem:[%s6445_s18 + $0x10c] sm:$0xf] }
 0x50e   : > { %v4317_v2 = vor.u32 %v4717_v61, %v4314_v0 }
 0x511   : > { %3070 = vmatpush.bf16.msra.mxu3 %v4365_v16 }
 0x515   : > { %3071 = vmatpush.bf16.msra.mxu3 %v4349_v53  ;;  %v4761_v53 = vld [vmem:[%s6447_s20 + $0x68] sm:$0xff] }
 0x54f   : > { %v2396_v31 = vpop.f32.mrf.mxu2  ;;  %v2425_v34 = vpop.f32.mrf.mxu3 }
 0x550   : > { %v2397_v42 = vadd.f32 %v2396_v31, %v6080_v15  ;;  %v2426_v43 = vadd.f32 %v2425_v34, %v6082_v37 }
 0x552   : > { %v2445_v49 = vmax.f32 %v2397_v42, 0.0  ;;  %v2446_v50 = vmax.f32 %v2426_v43, 0.0  ;;  %v4202_v42 = vld [vmem:[%s6445_s18 + $0x38] sm:$0xf0]  ;;  %v4721_v43 = vld [vmem:[%s6445_s18 + $0x12c] sm:$0xf] }
 0x557   : > { %v2398_v8 = vpop.f32.mrf.mxu2  ;;  %v2427_v44 = vpop.f32.mrf.mxu3 }
 0x558   : > { %v2399_v47 = vadd.f32 %v2398_v8, %v6080_v15  ;;  %v2428_v48 = vadd.f32 %v2427_v44, %v6082_v37  ;;  %v4205_v8 = vor.u32 %v4689_v39, %v4202_v42  ;;  %v4330_v44 = vld [vmem:[%s6445_s18 + $0x138] sm:$0xf0]  ;;  %v4757_v39 = vld [vmem:[%s6447_s20 + $0x48] sm:$0xff]  ;;  %v4756_v42 = vld [vmem:[%s6447_s20 + $0x40] sm:$0xff] }
 0x55a   : > { %v2447_v51 = vmax.f32 %v2399_v47, 0.0  ;;  %v2448_v52 = vmax.f32 %v2428_v48, 0.0  ;;  %v4200_v47 = vld [vmem:[%s6445_s18 + $0x28] sm:$0xf]  ;;  %v4691_v48 = vld [vmem:[%s6445_s18 + $0x34] sm:$0xf0]  ;;  %3043 = vmatpush.bf16.msra.mxu2 %v4205_v8 }
 0x55b   : > { %v4779_v8 = vld [vmem:[%s6447_s20 + $0xf8] sm:$0xff] }
 0x55c   : > { %v6112_v55 = vpack.c.bf16 %v2447_v51, %v2445_v49  ;;  %v6114_v57 = vpack.c.bf16 %v2448_v52, %v2446_v50  ;;  %v4333_v49 = vor.u32 %v4721_v43, %v4330_v44  ;;  %v4201_v50 = vor.u32 %v4691_v48, %v4200_v47  ;;  %v4328_v51 = vld [vmem:[%s6445_s18 + $0x128] sm:$0xf]  ;;  %v4723_v52 = vld [vmem:[%s6445_s18 + $0x134] sm:$0xf0]  ;;  %v6319_v44 = vld [vmem:[%s6446_s19] sm:$0xf] }
 0x55d   : > { %v4329_v59 = vor.u32 %v4723_v52, %v4328_v51  ;;  %v4771_v43 = vld [vmem:[%s6447_s20 + $0xb8] sm:$0xff]  ;;  %v4770_v47 = vld [vmem:[%s6447_s20 + $0xb0] sm:$0xff]  ;;  %v6335_v61 = vperm.slane %v6319_v44, 1 }
 0x55e   : > { %2871 = vmatmul.bf16.vlgmr.msrb.gmra.mxu0 %v6112_v55  ;;  %2900 = vmatmul.bf16.vlgmr.msrb.gmra.mxu1 %v6114_v57  ;;  %v4778_v52 = vld [vmem:[%s6447_s20 + $0xf0] sm:$0xff] }
 0x55f   : > { %2929 = vmatmul.bf16.vlgmr.msrb.gmra.mxu2 %v6112_v55  ;;  %2958 = vmatmul.bf16.vlgmr.msrb.gmra.mxu3 %v6114_v57  ;;  %v2401_v3 = vpop.f32.mrf.mxu2  ;;  %v2430_v4 = vpop.f32.mrf.mxu3 }
 0x560   : > { %v2402_v24 = vadd.f32 %v2401_v3, %v6080_v15  ;;  %v2431_v25 = vadd.f32 %v2430_v4, %v6082_v37  ;;  %3072 = vmatpush.bf16.msra.mxu3 %v4333_v49  ;;  %2985 = vmatpush.bf16.msra.mxu0 %v4201_v50  ;;  %v4185_v3 = vor.u32 %v4687_v1, %v4184_v56  ;;  %v4312_v4 = vld [vmem:[%s6445_s18 + $0x108] sm:$0xf]  ;;  %v6325_v50 = vperm.slane %v6319_v44, 0 }
 0x561   : > { %3014 = vmatpush.bf16.msra.mxu1 %v4329_v59  ;;  %v4313_v41 = vor.u32 %v4719_v7, %v4312_v4  ;;  %3044 = vmatpush.bf16.msra.mxu2 %v4189_v62  ;;  %v4777_v4 = vld [vmem:[%s6447_s20 + $0xe8] sm:$0xff] }
 0x562   : > { %v2449_v30 = vmax.f32 %v2402_v24, 0.0  ;;  %v2450_v31 = vmax.f32 %v2431_v25, 0.0 }
 0x564   : > { %3073 = vmatpush.bf16.msra.mxu3 %v4317_v2  ;;  %2986 = vmatpush.bf16.msra.mxu0 %v4185_v3 }
 0x565   : > { %3015 = vmatpush.bf16.msra.mxu1 %v4313_v41  ;;  %3461 = vmatpush.bf16.msrb.mxu2 %v4771_v43 }
 0x567   : > { %v2403_v26 = vpop.f32.mrf.mxu2  ;;  %v2432_v27 = vpop.f32.mrf.mxu3 }
 0x568   : > { %v2404_v28 = vadd.f32 %v2403_v26, %v6080_v15  ;;  %v2433_v29 = vadd.f32 %v2432_v27, %v6082_v37  ;;  %3490 = vmatpush.bf16.msrb.mxu3 %v4779_v8 }
 0x569   : > { %3462 = vmatpush.bf16.msrb.mxu2 %v4770_v47 }
 0x56a   : > { %v2451_v34 = vmax.f32 %v2404_v28, 0.0  ;;  %v2452_v35 = vmax.f32 %v2433_v29, 0.0 }
 0x56c   : > { %v6172_v14 = vpack.c.bf16 %v2451_v34, %v2449_v30  ;;  %v6174_v36 = vpack.c.bf16 %v2452_v35, %v2450_v31  ;;  %3491 = vmatpush.bf16.msrb.mxu3 %v4778_v52 }
 0x56d   : > { %3463 = vmatpush.bf16.msrb.mxu2 %v4769_v58  ;;  %v4773_v58 = vld [vmem:[%s6447_s20 + $0xc8] sm:$0xff] }
 0x56e   : > { %2876 = vmatmul.bf16.gmra.mxu0 %v6172_v14  ;;  %2905 = vmatmul.bf16.gmra.mxu1 %v6174_v36 }
 0x56f   : > { %2934 = vmatmul.bf16.gmra.mxu2 %v6172_v14  ;;  %2963 = vmatmul.bf16.gmra.mxu3 %v6174_v36  ;;  %v2406_v5 = vpop.f32.mrf.mxu2  ;;  %v2435_v6 = vpop.f32.mrf.mxu3 }
 0x570   : > { %v2407_v11 = vadd.f32 %v2406_v5, %v6080_v15  ;;  %v2436_v12 = vadd.f32 %v2435_v6, %v6082_v37  ;;  %v4758_v5 = vld [vmem:[%s6447_s20 + $0x50] sm:$0xff]  ;;  %v4748_v6 = vld [vmem:[%s6447_s20] sm:$0xff]  ;;  %3492 = vmatpush.bf16.msrb.mxu3 %v4777_v4 }
 0x572   : > { %v2453_v19 = vmax.f32 %v2407_v11, 0.0  ;;  %v2454_v40 = vmax.f32 %v2436_v12, 0.0 }
 0x577   : > { %v2408_v13 = vpop.f32.mrf.mxu2  ;;  %v2437_v16 = vpop.f32.mrf.mxu3 }
 0x578   : > { %v2409_v17 = vadd.f32 %v2408_v13, %v6080_v15  ;;  %v2438_v18 = vadd.f32 %v2437_v16, %v6082_v37  ;;  %v4768_v16 = vld [vmem:[%s6447_s20 + $0xa0] sm:$0xff] }
 0x579   : > { %3464 = vmatpush.bf16.msrb.mxu2 %v4768_v16 }
 0x57a   : > { %v2455_v63 = vmax.f32 %v2409_v17, 0.0  ;;  %v2456_v20 = vmax.f32 %v2438_v18, 0.0 }
 0x57c   : > { %v2465_v21 = vpack.c.bf16 %v2455_v63, %v2453_v19  ;;  %v2466_v22 = vpack.c.bf16 %v2456_v20, %v2454_v40 }
 0x57e   : > { %2881 = vmatmul.bf16.gmra.mxu0 %v2465_v21  ;;  %2910 = vmatmul.bf16.gmra.mxu1 %v2466_v22 }
 0x57f   : > { %2939 = vmatmul.bf16.gmra.mxu2 %v2465_v21  ;;  %2968 = vmatmul.bf16.gmra.mxu3 %v2466_v22  ;;  %v2411_v23 = vpop.f32.mrf.mxu2  ;;  %v2440_v24 = vpop.f32.mrf.mxu3 }
 0x580   : > { %v2412_v25 = vadd.f32 %v2411_v23, %v6080_v15  ;;  %v2441_v26 = vadd.f32 %v2440_v24, %v6082_v37  ;;  %v4776_v24 = vld [vmem:[%s6447_s20 + $0xe0] sm:$0xff] }
 0x581   : > { %3493 = vmatpush.bf16.msrb.mxu3 %v4776_v24 }
 0x582   : > { %v2457_v31 = vmax.f32 %v2412_v25, 0.0  ;;  %v2458_v34 = vmax.f32 %v2441_v26, 0.0  ;;  %v4767_v25 = vld [vmem:[%s6447_s20 + $0x98] sm:$0xff] }
 0x583   : > { %3465 = vmatpush.bf16.msrb.mxu2 %v4767_v25 }
 0x587   : > { %v2413_v27 = vpop.f32.mrf.mxu2  ;;  %v2442_v28 = vpop.f32.mrf.mxu3 }
 0x588   : > { %v2414_v29 = vadd.f32 %v2413_v27, %v6080_v15  ;;  %v2443_v30 = vadd.f32 %v2442_v28, %v6082_v37  ;;  %v4755_v15 = vld [vmem:[%s6447_s20 + $0x38] sm:$0xff]  ;;  %v4754_v37 = vld [vmem:[%s6447_s20 + $0x30] sm:$0xff] }
 0x589   : > { %3403 = vmatpush.bf16.msrb.mxu0 %v4755_v15 }
 0x58a   : > { %v2459_v35 = vmax.f32 %v2414_v29, 0.0  ;;  %v2460_v38 = vmax.f32 %v2443_v30, 0.0 }
 0x58c   : > { %v2467_v32 = vpack.c.bf16 %v2459_v35, %v2457_v31  ;;  %v2468_v33 = vpack.c.bf16 %v2460_v38, %v2458_v34  ;;  %v4775_v38 = vld [vmem:[%s6447_s20 + $0xd8] sm:$0xff] }
 0x58d   : > { %3404 = vmatpush.bf16.msrb.mxu0 %v4754_v37  ;;  %3494 = vmatpush.bf16.msrb.mxu3 %v4775_v38 }
 0x58e   : > { %2886 = vmatmul.bf16.gmra.mxu0 %v2467_v32  ;;  %2915 = vmatmul.bf16.gmra.mxu1 %v2468_v33 }
 0x58f   : > { %2944 = vmatmul.bf16.gmra.mxu2 %v2467_v32  ;;  %2973 = vmatmul.bf16.gmra.mxu3 %v2468_v33 }
 0x59e   : > { %2987 = vmatmul.bf16.vlgmr.msra.gmra.mxu0 %v6112_v55  ;;  %3016 = vmatmul.bf16.vlgmr.msra.gmra.mxu1 %v6114_v57 }
 0x59f   : > { %3045 = vmatmul.bf16.vlgmr.msra.gmra.mxu2 %v6112_v55  ;;  %3074 = vmatmul.bf16.vlgmr.msra.gmra.mxu3 %v6114_v57  ;;  %v4763_v55 = vld [vmem:[%s6447_s20 + $0x78] sm:$0xff]  ;;  %v4753_v57 = vld [vmem:[%s6447_s20 + $0x28] sm:$0xff] }
 0x5a0   : > { %3432 = vmatpush.bf16.msrb.mxu1 %v4763_v55  ;;  %3405 = vmatpush.bf16.msrb.mxu0 %v4753_v57  ;;  %v4766_v57 = vld [vmem:[%s6447_s20 + $0x90] sm:$0xff] }
 0x5a1   : > { %3466 = vmatpush.bf16.msrb.mxu2 %v4766_v57  ;;  %v6390_v57 = vperm.slane %v6319_v44, 3 }
 0x5ae   : > { %2992 = vmatmul.bf16.gmra.mxu0 %v6172_v14  ;;  %3021 = vmatmul.bf16.gmra.mxu1 %v6174_v36 }
 0x5af   : > { %3050 = vmatmul.bf16.gmra.mxu2 %v6172_v14  ;;  %3079 = vmatmul.bf16.gmra.mxu3 %v6174_v36  ;;  %v4762_v14 = vld [vmem:[%s6447_s20 + $0x70] sm:$0xff]  ;;  %v4752_v36 = vld [vmem:[%s6447_s20 + $0x20] sm:$0xff] }
 0x5b0   : > { %3433 = vmatpush.bf16.msrb.mxu1 %v4762_v14  ;;  %3406 = vmatpush.bf16.msrb.mxu0 %v4752_v36 }
 0x5b4   : > { %3434 = vmatpush.bf16.msrb.mxu1 %v4761_v53  ;;  %3407 = vmatpush.bf16.msrb.mxu0 %v4751_v54 }
 0x5b8   : > { %3435 = vmatpush.bf16.msrb.mxu1 %v4760_v9  ;;  %3408 = vmatpush.bf16.msrb.mxu0 %v4750_v10 }
 0x5bc   : > { %3436 = vmatpush.bf16.msrb.mxu1 %v4759_v45  ;;  %3409 = vmatpush.bf16.msrb.mxu0 %v4749_v46 }
 0x5be   : > { %2997 = vmatmul.bf16.gmra.mxu0 %v2465_v21  ;;  %3026 = vmatmul.bf16.gmra.mxu1 %v2466_v22 }
 0x5bf   : > { %3055 = vmatmul.bf16.gmra.mxu2 %v2465_v21  ;;  %3084 = vmatmul.bf16.gmra.mxu3 %v2466_v22 }
 0x5c0   : > { %3437 = vmatpush.bf16.msrb.mxu1 %v4758_v5  ;;  %3410 = vmatpush.bf16.msrb.mxu0 %v4748_v6  ;;  %v4774_v6 = vld [vmem:[%s6447_s20 + $0xd0] sm:$0xff] }
 0x5c1   : > { %3495 = vmatpush.bf16.msrb.mxu3 %v4774_v6 }
 0x5c4   : > { %3438 = vmatpush.bf16.msrb.mxu1 %v4757_v39  ;;  %v4765_v39 = vld [vmem:[%s6447_s20 + $0x88] sm:$0xff] }
 0x5c5   : > { %3467 = vmatpush.bf16.msrb.mxu2 %v4765_v39  ;;  %3496 = vmatpush.bf16.msrb.mxu3 %v4773_v58 }
 0x5c8   : > { %3439 = vmatpush.bf16.msrb.mxu1 %v4756_v42 }
 0x5ce   : > { %3002 = vmatmul.bf16.gmra.mxu0 %v2467_v32  ;;  %3031 = vmatmul.bf16.gmra.mxu1 %v2468_v33 }
 0x5cf   : > { %3060 = vmatmul.bf16.gmra.mxu2 %v2467_v32  ;;  %3089 = vmatmul.bf16.gmra.mxu3 %v2468_v33 }
 0x5db   : > { %v2872_v48 = vpop.f32.mrf.mxu0  ;;  %v2901_v49 = vpop.f32.mrf.mxu1 }
 0x5dc   : > { %v2873_v51 = vadd.f32 %v2872_v48, %v6325_v50 }
 0x5de   : > { %v2902_v56 = vadd.f32 %v2901_v49, %v2873_v51 }
 0x5e0   : > { %v3095_v7 = vmax.f32 %v2902_v56, 0.0 }
 0x5e2   : > { %v2930_v59 = vpop.f32.mrf.mxu2  ;;  %v2959_v60 = vpop.f32.mrf.mxu3 }
 0x5e3   : > { %v2874_v62 = vpop.f32.mrf.mxu0  ;;  %v2903_v0 = vpop.f32.mrf.mxu1  ;;  %v2931_v3 = vadd.f32 %v2930_v59, %v6335_v61 }
 0x5e4   : > { %v2875_v1 = vadd.f32 %v2874_v62, %v6325_v50  ;;  %v4764_v62 = vld [vmem:[%s6447_s20 + $0x80] sm:$0xff] }
 0x5e5   : > { %v2960_v17 = vadd.f32 %v2959_v60, %v2931_v3  ;;  %3468 = vmatpush.bf16.msrb.mxu2 %v4764_v62 }
 0x5e6   : > { %v2904_v2 = vadd.f32 %v2903_v0, %v2875_v1 }
 0x5e7   : > { %v3096_v20 = vmax.f32 %v2960_v17, 0.0 }
 0x5e8   : > { %v3099_v41 = vmax.f32 %v2904_v2, 0.0 }
 0x5ea   : > { %v3127_v11 = vpack.c.bf16 %v3099_v41, %v3095_v7  ;;  %v2932_v12 = vpop.f32.mrf.mxu2  ;;  %v2961_v13 = vpop.f32.mrf.mxu3 }
 0x5eb   : > { %v2933_v18 = vadd.f32 %v2932_v12, %v6335_v61  ;;  %v2877_v19 = vpop.f32.mrf.mxu0  ;;  %v2906_v40 = vpop.f32.mrf.mxu1 }
 0x5ec   : > { %3411 = vmatmul.bf16.vlgmr.msrb.gmra.mxu0 %v3127_v11  ;;  %v2878_v22 = vadd.f32 %v2877_v19, %v6325_v50  ;;  %v4772_v11 = vld [vmem:[%s6447_s20 + $0xc0] sm:$0xff] }
 0x5ed   : > { %v2962_v63 = vadd.f32 %v2961_v13, %v2933_v18  ;;  %3497 = vmatpush.bf16.msrb.mxu3 %v4772_v11 }
 0x5ee   : > { %v2907_v30 = vadd.f32 %v2906_v40, %v2878_v22 }
 0x5ef   : > { %v3100_v21 = vmax.f32 %v2962_v63, 0.0 }
 0x5f0   : > { %v3103_v32 = vmax.f32 %v2907_v30, 0.0 }
 0x5f1   : > { %v3128_v23 = vpack.c.bf16 %v3100_v21, %v3096_v20 }
 0x5f2   : > { %v2935_v26 = vpop.f32.mrf.mxu2  ;;  %v2964_v27 = vpop.f32.mrf.mxu3 }
 0x5f3   : > { %3440 = vmatmul.bf16.vlgmr.msrb.gmra.mxu1 %v3128_v23  ;;  %v2879_v28 = vpop.f32.mrf.mxu0  ;;  %v2908_v29 = vpop.f32.mrf.mxu1  ;;  %v2936_v35 = vadd.f32 %v2935_v26, %v6335_v61 }
 0x5f4   : > { %v2880_v31 = vadd.f32 %v2879_v28, %v6325_v50 }
 0x5f5   : > { %v2965_v14 = vadd.f32 %v2964_v27, %v2936_v35  ;;  %v6386_v35 = vperm.slane %v6319_v44, 2 }
 0x5f6   : > { %v2909_v34 = vadd.f32 %v2908_v29, %v2880_v31 }
 0x5f7   : > { %v3104_v10 = vmax.f32 %v2965_v14, 0.0 }
 0x5f8   : > { %v3107_v33 = vmax.f32 %v2909_v34, 0.0 }
 0x5fa   : > { %v3131_v15 = vpack.c.bf16 %v3107_v33, %v3103_v32  ;;  %v2937_v37 = vpop.f32.mrf.mxu2  ;;  %v2966_v55 = vpop.f32.mrf.mxu3 }
 0x5fb   : > { %v2938_v36 = vadd.f32 %v2937_v37, %v6335_v61  ;;  %v2882_v53 = vpop.f32.mrf.mxu0  ;;  %v2911_v54 = vpop.f32.mrf.mxu1 }
 0x5fc   : > { %3416 = vmatmul.bf16.gmra.mxu0 %v3131_v15  ;;  %v2883_v46 = vadd.f32 %v2882_v53, %v6325_v50 }
 0x5fd   : > { %v2967_v9 = vadd.f32 %v2966_v55, %v2938_v36 }
 0x5fe   : > { %v2912_v48 = vadd.f32 %v2911_v54, %v2883_v46 }
 0x5ff   : > { %v3108_v45 = vmax.f32 %v2967_v9, 0.0 }
 0x600   : > { %v3111_v59 = vmax.f32 %v2912_v48, 0.0 }
 0x601   : > { %v3132_v5 = vpack.c.bf16 %v3108_v45, %v3104_v10 }
 0x602   : > { %v2940_v42 = vpop.f32.mrf.mxu2  ;;  %v2969_v43 = vpop.f32.mrf.mxu3 }
 0x603   : > { %3445 = vmatmul.bf16.gmra.mxu1 %v3132_v5  ;;  %v2884_v8 = vpop.f32.mrf.mxu0  ;;  %v2913_v47 = vpop.f32.mrf.mxu1  ;;  %v2941_v52 = vadd.f32 %v2940_v42, %v6335_v61 }
 0x604   : > { %v2885_v49 = vadd.f32 %v2884_v8, %v6325_v50 }
 0x605   : > { %v2970_v2 = vadd.f32 %v2969_v43, %v2941_v52 }
 0x606   : > { %v2914_v51 = vadd.f32 %v2913_v47, %v2885_v49 }
 0x607   : > { %v3112_v12 = vmax.f32 %v2970_v2, 0.0 }
 0x608   : > { %v3115_v60 = vmax.f32 %v2914_v51, 0.0 }
 0x60a   : > { %v3135_v0 = vpack.c.bf16 %v3115_v60, %v3111_v59  ;;  %v2942_v56 = vpop.f32.mrf.mxu2  ;;  %v2971_v1 = vpop.f32.mrf.mxu3 }
 0x60b   : > { %v2943_v3 = vadd.f32 %v2942_v56, %v6335_v61  ;;  %v2887_v4 = vpop.f32.mrf.mxu0  ;;  %v2916_v7 = vpop.f32.mrf.mxu1 }
 0x60c   : > { %3421 = vmatmul.bf16.gmra.mxu0 %v3135_v0  ;;  %v2888_v16 = vadd.f32 %v2887_v4, %v6325_v50 }
 0x60d   : > { %v2972_v41 = vadd.f32 %v2971_v1, %v2943_v3 }
 0x60e   : > { %v2917_v20 = vadd.f32 %v2916_v7, %v2888_v16 }
 0x60f   : > { %v3116_v13 = vmax.f32 %v2972_v41, 0.0 }
 0x610   : > { %v3119_v24 = vmax.f32 %v2917_v20, 0.0 }
 0x611   : > { %v3136_v17 = vpack.c.bf16 %v3116_v13, %v3112_v12 }
 0x612   : > { %v2945_v18 = vpop.f32.mrf.mxu2  ;;  %v2974_v19 = vpop.f32.mrf.mxu3 }
 0x613   : > { %3450 = vmatmul.bf16.gmra.mxu1 %v3136_v17  ;;  %v2889_v40 = vpop.f32.mrf.mxu0  ;;  %v2918_v63 = vpop.f32.mrf.mxu1  ;;  %v2946_v23 = vadd.f32 %v2945_v18, %v6335_v61 }
 0x614   : > { %v2890_v21 = vadd.f32 %v2889_v40, %v6325_v50 }
 0x615   : > { %v2975_v29 = vadd.f32 %v2974_v19, %v2946_v23 }
 0x616   : > { %v2919_v22 = vadd.f32 %v2918_v63, %v2890_v21 }
 0x617   : > { %v3120_v32 = vmax.f32 %v2975_v29, 0.0 }
 0x618   : > { %v3123_v25 = vmax.f32 %v2919_v22, 0.0 }
 0x61a   : > { %v3139_v26 = vpack.c.bf16 %v3123_v25, %v3119_v24  ;;  %v2947_v27 = vpop.f32.mrf.mxu2  ;;  %v2976_v28 = vpop.f32.mrf.mxu3 }
 0x61b   : > { %v2948_v30 = vadd.f32 %v2947_v27, %v6335_v61  ;;  %v2988_v31 = vpop.f32.mrf.mxu0  ;;  %v3017_v34 = vpop.f32.mrf.mxu1 }
 0x61c   : > { %3426 = vmatmul.bf16.gmra.mxu0 %v3139_v26  ;;  %v2989_v33 = vadd.f32 %v2988_v31, %v6386_v35 }
 0x61d   : > { %v2977_v38 = vadd.f32 %v2976_v28, %v2948_v30 }
 0x61e   : > { %v3018_v36 = vadd.f32 %v3017_v34, %v2989_v33 }
 0x61f   : > { %v3124_v50 = vmax.f32 %v2977_v38, 0.0 }
 0x620   : > { %v3097_v10 = vmax.f32 %v3018_v36, 0.0 }
 0x621   : > { %v3140_v15 = vpack.c.bf16 %v3124_v50, %v3120_v32 }
 0x622   : > { %v3046_v37 = vpop.f32.mrf.mxu2  ;;  %v3075_v55 = vpop.f32.mrf.mxu3 }
 0x623   : > { %3455 = vmatmul.bf16.gmra.mxu1 %v3140_v15  ;;  %v2990_v14 = vpop.f32.mrf.mxu0  ;;  %v3019_v61 = vpop.f32.mrf.mxu1  ;;  %v3047_v9 = vadd.f32 %v3046_v37, %v6390_v57 }
 0x624   : > { %v2991_v53 = vadd.f32 %v2990_v14, %v6386_v35 }
 0x625   : > { %v3076_v39 = vadd.f32 %v3075_v55, %v3047_v9 }
 0x626   : > { %v3020_v54 = vadd.f32 %v3019_v61, %v2991_v53 }
 0x627   : > { %v3098_v47 = vmax.f32 %v3076_v39, 0.0 }
 0x628   : > { %v3101_v45 = vmax.f32 %v3020_v54, 0.0 }
 0x62a   : > { %v3129_v46 = vpack.c.bf16 %v3101_v45, %v3097_v10  ;;  %v3048_v5 = vpop.f32.mrf.mxu2  ;;  %v3077_v6 = vpop.f32.mrf.mxu3 }
 0x62b   : > { %v3049_v42 = vadd.f32 %v3048_v5, %v6390_v57  ;;  %v2993_v43 = vpop.f32.mrf.mxu0  ;;  %v3022_v44 = vpop.f32.mrf.mxu1 }
 0x62c   : > { %3469 = vmatmul.bf16.vlgmr.msrb.gmra.mxu2 %v3129_v46  ;;  %v2994_v49 = vadd.f32 %v2993_v43, %v6386_v35 }
 0x62d   : > { %v3078_v8 = vadd.f32 %v3077_v6, %v3049_v42 }
 0x62e   : > { %v3023_v62 = vadd.f32 %v3022_v44, %v2994_v49 }
 0x62f   : > { %v3102_v48 = vmax.f32 %v3078_v8, 0.0 }
 0x630   : > { %v3105_v2 = vmax.f32 %v3023_v62, 0.0  ;;  %v4794_v62 = vld [vmem:[%s6448_s21] ss:$0 sm:$0xff] }
 0x631   : > { %v3130_v51 = vpack.c.bf16 %v3102_v48, %v3098_v47 }
 0x632   : > { %v3051_v52 = vpop.f32.mrf.mxu2  ;;  %v3080_v58 = vpop.f32.mrf.mxu3 }
 0x633   : > { %3498 = vmatmul.bf16.vlgmr.msrb.gmra.mxu3 %v3130_v51  ;;  %v2995_v59 = vpop.f32.mrf.mxu0  ;;  %v3024_v60 = vpop.f32.mrf.mxu1  ;;  %v3052_v1 = vadd.f32 %v3051_v52, %v6390_v57 }
 0x634   : > { %v2996_v0 = vadd.f32 %v2995_v59, %v6386_v35 }
 0x635   : > { %v3081_v11 = vadd.f32 %v3080_v58, %v3052_v1 }
 0x636   : > { %v3025_v56 = vadd.f32 %v3024_v60, %v2996_v0 }
 0x637   : > { %v3106_v18 = vmax.f32 %v3081_v11, 0.0 }
 0x638   : > { %v3109_v3 = vmax.f32 %v3025_v56, 0.0 }
 0x63a   : > { %v3133_v4 = vpack.c.bf16 %v3109_v3, %v3105_v2  ;;  %v3053_v7 = vpop.f32.mrf.mxu2  ;;  %v3082_v41 = vpop.f32.mrf.mxu3 }
 0x63b   : > { %v3054_v12 = vadd.f32 %v3053_v7, %v6390_v57  ;;  %v2998_v13 = vpop.f32.mrf.mxu0  ;;  %v3027_v16 = vpop.f32.mrf.mxu1 }
 0x63c   : > { %3474 = vmatmul.bf16.gmra.mxu2 %v3133_v4  ;;  %v2999_v40 = vadd.f32 %v2998_v13, %v6386_v35 }
 0x63d   : > { %v3083_v17 = vadd.f32 %v3082_v41, %v3054_v12 }
 0x63e   : > { %v3028_v24 = vadd.f32 %v3027_v16, %v2999_v40 }
 0x63f   : > { %v3110_v19 = vmax.f32 %v3083_v17, 0.0 }
 0x640   : > { %v3113_v28 = vmax.f32 %v3028_v24, 0.0 }
 0x641   : > { %v3134_v63 = vpack.c.bf16 %v3110_v19, %v3106_v18 }
 0x642   : > { %v3056_v20 = vpop.f32.mrf.mxu2  ;;  %v3085_v21 = vpop.f32.mrf.mxu3 }
 0x643   : > { %3503 = vmatmul.bf16.gmra.mxu3 %v3134_v63  ;;  %v3000_v22 = vpop.f32.mrf.mxu0  ;;  %v3029_v23 = vpop.f32.mrf.mxu1  ;;  %v3057_v27 = vadd.f32 %v3056_v20, %v6390_v57 }
 0x644   : > { %v3001_v25 = vadd.f32 %v3000_v22, %v6386_v35 }
 0x645   : > { %v3086_v38 = vadd.f32 %v3085_v21, %v3057_v27 }
 0x646   : > { %v3030_v26 = vadd.f32 %v3029_v23, %v3001_v25 }
 0x647   : > { %v3114_v37 = vmax.f32 %v3086_v38, 0.0 }
 0x648   : > { %v3117_v29 = vmax.f32 %v3030_v26, 0.0 }
 0x64a   : > { %v3137_v30 = vpack.c.bf16 %v3117_v29, %v3113_v28  ;;  %v3058_v31 = vpop.f32.mrf.mxu2  ;;  %v3087_v34 = vpop.f32.mrf.mxu3 }
 0x64b   : > { %v3059_v32 = vadd.f32 %v3058_v31, %v6390_v57  ;;  %v3003_v50 = vpop.f32.mrf.mxu0  ;;  %v3032_v33 = vpop.f32.mrf.mxu1 }
 0x64c   : > { %3479 = vmatmul.bf16.gmra.mxu2 %v3137_v30  ;;  %v3004_v14 = vadd.f32 %v3003_v50, %v6386_v35 }
 0x64d   : > { %v3088_v15 = vadd.f32 %v3087_v34, %v3059_v32 }
 0x64e   : > { %v3033_v9 = vadd.f32 %v3032_v33, %v3004_v14 }
 0x64f   : > { %v3118_v55 = vmax.f32 %v3088_v15, 0.0 }
 0x650   : > { %v3121_v6 = vmax.f32 %v3033_v9, 0.0 }
 0x651   : > { %v3138_v61 = vpack.c.bf16 %v3118_v55, %v3114_v37 }
 0x652   : > { %v3061_v36 = vpop.f32.mrf.mxu2  ;;  %v3090_v53 = vpop.f32.mrf.mxu3 }
 0x653   : > { %3508 = vmatmul.bf16.gmra.mxu3 %v3138_v61  ;;  %v3005_v54 = vpop.f32.mrf.mxu0  ;;  %v3034_v45 = vpop.f32.mrf.mxu1  ;;  %v3062_v5 = vadd.f32 %v3061_v36, %v6390_v57 }
 0x654   : > { %v3006_v10 = vadd.f32 %v3005_v54, %v6386_v35 }
 0x655   : > { %v3091_v44 = vadd.f32 %v3090_v53, %v3062_v5 }
 0x656   : > { %v3035_v46 = vadd.f32 %v3034_v45, %v3006_v10 }
 0x657   : > { %v3122_v49 = vmax.f32 %v3091_v44, 0.0 }
 0x658   : > { %v3125_v39 = vmax.f32 %v3035_v46, 0.0 }
 0x65a   : > { %v3141_v42 = vpack.c.bf16 %v3125_v39, %v3121_v6  ;;  %v3063_v43 = vpop.f32.mrf.mxu2  ;;  %v3092_v47 = vpop.f32.mrf.mxu3 }
 0x65b   : > { %v3064_v8 = vadd.f32 %v3063_v43, %v6390_v57 }
 0x65c   : > { %3484 = vmatmul.bf16.gmra.mxu2 %v3141_v42 }
 0x65d   : > { %v3093_v48 = vadd.f32 %v3092_v47, %v3064_v8 }
 0x65f   : > { %v3126_v51 = vmax.f32 %v3093_v48, 0.0 }
 0x661   : > { %v3142_v52 = vpack.c.bf16 %v3126_v51, %v3122_v49 }
 0x663   : > { %3513 = vmatmul.bf16.gmra.mxu3 %v3142_v52 }
 0x669   : > { %v3412_v35 = vpop.f32.mrf.mxu0 }
 0x66a   : > { %v3413_v56 = vadd.f32 %v4794_v62, %v3412_v35 }
 0x670   : > { %v3441_v58 = vpop.f32.mrf.mxu1 }
 0x671   : > { %v3414_v59 = vpop.f32.mrf.mxu0  ;;  %v3442_v1 = vadd.f32 %v3441_v58, %v3413_v56 }
 0x672   : > { %v3415_v11 = vadd.f32 %v4794_v62, %v3414_v59 }
 0x678   : > { %v3443_v60 = vpop.f32.mrf.mxu1 }
 0x679   : > { %v3417_v57 = vpop.f32.mrf.mxu0  ;;  %v3444_v12 = vadd.f32 %v3443_v60, %v3415_v11 }
 0x67a   : > { %v3418_v63 = vadd.f32 %v4794_v62, %v3417_v57 }
 0x680   : > { %v3446_v3 = vpop.f32.mrf.mxu1 }
 0x681   : > { %v3419_v16 = vpop.f32.mrf.mxu0  ;;  %v3447_v20 = vadd.f32 %v3446_v3, %v3418_v63 }
 0x682   : > { %v3420_v26 = vadd.f32 %v4794_v62, %v3419_v16 }
 0x688   : > { %v3448_v40 = vpop.f32.mrf.mxu1 }
 0x689   : > { %v3422_v25 = vpop.f32.mrf.mxu0  ;;  %v3449_v28 = vadd.f32 %v3448_v40, %v3420_v26 }
 0x68a   : > { %v3423_v38 = vadd.f32 %v4794_v62, %v3422_v25 }
 0x690   : > { %v3451_v27 = vpop.f32.mrf.mxu1 }
 0x691   : > { %v3424_v32 = vpop.f32.mrf.mxu0  ;;  %v3452_v50 = vadd.f32 %v3451_v27, %v3423_v38 }
 0x692   : > { %v3425_v61 = vadd.f32 %v4794_v62, %v3424_v32 }
 0x698   : > { %v3453_v33 = vpop.f32.mrf.mxu1 }
 0x699   : > { %v3454_v36 = vadd.f32 %v3453_v33, %v3425_v61  ;;  %v3427_v53 = vpop.f32.mrf.mxu0 }
 0x69a   : > { %v3428_v5 = vadd.f32 %v4794_v62, %v3427_v53 }
 0x6a0   : > { %v3456_v9 = vpop.f32.mrf.mxu1 }
 0x6a1   : > { %v3457_v6 = vadd.f32 %v3456_v9, %v3428_v5  ;;  %v3429_v42 = vpop.f32.mrf.mxu0 }
 0x6a2   : > { %v3430_v47 = vadd.f32 %v4794_v62, %v3429_v42 }
 0x6a8   : > { %v3458_v8 = vpop.f32.mrf.mxu1 }
 0x6a9   : > { %v3459_v49 = vadd.f32 %v3458_v8, %v3430_v47 }
 0x6af   : > { %v3470_v0 = vpop.f32.mrf.mxu2 }
 0x6b0   : > { %v3471_v2 = vadd.f32 %v3470_v0, %v3442_v1 }
 0x6b6   : > { %v3499_v4 = vpop.f32.mrf.mxu3 }
 0x6b7   : > { %v3500_v7 = vadd.f32 %v3499_v4, %v3471_v2  ;;  %v3472_v41 = vpop.f32.mrf.mxu2 }
 0x6b8   : > { %v3473_v13 = vadd.f32 %v3472_v41, %v3444_v12 }
 0x6b9   : > { %3519 = vst [vmem:[%s6414_s24] sm:$0xff] %v3500_v7 }
 0x6be   : > { %v3501_v17 = vpop.f32.mrf.mxu3 }
 0x6bf   : > { %v3502_v18 = vadd.f32 %v3501_v17, %v3473_v13  ;;  %v3475_v19 = vpop.f32.mrf.mxu2 }
 0x6c0   : > { %v3476_v21 = vadd.f32 %v3475_v19, %v3447_v20 }
 0x6c1   : > { %3520 = vst [vmem:[%s6414_s24 + $0x8] sm:$0xff] %v3502_v18 }
 0x6c6   : > { %v3504_v22 = vpop.f32.mrf.mxu3 }
 0x6c7   : > { %v3505_v23 = vadd.f32 %v3504_v22, %v3476_v21  ;;  %v3477_v24 = vpop.f32.mrf.mxu2 }
 0x6c8   : > { %v3478_v29 = vadd.f32 %v3477_v24, %v3449_v28 }
 0x6c9   : > { %3521 = vst [vmem:[%s6414_s24 + $0x10] sm:$0xff] %v3505_v23 }
 0x6ce   : > { %v3506_v30 = vpop.f32.mrf.mxu3 }
 0x6cf   : > { %v3507_v31 = vadd.f32 %v3506_v30, %v3478_v29  ;;  %v3480_v34 = vpop.f32.mrf.mxu2 }
 0x6d0   : > { %v3481_v15 = vadd.f32 %v3480_v34, %v3452_v50 }
 0x6d1   : > { %3522 = vst [vmem:[%s6414_s24 + $0x18] sm:$0xff] %v3507_v31 }
 0x6d6   : > { %v3509_v37 = vpop.f32.mrf.mxu3 }
 0x6d7   : > { %v3510_v55 = vadd.f32 %v3509_v37, %v3481_v15  ;;  %v3482_v14 = vpop.f32.mrf.mxu2 }
 0x6d8   : > { %v3483_v54 = vadd.f32 %v3482_v14, %v3454_v36 }
 0x6d9   : > { %3523 = vst [vmem:[%s6414_s24 + $0x20] sm:$0xff] %v3510_v55 }
 0x6de   : > { %v3511_v10 = vpop.f32.mrf.mxu3 }
 0x6df   : > { %v3512_v45 = vadd.f32 %v3511_v10, %v3483_v54  ;;  %v3485_v46 = vpop.f32.mrf.mxu2 }
 0x6e0   : > { %v3486_v39 = vadd.f32 %v3485_v46, %v3457_v6 }
 0x6e1   : > { %3524 = vst [vmem:[%s6414_s24 + $0x28] sm:$0xff] %v3512_v45 }
 0x6e6   : > { %v3514_v43 = vpop.f32.mrf.mxu3 }
 0x6e7   : > { %v3515_v44 = vadd.f32 %v3514_v43, %v3486_v39  ;;  %v3487_v48 = vpop.f32.mrf.mxu2 }
 0x6e8   : > { %v3488_v51 = vadd.f32 %v3487_v48, %v3459_v49 }
 0x6e9   : > { %3525 = vst [vmem:[%s6414_s24 + $0x30] sm:$0xff] %v3515_v44 }
 0x6ee   : > { %v3516_v52 = vpop.f32.mrf.mxu3 }
 0x6ef   : > { %v3517_v35 = vadd.f32 %v3516_v52, %v3488_v51 }
 0x6f1   : > { %3526 = vst [vmem:[%s6414_s24 + $0x38] sm:$0xff] %v3517_v35 }
 0x6f2 PF: > { %s34_s4 = sadd.s32 1, %s4817_s4  }
 0x6f3   : > { %p31_p4 = scmp.ge.s32.totalorder %s34_s4, 4  }
 0x6f5   :  { %33 = sbr.rel (!%p31_p4) target bundleno = 9 (0x9), region = 153 }

</bundles_post_ra>
